<compile_context>
chip_gen: v5e
topology: v5e:2x2
jax: 0.10.0
libtpu: 0.0.40
codegen_flags: <defaults>
</compile_context>

<pallas_src>
from functools import partial

import numpy as np
import jax
import jax.numpy as jnp
from jax.experimental import pallas as pl
from jax.experimental.pallas import tpu as pltpu

# ----- module hyper-parameters (match TransformField.__init__ defaults) -----
W1 = 64
W2 = 256
OUT_DIM = 12
IN_CH_XYZ = 63
IN_CH_T = 13
VOXEL_SIZE = 0.005
POSITION_EMB_LEVEL = 10                      # args.position_emb_level
FRONT_IN = POSITION_EMB_LEVEL * 2 * 3 + 3    # 63 = front_net_in_dim
UNET_OUT = 64                                # MinkUNet per-point output dim
X76 = IN_CH_XYZ + IN_CH_T                    # 76 = x[:, :-3]
XCAT = 2 * X76                               # 152 = [x76 | x76[rep_idx]]
XCATB = XCAT + UNET_OUT                      # 216 = [x76 | xrep | back_feat]
NET_IN = X76 + UNET_OUT                      # 140 = network input width
MAX_TM = 1024                                # row tile (sweep 512/1024/2048)
MIN_TM = 128

# ----- packed weight / bias layout (every row offset is a multiple of 8) -----
_W_LAYOUT = (
    ("vfw0", XCAT, W1 + UNET_OUT),    # 152 x 128  block-diag [front_net.0 | unet-proj]
    ("fw1",  W1, W1),                 #  64 x  64  front_net.2
    ("bw0",  W1 + UNET_OUT, W1),      # 128 x  64  back_net.0 (un-split cat weight)
    ("bw1",  W1, W1),                 #  64 x  64  back_net.2
    ("bw2",  W1, W1),                 #  64 x  64  back_net.4
    ("nw0",  XCATB, W2),              # 216 x 256  network.0 (zero rows for xrep block)
    ("nw1",  W2, W2),                 # 256 x 256  network.2
    ("nw2a", W2, W2),                 # 256 x 256  network.4, rows for h
    ("nw2b", XCATB, W2),              # 216 x 256  network.4, rows for x_in (skip)
    ("nw3",  W2, W2),                 # 256 x 256  network.6
    ("nw4",  W2, OUT_DIM),            # 256 x  12  network.8
)
_W_OFF = {}
_off = 0
for _name, _rows, _cols in _W_LAYOUT:
    _W_OFF[_name] = _off
    _off += _rows
W_ROWS = _off                          # 1928
W_COLS = 256

_B_ORDER = ("vfb0", "fb1", "bb0", "bb1", "bb2", "nb0", "nb1", "nb2", "nb3", "nb4")
_B_ROW = {name: i for i, name in enumerate(_B_ORDER)}
N_BIAS = len(_B_ORDER)


# ------------------------------ fused Pallas kernel ------------------------------

def fused_field_kernel(xcat_ref, w_ref, b_ref, o_ref):
    """Whole per-point MLP chain for one row tile.

    xcat_ref: [TM, 152] bf16 = [x[:, :76] | x[:, :76][rep_idx]]
    w_ref   : [W_ROWS, 256] bf16, all weight matrices packed row-wise (see _W_LAYOUT)
    b_ref   : [N_BIAS, 256] f32,  one bias per row
    o_ref   : [TM, 12] f32
    """
    def lin(a, wname, bname, rows, cols):
        r0 = _W_OFF[wname]
        acc = jnp.dot(a, w_ref[r0:r0 + rows, 0:cols],
                      preferred_element_type=jnp.float32)
        i = _B_ROW[bname]
        return acc + b_ref[i:i + 1, 0:cols]

    def relu(v):
        return jnp.maximum(v, 0.0)

    def bf(v):
        return v.astype(jnp.bfloat16)

    xcat = xcat_ref[...]                                            # [TM, 152] bf16

    # front_net.0 and the per-voxel projection share one block-diagonal matmul.
    # TODO(synk): MinkUNet (torchsparse sparse 3D conv UNet) has no clean Pallas
    # equivalent; a per-voxel linear projection gathered back per point stands in.
    t = lin(xcat, "vfw0", "vfb0", XCAT, W1 + UNET_OUT)              # [TM, 128] f32
    ffeat = bf(lin(bf(relu(t[:, :W1])), "fw1", "fb1", W1, W1))      # front_net output
    pcd = bf(t[:, W1:W1 + UNET_OUT])                                # unet stand-in output

    # back_net on cat([front_feat, pcd]) — single un-split [128, 64] first layer.
    h = bf(relu(lin(jnp.concatenate([ffeat, pcd], axis=-1),
                    "bw0", "bb0", W1 + UNET_OUT, W1)))
    h = bf(relu(lin(h, "bw1", "bb1", W1, W1)))
    bfeat = bf(lin(h, "bw2", "bb2", W1, W1))                        # [TM, 64]

    # main network; x_in = cat([x76, back_feat]) is realized as [x76 | xrep | bfeat]
    # with zero weight rows for the xrep block, so x never needs lane re-slicing.
    # (xcat_ref re-read here to keep its live range short across the 64-wide chain.)
    xin = jnp.concatenate([xcat_ref[...], bfeat], axis=-1)          # [TM, 216] bf16
    h = bf(relu(lin(xin, "nw0", "nb0", XCATB, W2)))                 # network.0+1
    h = bf(relu(lin(h, "nw1", "nb1", W2, W2)))                      # network.2+3
    r0 = _W_OFF["nw2a"]
    skip = jnp.dot(h, w_ref[r0:r0 + W2, 0:W2],
                   preferred_element_type=jnp.float32)
    h = bf(relu(skip + lin(xin, "nw2b", "nb2", XCATB, W2)))         # network.4+5 (skip)
    h = bf(relu(lin(h, "nw3", "nb3", W2, W2)))                      # network.6+7
    o_ref[...] = lin(h, "nw4", "nb4", W2, OUT_DIM).astype(o_ref.dtype)  # network.8


# --------------------------- tile policy & pallas_call ---------------------------

def _num_tensorcores():
    """Best-effort TensorCores-per-chip (v7x=2, v5e/v6e=1); default to 1 if unknown."""
    try:
        info = pltpu.get_tpu_info()
        for name in ("num_cores", "core_count", "num_tensorcores",
                     "tensorcore_count", "cores_per_chip"):
            v = getattr(info, name, None)
            if isinstance(v, int) and v > 0:
                return v
    except Exception:
        pass
    try:
        if "v7" in jax.devices()[0].device_kind.lower():
            return 2
    except Exception:
        pass
    return 1


def _round_up(x, m):
    return ((x + m - 1) // m) * m


def _pick_tile(n, num_cores):
    """Largest row tile <= MAX_TM. Only multi-TensorCore chips (v7x) shrink the tile
    so the 'parallel' grid axis has at least one block per core; on 1-TC chips the
    grid is a serial loop and shrinking only adds per-step overhead."""
    tm = min(MAX_TM, _round_up(max(n, 8), 8))
    if num_cores > 1:
        while tm > MIN_TM and -(-n // tm) < num_cores:
            tm = max(MIN_TM, _round_up(tm // 2, 8))
    return tm


@partial(jax.jit, static_argnames=("tm",))
def _forward_device(params, x, rep_idx, tm):
    n = x.shape[0]
    x76 = x[:, :X76].astype(jnp.bfloat16)
    # gather the voxel-representative features and lane-concat with the per-point ones;
    # this (plus the small row pad below) fuses with the bf16 cast under jit.
    xcat = jnp.concatenate([x76, jnp.take(x76, rep_idx, axis=0)], axis=-1)  # [n, 152]
    rows = ((n + tm - 1) // tm) * tm
    if rows != n:
        xcat = jnp.pad(xcat, ((0, rows - n), (0, 0)))

    out = pl.pallas_call(
        fused_field_kernel,
        out_shape=jax.ShapeDtypeStruct((rows, OUT_DIM), jnp.float32),
        grid=(rows // tm,),
        in_specs=[
            pl.BlockSpec((tm, XCAT), lambda i: (i, 0)),           # per-point features
            pl.BlockSpec((W_ROWS, W_COLS), lambda i: (0, 0)),     # packed bf16 weights
            pl.BlockSpec((N_BIAS, W_COLS), lambda i: (0, 0)),     # packed f32 biases
        ],
        out_specs=pl.BlockSpec((tm, OUT_DIM), lambda i: (i, 0)),
        compiler_params=pltpu.CompilerParams(
            dimension_semantics=("parallel",),
            vmem_limit_bytes=32 * 1024 * 1024,
        ),
    )(xcat, params["wpack"], params["bpack"])
    return out[:n]


# ----------------------------- parameter setup ------------------------------

def _linear_init(key, fan_in, fan_out):
    kw, kb = jax.random.split(key)
    bound = float(1.0 / np.sqrt(fan_in))
    w = jax.random.uniform(kw, (fan_in, fan_out), jnp.float32, -bound, bound)
    b = jax.random.uniform(kb, (fan_out,), jnp.float32, -bound, bound)
    return w, b


def init_params(key):
    """Returns (packed kernel params, raw f32 weights for the pure-numpy reference)."""
    keys = jax.random.split(key, 11)
    fw0, fb0 = _linear_init(keys[0], FRONT_IN, W1)          # front_net.0 (63 -> 64)
    fw1, fb1 = _linear_init(keys[1], W1, W1)                # front_net.2
    vw, vb = _linear_init(keys[2], FRONT_IN, UNET_OUT)      # MinkUNet stand-in proj
    bw0, bb0 = _linear_init(keys[3], W1 + UNET_OUT, W1)     # back_net.0 (128 -> 64)
    bw1, bb1 = _linear_init(keys[4], W1, W1)                # back_net.2
    bw2, bb2 = _linear_init(keys[5], W1, W1)                # back_net.4
    nw0, nb0 = _linear_init(keys[6], NET_IN, W2)            # network.0 (140 -> 256)
    nw1, nb1 = _linear_init(keys[7], W2, W2)                # network.2
    nw2, nb2 = _linear_init(keys[8], W2 + NET_IN, W2)       # network.4 (396 -> 256)
    nw3, nb3 = _linear_init(keys[9], W2, W2)                # network.6
    nw4, nb4 = _linear_init(keys[10], W2, OUT_DIM)          # network.8

    # ---- fold every torch.cat into merged / zero-padded weight blocks ----
    # N-pack front_net.0 and the voxel projection into one block-diagonal matmul:
    # [x76 | xrep76] @ vfw0 -> [front_h | pcd].  (rows 63:76 are zero: time-emb no-op)
    vfw0 = jnp.zeros((XCAT, W1 + UNET_OUT), jnp.float32)
    vfw0 = vfw0.at[:FRONT_IN, :W1].set(fw0)
    vfw0 = vfw0.at[X76:X76 + FRONT_IN, W1:].set(vw)
    vfb0 = jnp.concatenate([fb0, vb])

    # network.0 / network.4 act on x_in = cat([x76, bfeat]); the kernel feeds
    # [x76 | xrep | bfeat], so insert zero rows for the xrep block.
    nw0m = jnp.zeros((XCATB, W2), jnp.float32)
    nw0m = nw0m.at[:X76].set(nw0[:X76])
    nw0m = nw0m.at[XCAT:].set(nw0[X76:])
    nw2a = nw2[:W2]
    nw2b = jnp.zeros((XCATB, W2), jnp.float32)
    nw2b = nw2b.at[:X76].set(nw2[W2:W2 + X76])
    nw2b = nw2b.at[XCAT:].set(nw2[W2 + X76:])

    mats = {"vfw0": vfw0, "fw1": fw1, "bw0": bw0, "bw1": bw1, "bw2": bw2,
            "nw0": nw0m, "nw1": nw1, "nw2a": nw2a, "nw2b": nw2b, "nw3": nw3, "nw4": nw4}
    wpack = jnp.zeros((W_ROWS, W_COLS), jnp.bfloat16)
    for name, rows, cols in _W_LAYOUT:
        off = _W_OFF[name]
        wpack = wpack.at[off:off + rows, :cols].set(mats[name].astype(jnp.bfloat16))

    biases = {"vfb0": vfb0, "fb1": fb1, "bb0": bb0, "bb1": bb1, "bb2": bb2,
              "nb0": nb0, "nb1": nb1, "nb2": nb2, "nb3": nb3, "nb4": nb4}
    bpack = jnp.zeros((N_BIAS, W_COLS), jnp.float32)
    for name in _B_ORDER:
        b = biases[name]
        bpack = bpack.at[_B_ROW[name], :b.shape[0]].set(b)

    params = {"wpack": wpack, "bpack": bpack}
    raw = {k: np.asarray(v, np.float32) for k, v in dict(
        fw0=fw0, fb0=fb0, fw1=fw1, fb1=fb1, vw=vw, vb=vb,
        bw0=bw0, bb0=bb0, bw1=bw1, bb1=bb1, bw2=bw2, bb2=bb2,
        nw0=nw0, nb0=nb0, nw1=nw1, nb1=nb1, nw2=nw2, nb2=nb2,
        nw3=nw3, nb3=nb3, nw4=nw4, nb4=nb4).items()}
    return params, raw


# --------------------------------- forward ----------------------------------

def _voxel_rep_idx(x_np):
    """sparse_quantize: voxelize xyz, dedup, map each point to its voxel representative.
    Host numpy mirrors the .cpu().numpy() path of the original module and runs once,
    entirely before the single kernel launch."""
    pc = np.round(x_np[:, -3:].astype(np.float32) / VOXEL_SIZE).astype(np.int32)
    _, inds, inverse_map = np.unique(pc, axis=0, return_index=True, return_inverse=True)
    inverse_map = np.asarray(inverse_map).reshape(-1)
    return inds[inverse_map].astype(np.int32), int(inds.shape[0])


def transform_field_forward(params, x, tm=None):
    """x: [N, 79] = [63 pos-emb | 13 time-emb | 3 raw xyz]. Returns (out[N,12], n_voxels)."""
    rep_idx, nv = _voxel_rep_idx(np.asarray(x))
    if tm is None:
        tm = _pick_tile(x.shape[0], _num_tensorcores())
    out = _forward_device(params, x, jnp.asarray(rep_idx), tm=tm)
    return out, nv


def _reference_forward(raw, x, rep_idx):
    """Pure-numpy f32 reference of the same forward math, using the un-merged weights."""
    relu = lambda v: np.maximum(v, 0.0)
    x = np.asarray(x, np.float32)
    x76, x63 = x[:, :X76], x[:, :FRONT_IN]
    ffeat = relu(x63 @ raw["fw0"] + raw["fb0"]) @ raw["fw1"] + raw["fb1"]
    pcd = x63[rep_idx] @ raw["vw"] + raw["vb"]
    h = relu(np.concatenate([ffeat, pcd], -1) @ raw["bw0"] + raw["bb0"])
    h = relu(h @ raw["bw1"] + raw["bb1"])
    bfeat = h @ raw["bw2"] + raw["bb2"]
    xin = np.concatenate([x76, bfeat], -1)
    h = relu(xin @ raw["nw0"] + raw["nb0"])
    h = relu(h @ raw["nw1"] + raw["nb1"])
    h = relu(np.concatenate([h, xin], -1) @ raw["nw2"] + raw["nb2"])
    h = relu(h @ raw["nw3"] + raw["nb3"])
    return h @ raw["nw4"] + raw["nb4"]


if __name__ == "__main__":
    key = jax.random.PRNGKey(0)
    kp, kx, kxyz = jax.random.split(key, 3)
    params, raw = init_params(kp)

    N = 200
    emb = jax.random.normal(kx, (N, X76), dtype=jnp.float32)                        # 76 cols
    xyz = jax.random.uniform(kxyz, (N, 3), dtype=jnp.float32, minval=-0.05, maxval=0.05)
    x = jnp.concatenate([emb, xyz], axis=-1)                                        # (200, 79)

    out, nv = transform_field_forward(params, x)
    out = jax.block_until_ready(out)

    assert out.shape == (N, OUT_DIM) and out.dtype == jnp.float32
    assert bool(jnp.all(jnp.isfinite(out)))
    assert 0 < nv <= N

    rep_idx, _ = _voxel_rep_idx(np.asarray(x))
    ref = _reference_forward(raw, np.asarray(x), rep_idx)
    np.testing.assert_allclose(np.asarray(out), ref, rtol=5e-2, atol=5e-2)

    print("KERNEL_OK")
</pallas_src>

<mosaic_0001>
module attributes {stable_mosaic.version = 11 : i64} {
  func.func @fused_field_kernel(%arg0: i32, %arg1: memref<200x152xbf16, #tpu.memory_space<vmem>>, %arg2: memref<1928x256xbf16, #tpu.memory_space<vmem>>, %arg3: memref<10x256xf32, #tpu.memory_space<vmem>>, %arg4: memref<200x12xf32, #tpu.memory_space<vmem>>) attributes {dimension_semantics = [#tpu.dimension_semantics<parallel>], iteration_bounds = array<i64: 1>, scalar_prefetch = 0 : i64, scratch_operands = 0 : i64, tpu.core_type = #tpu.core_type<tc>, window_params = [{transform_indices = @transform_0, window_bounds = array<i64: 200, 152>}, {pipeline_mode = #tpu.pipeline_mode<synchronous>, transform_indices = @transform_1, window_bounds = array<i64: 1928, 256>}, {pipeline_mode = #tpu.pipeline_mode<synchronous>, transform_indices = @transform_2, window_bounds = array<i64: 10, 256>}, {transform_indices = @transform_3, window_bounds = array<i64: 200, 12>}]} {
    %c0 = arith.constant 0 : index
    %c0_0 = arith.constant 0 : index
    %0 = vector.load %arg1[%c0, %c0_0] : memref<200x152xbf16, #tpu.memory_space<vmem>>, vector<200x152xbf16>
    %c0_1 = arith.constant 0 : index
    %c0_2 = arith.constant 0 : index
    %1 = vector.load %arg2[%c0_1, %c0_2] : memref<1928x256xbf16, #tpu.memory_space<vmem>>, vector<152x128xbf16>
    %cst = arith.constant dense<0.000000e+00> : vector<200x128xf32>
    %2 = tpu.matmul %0, %1, %cst {dimension_numbers = #tpu.dot_dimension_numbers<[1], [0], [0], [1], [0, 0, 1, 1], [], []>} : vector<200x152xbf16>, vector<152x128xbf16>, vector<200x128xf32> -> vector<200x128xf32>
    %c0_3 = arith.constant 0 : index
    %c0_4 = arith.constant 0 : index
    %3 = vector.load %arg3[%c0_3, %c0_4] : memref<10x256xf32, #tpu.memory_space<vmem>>, vector<1x128xf32>
    %4 = vector.broadcast %3 : vector<1x128xf32> to vector<200x128xf32>
    %5 = arith.addf %2, %4 : vector<200x128xf32>
    %6 = vector.extract_strided_slice %5 {offsets = [0, 0], sizes = [200, 64], strides = [1, 1]} : vector<200x128xf32> to vector<200x64xf32>
    %cst_5 = arith.constant 0.000000e+00 : f32
    %7 = vector.broadcast %cst_5 : f32 to vector<200x64xf32>
    %8 = arith.maximumf %6, %7 : vector<200x64xf32>
    %9 = arith.truncf %8 : vector<200x64xf32> to vector<200x64xbf16>
    %c152 = arith.constant 152 : index
    %c0_6 = arith.constant 0 : index
    %10 = vector.load %arg2[%c152, %c0_6] : memref<1928x256xbf16, #tpu.memory_space<vmem>>, vector<64x64xbf16>
    %cst_7 = arith.constant dense<0.000000e+00> : vector<200x64xf32>
    %11 = tpu.matmul %9, %10, %cst_7 {dimension_numbers = #tpu.dot_dimension_numbers<[1], [0], [0], [1], [0, 0, 1, 1], [], []>} : vector<200x64xbf16>, vector<64x64xbf16>, vector<200x64xf32> -> vector<200x64xf32>
    %c1 = arith.constant 1 : index
    %c0_8 = arith.constant 0 : index
    %12 = vector.load %arg3[%c1, %c0_8] : memref<10x256xf32, #tpu.memory_space<vmem>>, vector<1x64xf32>
    %13 = vector.broadcast %12 : vector<1x64xf32> to vector<200x64xf32>
    %14 = arith.addf %11, %13 : vector<200x64xf32>
    %15 = arith.truncf %14 : vector<200x64xf32> to vector<200x64xbf16>
    %16 = vector.extract_strided_slice %5 {offsets = [0, 64], sizes = [200, 64], strides = [1, 1]} : vector<200x128xf32> to vector<200x64xf32>
    %17 = arith.truncf %16 : vector<200x64xf32> to vector<200x64xbf16>
    %18 = tpu.concatenate %15, %17 in 1 : vector<200x64xbf16>, vector<200x64xbf16> -> vector<200x128xbf16>
    %c216 = arith.constant 216 : index
    %c0_9 = arith.constant 0 : index
    %19 = vector.load %arg2[%c216, %c0_9] : memref<1928x256xbf16, #tpu.memory_space<vmem>>, vector<128x64xbf16>
    %cst_10 = arith.constant dense<0.000000e+00> : vector<200x64xf32>
    %20 = tpu.matmul %18, %19, %cst_10 {dimension_numbers = #tpu.dot_dimension_numbers<[1], [0], [0], [1], [0, 0, 1, 1], [], []>} : vector<200x128xbf16>, vector<128x64xbf16>, vector<200x64xf32> -> vector<200x64xf32>
    %c2 = arith.constant 2 : index
    %c0_11 = arith.constant 0 : index
    %21 = vector.load %arg3[%c2, %c0_11] : memref<10x256xf32, #tpu.memory_space<vmem>>, vector<1x64xf32>
    %22 = vector.broadcast %21 : vector<1x64xf32> to vector<200x64xf32>
    %23 = arith.addf %20, %22 : vector<200x64xf32>
    %cst_12 = arith.constant 0.000000e+00 : f32
    %24 = vector.broadcast %cst_12 : f32 to vector<200x64xf32>
    %25 = arith.maximumf %23, %24 : vector<200x64xf32>
    %26 = arith.truncf %25 : vector<200x64xf32> to vector<200x64xbf16>
    %c344 = arith.constant 344 : index
    %c0_13 = arith.constant 0 : index
    %27 = vector.load %arg2[%c344, %c0_13] : memref<1928x256xbf16, #tpu.memory_space<vmem>>, vector<64x64xbf16>
    %cst_14 = arith.constant dense<0.000000e+00> : vector<200x64xf32>
    %28 = tpu.matmul %26, %27, %cst_14 {dimension_numbers = #tpu.dot_dimension_numbers<[1], [0], [0], [1], [0, 0, 1, 1], [], []>} : vector<200x64xbf16>, vector<64x64xbf16>, vector<200x64xf32> -> vector<200x64xf32>
    %c3 = arith.constant 3 : index
    %c0_15 = arith.constant 0 : index
    %29 = vector.load %arg3[%c3, %c0_15] : memref<10x256xf32, #tpu.memory_space<vmem>>, vector<1x64xf32>
    %30 = vector.broadcast %29 : vector<1x64xf32> to vector<200x64xf32>
    %31 = arith.addf %28, %30 : vector<200x64xf32>
    %cst_16 = arith.constant 0.000000e+00 : f32
    %32 = vector.broadcast %cst_16 : f32 to vector<200x64xf32>
    %33 = arith.maximumf %31, %32 : vector<200x64xf32>
    %34 = arith.truncf %33 : vector<200x64xf32> to vector<200x64xbf16>
    %c408 = arith.constant 408 : index
    %c0_17 = arith.constant 0 : index
    %35 = vector.load %arg2[%c408, %c0_17] : memref<1928x256xbf16, #tpu.memory_space<vmem>>, vector<64x64xbf16>
    %cst_18 = arith.constant dense<0.000000e+00> : vector<200x64xf32>
    %36 = tpu.matmul %34, %35, %cst_18 {dimension_numbers = #tpu.dot_dimension_numbers<[1], [0], [0], [1], [0, 0, 1, 1], [], []>} : vector<200x64xbf16>, vector<64x64xbf16>, vector<200x64xf32> -> vector<200x64xf32>
    %c4 = arith.constant 4 : index
    %c0_19 = arith.constant 0 : index
    %37 = vector.load %arg3[%c4, %c0_19] : memref<10x256xf32, #tpu.memory_space<vmem>>, vector<1x64xf32>
    %38 = vector.broadcast %37 : vector<1x64xf32> to vector<200x64xf32>
    %39 = arith.addf %36, %38 : vector<200x64xf32>
    %40 = arith.truncf %39 : vector<200x64xf32> to vector<200x64xbf16>
    %c0_20 = arith.constant 0 : index
    %c0_21 = arith.constant 0 : index
    %41 = vector.load %arg1[%c0_20, %c0_21] : memref<200x152xbf16, #tpu.memory_space<vmem>>, vector<200x152xbf16>
    %42 = tpu.concatenate %41, %40 in 1 : vector<200x152xbf16>, vector<200x64xbf16> -> vector<200x216xbf16>
    %c472 = arith.constant 472 : index
    %c0_22 = arith.constant 0 : index
    %43 = vector.load %arg2[%c472, %c0_22] : memref<1928x256xbf16, #tpu.memory_space<vmem>>, vector<216x256xbf16>
    %cst_23 = arith.constant dense<0.000000e+00> : vector<200x256xf32>
    %44 = tpu.matmul %42, %43, %cst_23 {dimension_numbers = #tpu.dot_dimension_numbers<[1], [0], [0], [1], [0, 0, 1, 1], [], []>} : vector<200x216xbf16>, vector<216x256xbf16>, vector<200x256xf32> -> vector<200x256xf32>
    %c5 = arith.constant 5 : index
    %c0_24 = arith.constant 0 : index
    %45 = vector.load %arg3[%c5, %c0_24] : memref<10x256xf32, #tpu.memory_space<vmem>>, vector<1x256xf32>
    %46 = vector.broadcast %45 : vector<1x256xf32> to vector<200x256xf32>
    %47 = arith.addf %44, %46 : vector<200x256xf32>
    %cst_25 = arith.constant 0.000000e+00 : f32
    %48 = vector.broadcast %cst_25 : f32 to vector<200x256xf32>
    %49 = arith.maximumf %47, %48 : vector<200x256xf32>
    %50 = arith.truncf %49 : vector<200x256xf32> to vector<200x256xbf16>
    %c688 = arith.constant 688 : index
    %c0_26 = arith.constant 0 : index
    %51 = vector.load %arg2[%c688, %c0_26] : memref<1928x256xbf16, #tpu.memory_space<vmem>>, vector<256x256xbf16>
    %cst_27 = arith.constant dense<0.000000e+00> : vector<200x256xf32>
    %52 = tpu.matmul %50, %51, %cst_27 {dimension_numbers = #tpu.dot_dimension_numbers<[1], [0], [0], [1], [0, 0, 1, 1], [], []>} : vector<200x256xbf16>, vector<256x256xbf16>, vector<200x256xf32> -> vector<200x256xf32>
    %c6 = arith.constant 6 : index
    %c0_28 = arith.constant 0 : index
    %53 = vector.load %arg3[%c6, %c0_28] : memref<10x256xf32, #tpu.memory_space<vmem>>, vector<1x256xf32>
    %54 = vector.broadcast %53 : vector<1x256xf32> to vector<200x256xf32>
    %55 = arith.addf %52, %54 : vector<200x256xf32>
    %cst_29 = arith.constant 0.000000e+00 : f32
    %56 = vector.broadcast %cst_29 : f32 to vector<200x256xf32>
    %57 = arith.maximumf %55, %56 : vector<200x256xf32>
    %58 = arith.truncf %57 : vector<200x256xf32> to vector<200x256xbf16>
    %c944 = arith.constant 944 : index
    %c0_30 = arith.constant 0 : index
    %59 = vector.load %arg2[%c944, %c0_30] : memref<1928x256xbf16, #tpu.memory_space<vmem>>, vector<256x256xbf16>
    %cst_31 = arith.constant dense<0.000000e+00> : vector<200x256xf32>
    %60 = tpu.matmul %58, %59, %cst_31 {dimension_numbers = #tpu.dot_dimension_numbers<[1], [0], [0], [1], [0, 0, 1, 1], [], []>} : vector<200x256xbf16>, vector<256x256xbf16>, vector<200x256xf32> -> vector<200x256xf32>
    %c1200 = arith.constant 1200 : index
    %c0_32 = arith.constant 0 : index
    %61 = vector.load %arg2[%c1200, %c0_32] : memref<1928x256xbf16, #tpu.memory_space<vmem>>, vector<216x256xbf16>
    %cst_33 = arith.constant dense<0.000000e+00> : vector<200x256xf32>
    %62 = tpu.matmul %42, %61, %cst_33 {dimension_numbers = #tpu.dot_dimension_numbers<[1], [0], [0], [1], [0, 0, 1, 1], [], []>} : vector<200x216xbf16>, vector<216x256xbf16>, vector<200x256xf32> -> vector<200x256xf32>
    %c7 = arith.constant 7 : index
    %c0_34 = arith.constant 0 : index
    %63 = vector.load %arg3[%c7, %c0_34] : memref<10x256xf32, #tpu.memory_space<vmem>>, vector<1x256xf32>
    %64 = vector.broadcast %63 : vector<1x256xf32> to vector<200x256xf32>
    %65 = arith.addf %62, %64 : vector<200x256xf32>
    %66 = arith.addf %60, %65 : vector<200x256xf32>
    %cst_35 = arith.constant 0.000000e+00 : f32
    %67 = vector.broadcast %cst_35 : f32 to vector<200x256xf32>
    %68 = arith.maximumf %66, %67 : vector<200x256xf32>
    %69 = arith.truncf %68 : vector<200x256xf32> to vector<200x256xbf16>
    %c1416 = arith.constant 1416 : index
    %c0_36 = arith.constant 0 : index
    %70 = vector.load %arg2[%c1416, %c0_36] : memref<1928x256xbf16, #tpu.memory_space<vmem>>, vector<256x256xbf16>
    %cst_37 = arith.constant dense<0.000000e+00> : vector<200x256xf32>
    %71 = tpu.matmul %69, %70, %cst_37 {dimension_numbers = #tpu.dot_dimension_numbers<[1], [0], [0], [1], [0, 0, 1, 1], [], []>} : vector<200x256xbf16>, vector<256x256xbf16>, vector<200x256xf32> -> vector<200x256xf32>
    %c8 = arith.constant 8 : index
    %c0_38 = arith.constant 0 : index
    %72 = vector.load %arg3[%c8, %c0_38] : memref<10x256xf32, #tpu.memory_space<vmem>>, vector<1x256xf32>
    %73 = vector.broadcast %72 : vector<1x256xf32> to vector<200x256xf32>
    %74 = arith.addf %71, %73 : vector<200x256xf32>
    %cst_39 = arith.constant 0.000000e+00 : f32
    %75 = vector.broadcast %cst_39 : f32 to vector<200x256xf32>
    %76 = arith.maximumf %74, %75 : vector<200x256xf32>
    %77 = arith.truncf %76 : vector<200x256xf32> to vector<200x256xbf16>
    %c1672 = arith.constant 1672 : index
    %c0_40 = arith.constant 0 : index
    %78 = vector.load %arg2[%c1672, %c0_40] : memref<1928x256xbf16, #tpu.memory_space<vmem>>, vector<256x12xbf16>
    %cst_41 = arith.constant dense<0.000000e+00> : vector<200x12xf32>
    %79 = tpu.matmul %77, %78, %cst_41 {dimension_numbers = #tpu.dot_dimension_numbers<[1], [0], [0], [1], [0, 0, 1, 1], [], []>} : vector<200x256xbf16>, vector<256x12xbf16>, vector<200x12xf32> -> vector<200x12xf32>
    %c9 = arith.constant 9 : index
    %c0_42 = arith.constant 0 : index
    %80 = vector.load %arg3[%c9, %c0_42] : memref<10x256xf32, #tpu.memory_space<vmem>>, vector<1x12xf32>
    %81 = vector.broadcast %80 : vector<1x12xf32> to vector<200x12xf32>
    %82 = arith.addf %79, %81 : vector<200x12xf32>
    %c0_43 = arith.constant 0 : index
    %c0_44 = arith.constant 0 : index
    %83 = vector.load %arg4[%c0_43, %c0_44] : memref<200x12xf32, #tpu.memory_space<vmem>>, vector<200x12xf32>
    tpu.vector_store %arg4[%c0_43, %c0_44], %82 {strides = array<i32>} : memref<200x12xf32, #tpu.memory_space<vmem>>, vector<200x12xf32>,
    return
  }
  func.func @transform_0(%arg0: i32) -> (i32, i32) {
    %c0_i32 = arith.constant 0 : i32
    %c0_i32_0 = arith.constant 0 : i32
    return %arg0, %c0_i32 : i32, i32
  }
  func.func @transform_1(%arg0: i32) -> (i32, i32) {
    %c0_i32 = arith.constant 0 : i32
    %c0_i32_0 = arith.constant 0 : i32
    %c0_i32_1 = arith.constant 0 : i32
    return %c0_i32, %c0_i32_0 : i32, i32
  }
  func.func @transform_2(%arg0: i32) -> (i32, i32) {
    %c0_i32 = arith.constant 0 : i32
    %c0_i32_0 = arith.constant 0 : i32
    %c0_i32_1 = arith.constant 0 : i32
    return %c0_i32, %c0_i32_0 : i32, i32
  }
  func.func @transform_3(%arg0: i32) -> (i32, i32) {
    %c0_i32 = arith.constant 0 : i32
    %c0_i32_0 = arith.constant 0 : i32
    return %arg0, %c0_i32 : i32, i32
  }
}

</mosaic_0001>

<bundles_post_ra>
// kernel: _forward_device.1
= control target key start
LH: loop header
LB: loop body
LE: loop exit
PB: predicated region body
PF: predicated region fallthrough
CT: control target
= control target key end

     0   :  { %8 = vsyncpa [#allocation3], 0  ;;  %s5753_s15 = smov [#allocation2]   ;;  %s5754_s17 = smov 128   ;;  %s8096_s0 = inlined_call_operand.vmem [shape: bf16[200,152], index: 0, kind: input, shape index: {}]   ;;  %s8097_s1 = inlined_call_operand.hbm [shape: bf16[1928,256], index: 1, kind: input, shape index: {}]   ;;  %s8098_s2 = inlined_call_operand.vmem [shape: f32[10,256], index: 2, kind: input, shape index: {}]   ;;  %s8099_s3 = inlined_call_operand.vmem [shape: f32[200,12], index: 3, kind: output, shape index: {}]  }
   0x1   :  { %s15_s14 = sshll.u32 %s8097_s1, 4  ;;  %s17_s16 = sshll.u32 %s5753_s15, 4  ;;  %s16_s14 = int_to_ptr.hbm [resolvable:$true] %s15_s14  ;;  %s18_s16 = int_to_ptr.vmem [resolvable:$true] %s17_s16 }
   0x2   :  { %s5755_s18 = smov 8  }
   0x3   :  { %23 = dma.hbm_to_vmem [thread:$0]  %s16_s14, 30848, %s18_s16, [#allocation3], %s5754_s17, %s5754_s17, %s5755_s18  }
   0x4   :  { %5751 = dma.done.wait [#allocation3], 30848  }
   0x5   :  { %5752 = vsyncadd [#allocation3], 4294936448  ;;  %v4656_v0 = vld [vmem:[#allocation2 + $0x70] sm:$0xf]  ;;  %v5537_v1 = vld [vmem:[#allocation2 + $0x74] sm:$0xf0] }
   0x6   :  { %v4652_v2 = vld [vmem:[#allocation2 + $0x60] sm:$0xf]  ;;  %v4657_v3 = vor.u32 %v5537_v1, %v4656_v0  ;;  %v5536_v4 = vld [vmem:[#allocation2 + $0x64] sm:$0xf0]  ;;  %v74_v6 = vld [vmem:[#allocation2 + $0x90] sm:$0xf] }
   0x7   :  { %v4653_v5 = vor.u32 %v5536_v4, %v4652_v2  ;;  %v4648_v7 = vld [vmem:[#allocation2 + $0x50] sm:$0xf]  ;;  %v5535_v8 = vld [vmem:[#allocation2 + $0x54] sm:$0xf0]  ;;  %v227_v9 = vunpack.c.l.b16 %v74_v6  ;;  %vm287_vm0 = vcmask 1043456   ;;  %vm247_vm1 = vcmask 195584  }
   0x8   :  { %291 = vmatpush.bf16.msra.mxu0 %v4657_v3  ;;  %v4660_v11 = vld [vmem:[#allocation2 + $0x80] sm:$0xf]  ;;  %v5538_v12 = vld [vmem:[#allocation2 + $0x84] sm:$0xf0]  ;;  %v4649_v13 = vor.u32 %v5535_v8, %v4648_v7  ;;  %v5506_v18 = vld [vmem:[%s8096_s0 + $0x4] sm:$0xf] }
   0x9   :  { %v237_v10 = vpack.c.b16 %v227_v9, %v227_v9  ;;  %v4644_v14 = vld [vmem:[#allocation2 + $0x40] sm:$0xf]  ;;  %v5534_v15 = vld [vmem:[#allocation2 + $0x44] sm:$0xf0]  ;;  %v4661_v17 = vor.u32 %v5538_v12, %v4660_v11  ;;  %v4534_v19 = vld [vmem:[%s8096_s0 + $0x8] sm:$0xf0] }
   0xa   :  { %v4645_v20 = vor.u32 %v5534_v15, %v4644_v14  ;;  %v4640_v21 = vld [vmem:[#allocation2 + $0x30] sm:$0xf]  ;;  %v5533_v22 = vld [vmem:[#allocation2 + $0x34] sm:$0xf0]  ;;  %v5787_v23 = vor.u32 %v5506_v18, %v4534_v19  ;;  %v4636_v25 = vld [vmem:[#allocation2 + $0x20] sm:$0xf] }
   0xb   :  { %v289_v16 = vsel %vm287_vm0, %v237_v10, 0  ;;  %v4641_v24 = vor.u32 %v5533_v22, %v4640_v21  ;;  %v5532_v26 = vld [vmem:[#allocation2 + $0x24] sm:$0xf0]  ;;  %v4632_v28 = vld [vmem:[#allocation2 + $0x10] sm:$0xf]  ;;  %vm508_vm2 = vcmask 523264  }
   0xc   :  { %292 = vmatpush.bf16.msra.mxu0 %v4653_v5  ;;  %370 = vmatpush.bf16.msra.mxu1 %v289_v16  ;;  %v4637_v27 = vor.u32 %v5532_v26, %v4636_v25  ;;  %v5531_v29 = vld [vmem:[#allocation2 + $0x14] sm:$0xf0]  ;;  %v4628_v31 = vld [vmem:[#allocation2] sm:$0xf]  ;;  %v5530_v32 = vld [vmem:[#allocation2 + $0x4] sm:$0xf0] }
   0xd   :  { %v4633_v30 = vor.u32 %v5531_v29, %v4632_v28  ;;  %v5508_v33 = vld [vmem:[%s8096_s0 + $0x14] sm:$0xf]  ;;  %v4542_v34 = vld [vmem:[%s8096_s0 + $0x18] sm:$0xf0]  ;;  %v4629_v35 = vor.u32 %v5530_v32, %v4628_v31  ;;  %v4532_v36 = vld [vmem:[%s8096_s0] sm:$0xf] }
   0xe   :  { %v5507_v37 = vld [vmem:[%s8096_s0 + $0x4] sm:$0xf0]  ;;  %v5803_v38 = vor.u32 %v5508_v33, %v4542_v34  ;;  %v5510_v40 = vld [vmem:[%s8096_s0 + $0x24] sm:$0xf]  ;;  %v4550_v41 = vld [vmem:[%s8096_s0 + $0x28] sm:$0xf0] }
   0xf   :  { %v5805_v39 = vor.u32 %v5507_v37, %v4532_v36  ;;  %v4540_v42 = vld [vmem:[%s8096_s0 + $0x10] sm:$0xf]  ;;  %v5509_v43 = vld [vmem:[%s8096_s0 + $0x14] sm:$0xf0]  ;;  %v5822_v44 = vor.u32 %v5510_v40, %v4550_v41  ;;  %v5512_v46 = vld [vmem:[%s8096_s0 + $0x34] sm:$0xf] }
  0x10   :  { %293 = vmatpush.bf16.msra.mxu0 %v4649_v13  ;;  %371 = vmatpush.bf16.msra.mxu1 %v4661_v17  ;;  %v5824_v45 = vor.u32 %v5509_v43, %v4540_v42  ;;  %v4558_v47 = vld [vmem:[%s8096_s0 + $0x38] sm:$0xf0]  ;;  %v4548_v48 = vld [vmem:[%s8096_s0 + $0x20] sm:$0xf]  ;;  %v5511_v49 = vld [vmem:[%s8096_s0 + $0x24] sm:$0xf0] }
  0x11   :  { %v5841_v50 = vor.u32 %v5512_v46, %v4558_v47  ;;  %v5843_v51 = vor.u32 %v5511_v49, %v4548_v48  ;;  %v5514_v52 = vld [vmem:[%s8096_s0 + $0x44] sm:$0xf]  ;;  %v4566_v53 = vld [vmem:[%s8096_s0 + $0x48] sm:$0xf0]  ;;  %v4556_v54 = vld [vmem:[%s8096_s0 + $0x30] sm:$0xf] }
  0x12   :  { %v5513_v55 = vld [vmem:[%s8096_s0 + $0x34] sm:$0xf0]  ;;  %v5860_v56 = vor.u32 %v5514_v52, %v4566_v53  ;;  %v5516_v58 = vld [vmem:[%s8096_s0 + $0x54] sm:$0xf]  ;;  %v4574_v59 = vld [vmem:[%s8096_s0 + $0x58] sm:$0xf0] }
  0x13   :  { %4662 = vmatmul.msk.bf16.vlgmr.msra.gmra.mxu1 %vm247_vm1, %v5787_v23  ;;  %v5862_v57 = vor.u32 %v5513_v55, %v4556_v54  ;;  %v4564_v60 = vld [vmem:[%s8096_s0 + $0x40] sm:$0xf]  ;;  %v5515_v61 = vld [vmem:[%s8096_s0 + $0x44] sm:$0xf0]  ;;  %v5879_v62 = vor.u32 %v5516_v58, %v4574_v59  ;;  %v5518_v0 = vld [vmem:[%s8096_s0 + $0x64] sm:$0xf] }
  0x14   :  { %294 = vmatpush.bf16.msra.mxu0 %v4645_v20  ;;  %v5881_v63 = vor.u32 %v5515_v61, %v4564_v60  ;;  %v4582_v1 = vld [vmem:[%s8096_s0 + $0x68] sm:$0xf0]  ;;  %v4572_v2 = vld [vmem:[%s8096_s0 + $0x50] sm:$0xf]  ;;  %v5517_v3 = vld [vmem:[%s8096_s0 + $0x54] sm:$0xf0] }
  0x15   :  { %v5898_v4 = vor.u32 %v5518_v0, %v4582_v1  ;;  %v5900_v5 = vor.u32 %v5517_v3, %v4572_v2  ;;  %v5520_v6 = vld [vmem:[%s8096_s0 + $0x74] sm:$0xf]  ;;  %v4590_v7 = vld [vmem:[%s8096_s0 + $0x78] sm:$0xf0]  ;;  %v4580_v8 = vld [vmem:[%s8096_s0 + $0x60] sm:$0xf] }
  0x16   :  { %v5519_v9 = vld [vmem:[%s8096_s0 + $0x64] sm:$0xf0]  ;;  %v5917_v10 = vor.u32 %v5520_v6, %v4590_v7  ;;  %v5542_v13 = vld [vmem:[#allocation2 + $0xcc] sm:$0xf0]  ;;  %v4685_v15 = vld [vmem:[#allocation2 + $0xb8] sm:$0xf] }
  0x17   :  { %8147 = vst [vmem:[#allocation5_spill] sm:$0xff] %v5900_v5  ;;  %v5919_v11 = vor.u32 %v5519_v9, %v4580_v8  ;;  %v4689_v12 = vld [vmem:[#allocation2 + $0xc8] sm:$0xf]  ;;  %v5541_v16 = vld [vmem:[#allocation2 + $0xbc] sm:$0xf0]  ;;  %s5756_s14 = smov 24  }
  0x18   :  { %295 = vmatpush.bf16.msra.mxu0 %v4641_v24  ;;  %v4690_v14 = vor.u32 %v5542_v13, %v4689_v12  ;;  %v4686_v17 = vor.u32 %v5541_v16, %v4685_v15  ;;  %v4681_v18 = vld [vmem:[#allocation2 + $0xa8] sm:$0xf]  ;;  %v5540_v19 = vld [vmem:[#allocation2 + $0xac] sm:$0xf0]  ;;  %v5522_v21 = vld [vmem:[%s8096_s0 + $0x84] sm:$0xf] }
  0x19   :  { %8148 = vst [vmem:[#allocation6_spill] sm:$0xff] %v5919_v11  ;;  %v4682_v20 = vor.u32 %v5540_v19, %v4681_v18  ;;  %v4598_v22 = vld [vmem:[%s8096_s0 + $0x88] sm:$0xf0]  ;;  %v4677_v24 = vld [vmem:[#allocation2 + $0x98] sm:$0xf]  ;;  %vm1662_vm3 = vcmask 719872  }
  0x1a   :  { %552 = vmatpush.bf16.msra.mxu2 %v4690_v14  ;;  %v5539_v25 = vld [vmem:[#allocation2 + $0x9c] sm:$0xf0]  ;;  %v4588_v26 = vld [vmem:[%s8096_s0 + $0x70] sm:$0xf]  ;;  %v5936_v29 = vor.u32 %v5522_v21, %v4598_v22  ;;  %v5524_v33 = vld [vmem:[%s8096_s0 + $0x94] sm:$0xf] }
  0x1b   :  { %v4678_v28 = vor.u32 %v5539_v25, %v4677_v24  ;;  %v4606_v34 = vld [vmem:[%s8096_s0 + $0x98] sm:$0xf0]  ;;  %v5523_v36 = vld [vmem:[%s8096_s0 + $0x84] sm:$0xf0]  ;;  %v5962_v42 = vld [vmem:[%s8098_s2] ss:$0 sm:$0xff] }
  0x1c   :  { %296 = vmatpush.bf16.msra.mxu0 %v4637_v27  ;;  %v5521_v27 = vld [vmem:[%s8096_s0 + $0x74] sm:$0xf0]  ;;  %8149 = vst [vmem:[#allocation7_spill] sm:$0xff] %v5936_v29  ;;  %v5955_v37 = vor.u32 %v5524_v33, %v4606_v34  ;;  %v5526_v53 = vld [vmem:[%s8096_s0 + $0xa4] sm:$0xf]  ;;  %vm4499_vm4 = vcmask 97280  }
  0x1d   :  { %v5938_v31 = vor.u32 %v5521_v27, %v4588_v26  ;;  %v4614_v54 = vld [vmem:[%s8096_s0 + $0xa8] sm:$0xf0]  ;;  %v4604_v59 = vld [vmem:[%s8096_s0 + $0x90] sm:$0xf]  ;;  %v5525_v60 = vld [vmem:[%s8096_s0 + $0x94] sm:$0xf0] }
  0x1e   :  { %553 = vmatpush.bf16.msra.mxu2 %v4686_v17  ;;  %8151 = vst [vmem:[#allocation9_spill] sm:$0xff] %v5955_v37  ;;  %v5981_v2 = vor.u32 %v5526_v53, %v4614_v54  ;;  %v5987_v9 = vor.u32 %v5525_v60, %v4604_v59  ;;  %v5528_v19 = vld [vmem:[%s8096_s0 + $0xb4] sm:$0xf]  ;;  %v4612_v24 = vld [vmem:[%s8096_s0 + $0xa0] sm:$0xf] }
  0x1f   :  { %8150 = vst [vmem:[#allocation8_spill] sm:$0xff] %v5938_v31  ;;  %v5527_v25 = vld [vmem:[%s8096_s0 + $0xa4] sm:$0xf0]  ;;  %v4620_v59 = vld [vmem:[%s8096_s0 + $0xb0] sm:$0xf] }
  0x20   :  { %297 = vmatpush.bf16.msra.mxu0 %v4633_v30  ;;  %8153 = vst [vmem:[#allocation11_spill] sm:$0xff] %v5981_v2  ;;  %v5529_v60 = vld [vmem:[%s8096_s0 + $0xb4] sm:$0xf0] }
  0x21   :  { %8154 = vst [vmem:[#allocation12_spill] sm:$0xff] %v5987_v9 }
  0x22   :  { %554 = vmatpush.bf16.msra.mxu2 %v4682_v20  ;;  %v4622_v20 = vld [vmem:[%s8096_s0 + $0xb8] sm:$0xf0] }
  0x23   :  { %4663 = vmatmul.msk.bf16.gmra.mxu1 %vm247_vm1, %v5803_v38 }
  0x24   :  { %298 = vmatpush.bf16.msra.mxu0 %v4629_v35  ;;  %v4596_v35 = vld [vmem:[%s8096_s0 + $0x80] sm:$0xf] }
  0x25   :  { %v5957_v41 = vor.u32 %v5523_v36, %v4596_v35  ;;  %v6015_v36 = vor.u32 %v5527_v25, %v4612_v24 }
  0x26   :  { %555 = vmatpush.bf16.msra.mxu2 %v4678_v28 }
  0x27   :  { %299 = vmatmul.bf16.vlgmr.msra.gmra.mxu0 %v5805_v39  ;;  %8152 = vst [vmem:[#allocation10_spill] sm:$0xff] %v5957_v41 }
  0x28   :  { %8156 = vst [vmem:[#allocation14_spill] sm:$0xff] %v6015_v36 }
  0x33   :  { %4664 = vmatmul.msk.bf16.gmra.mxu1 %vm247_vm1, %v5822_v44 }
  0x37   :  { %304 = vmatmul.bf16.gmra.mxu0 %v5824_v45 }
  0x43   :  { %4665 = vmatmul.msk.bf16.gmra.mxu1 %vm247_vm1, %v5841_v50 }
  0x47   :  { %309 = vmatmul.bf16.gmra.mxu0 %v5843_v51 }
  0x53   :  { %4666 = vmatmul.msk.bf16.gmra.mxu1 %vm247_vm1, %v5860_v56 }
  0x57   :  { %314 = vmatmul.bf16.gmra.mxu0 %v5862_v57 }
  0x63   :  { %4667 = vmatmul.msk.bf16.gmra.mxu1 %vm247_vm1, %v5879_v62 }
  0x67   :  { %319 = vmatmul.bf16.gmra.mxu0 %v5881_v63 }
  0x73   :  { %4668 = vmatmul.msk.bf16.gmra.mxu1 %vm247_vm1, %v5898_v4 }
  0x77   :  { %324 = vmatmul.bf16.gmra.mxu0 %v5900_v5 }
  0x83   :  { %4669 = vmatmul.msk.bf16.gmra.mxu1 %vm247_vm1, %v5917_v10 }
  0x87   :  { %329 = vmatmul.bf16.gmra.mxu0 %v5919_v11 }
  0x90   :  { %v373_v30 = vpop.f32.mrf.mxu1 }
  0x93   :  { %4670 = vmatmul.msk.bf16.gmra.mxu1 %vm247_vm1, %v5936_v29 }
  0x97   :  { %334 = vmatmul.bf16.gmra.mxu0 %v5938_v31 }
  0x98   :  { %v375_v32 = vpop.f32.mrf.mxu1 }
  0xa0   :  { %v378_v40 = vpop.f32.mrf.mxu1 }
  0xa3   :  { %4671 = vmatmul.msk.bf16.gmra.mxu1 %vm247_vm1, %v5955_v37 }
  0xa4   :  { %v300_v43 = vpop.f32.mrf.mxu0 }
  0xa5   :  { %v301_v46 = vadd.f32 %v300_v43, %v5962_v42 }
  0xa7   :  { %339 = vmatmul.bf16.gmra.mxu0 %v5957_v41  ;;  %v374_v48 = vadd.f32 %v373_v30, %v301_v46  ;;  %v6009_v30 = vor.u32 %v5528_v19, %v4622_v20 }
  0xa8   :  { %v380_v47 = vpop.f32.mrf.mxu1 }
  0xa9   :  { %v646_v55 = vpack.c.bf16 %v374_v48, %v374_v48  ;;  %v437_v61 = vmax.f32 %v374_v48, 0.0  ;;  %8155 = vst [vmem:[#allocation13_spill] sm:$0xff] %v6009_v30 }
  0xab   :  { %v5983_v6 = vunpack.c.l.b16 %v646_v55 }
  0xac   :  { %v302_v49 = vpop.f32.mrf.mxu0 }
  0xad   :  { %v303_v52 = vadd.f32 %v302_v49, %v5962_v42 }
  0xaf   :  { %v376_v58 = vadd.f32 %v375_v32, %v303_v52  ;;  %v55_v52 = vld [vmem:[%s8096_s0 + $0xc0] sm:$0xff] }
  0xb0   :  { %v383_v3 = vpop.f32.mrf.mxu1  ;;  %v150_v54 = vunpack.c.h.b16 %v55_v52 }
  0xb1   :  { %v438_v0 = vmax.f32 %v376_v58, 0.0  ;;  %v647_v1 = vpack.c.bf16 %v376_v58, %v376_v58 }
  0xb3   :  { %v5985_v7 = vunpack.c.l.b16 %v647_v1  ;;  %v462_v8 = vpack.c.bf16 %v438_v0, %v437_v61  ;;  %4672 = vmatmul.msk.bf16.gmra.mxu1 %vm247_vm1, %v5981_v2 }
  0xb4   :  { %v305_v12 = vpop.f32.mrf.mxu0 }
  0xb5   :  { %4691 = vmatmul.msk.bf16.vlgmr.msra.gmra.mxu2 %vm508_vm2, %v462_v8  ;;  %v306_v14 = vadd.f32 %v305_v12, %v5962_v42 }
  0xb7   :  { %344 = vmatmul.bf16.gmra.mxu0 %v5987_v9  ;;  %v379_v16 = vadd.f32 %v378_v40, %v306_v14 }
  0xb8   :  { %v385_v15 = vpop.f32.mrf.mxu1 }
  0xb9   :  { %v648_v21 = vpack.c.bf16 %v379_v16, %v379_v16  ;;  %v439_v26 = vmax.f32 %v379_v16, 0.0 }
  0xbb   :  { %v6011_v33 = vunpack.c.l.b16 %v648_v21 }
  0xbc   :  { %v307_v17 = vpop.f32.mrf.mxu0 }
  0xbd   :  { %v308_v18 = vadd.f32 %v307_v17, %v5962_v42 }
  0xbf   :  { %v381_v22 = vadd.f32 %v380_v47, %v308_v18 }
  0xc0   :  { %v388_v32 = vpop.f32.mrf.mxu1 }
  0xc1   :  { %v440_v27 = vmax.f32 %v381_v22, 0.0  ;;  %v649_v28 = vpack.c.bf16 %v381_v22, %v381_v22 }
  0xc3   :  { %v6013_v34 = vunpack.c.l.b16 %v649_v28  ;;  %v463_v35 = vpack.c.bf16 %v440_v27, %v439_v26  ;;  %4673 = vmatmul.msk.bf16.gmra.mxu1 %vm247_vm1, %v6009_v30  ;;  %v149_v27 = vunpack.c.l.b16 %v55_v52 }
  0xc4   :  { %v310_v40 = vpop.f32.mrf.mxu0 }
  0xc5   :  { %4692 = vmatmul.msk.bf16.gmra.mxu2 %vm508_vm2, %v463_v35  ;;  %v311_v46 = vadd.f32 %v310_v40, %v5962_v42 }
  0xc7   :  { %349 = vmatmul.bf16.gmra.mxu0 %v6015_v36  ;;  %v384_v48 = vadd.f32 %v383_v3, %v311_v46  ;;  %v6034_v3 = vpack.c.b16 %v150_v54, %v150_v54  ;;  %v6054_v54 = vpack.c.b16 %v149_v27, %v149_v27 }
  0xc8   :  { %v390_v47 = vpop.f32.mrf.mxu1 }
  0xc9   :  { %v650_v55 = vpack.c.bf16 %v384_v48, %v384_v48  ;;  %v441_v61 = vmax.f32 %v384_v48, 0.0  ;;  %8157 = vst [vmem:[#allocation15_spill] sm:$0xff] %v6034_v3 }
  0xca   :  { %8159 = vst [vmem:[#allocation17_spill] sm:$0xff] %v6054_v54 }
  0xcb   :  { %v6036_v12 = vunpack.c.l.b16 %v650_v55 }
  0xcc   :  { %v312_v49 = vpop.f32.mrf.mxu0 }
  0xcd   :  { %v313_v53 = vadd.f32 %v312_v49, %v5962_v42 }
  0xcf   :  { %v386_v58 = vadd.f32 %v385_v15, %v313_v53  ;;  %v6040_v15 = vor.u32 %v5529_v60, %v4620_v59 }
  0xd0   :  { %v393_v8 = vpop.f32.mrf.mxu1 }
  0xd1   :  { %v442_v0 = vmax.f32 %v386_v58, 0.0  ;;  %v651_v1 = vpack.c.bf16 %v386_v58, %v386_v58  ;;  %8158 = vst [vmem:[#allocation16_spill] sm:$0xff] %v6040_v15 }
  0xd3   :  { %v6038_v14 = vunpack.c.l.b16 %v651_v1  ;;  %v464_v16 = vpack.c.bf16 %v442_v0, %v441_v61  ;;  %4674 = vmatmul.msk.bf16.gmra.mxu1 %vm247_vm1, %v6034_v3 }
  0xd4   :  { %v315_v17 = vpop.f32.mrf.mxu0 }
  0xd5   :  { %4693 = vmatmul.msk.bf16.gmra.mxu2 %vm508_vm2, %v464_v16  ;;  %v316_v19 = vadd.f32 %v315_v17, %v5962_v42 }
  0xd7   :  { %354 = vmatmul.bf16.gmra.mxu0 %v6040_v15  ;;  %v389_v21 = vadd.f32 %v388_v32, %v316_v19 }
  0xd8   :  { %v395_v20 = vpop.f32.mrf.mxu1 }
  0xd9   :  { %v652_v25 = vpack.c.bf16 %v389_v21, %v389_v21  ;;  %v443_v28 = vmax.f32 %v389_v21, 0.0 }
  0xdb   :  { %v6050_v48 = vunpack.c.l.b16 %v652_v25  ;;  %v4750_v25 = vld [vmem:[#allocation2 + $0x188] sm:$0xf] }
  0xdc   :  { %v317_v22 = vpop.f32.mrf.mxu0 }
  0xdd   :  { %v318_v24 = vadd.f32 %v317_v22, %v5962_v42 }
  0xdf   :  { %v391_v26 = vadd.f32 %v390_v47, %v318_v24 }
  0xe0   :  { %v398_v46 = vpop.f32.mrf.mxu1 }
  0xe1   :  { %v444_v35 = vmax.f32 %v391_v26, 0.0  ;;  %v653_v40 = vpack.c.bf16 %v391_v26, %v391_v26  ;;  %v5554_v26 = vld [vmem:[#allocation2 + $0x18c] sm:$0xf0] }
  0xe3   :  { %v6052_v49 = vunpack.c.l.b16 %v653_v40  ;;  %v465_v53 = vpack.c.bf16 %v444_v35, %v443_v28  ;;  %v4751_v28 = vor.u32 %v5554_v26, %v4750_v25  ;;  %v4734_v26 = vld [vmem:[#allocation2 + $0x148] sm:$0xf] }
  0xe4   :  { %v320_v55 = vpop.f32.mrf.mxu0 }
  0xe5   :  { %4694 = vmatmul.msk.bf16.gmra.mxu2 %vm508_vm2, %v465_v53  ;;  %v321_v47 = vadd.f32 %v320_v55, %v5962_v42  ;;  %1101 = vmatpush.bf16.msrb.mxu1 %v4751_v28 }
  0xe7   :  { %359 = vmatmul.bf16.gmra.mxu0 %v6054_v54  ;;  %v394_v58 = vadd.f32 %v393_v8, %v321_v47 }
  0xe8   :  { %v400_v52 = vpop.f32.mrf.mxu1 }
  0xe9   :  { %v654_v61 = vpack.c.bf16 %v394_v58, %v394_v58  ;;  %v445_v1 = vmax.f32 %v394_v58, 0.0 }
  0xeb   :  { %v6062_v21 = vunpack.c.l.b16 %v654_v61 }
  0xec   :  { %v322_v59 = vpop.f32.mrf.mxu0 }
  0xed   :  { %v323_v60 = vadd.f32 %v322_v59, %v5962_v42 }
  0xef   :  { %v396_v0 = vadd.f32 %v395_v20, %v323_v60 }
  0xf0   :  { %v403_v19 = vpop.f32.mrf.mxu1 }
  0xf1   :  { %v446_v16 = vmax.f32 %v396_v0, 0.0  ;;  %v655_v17 = vpack.c.bf16 %v396_v0, %v396_v0 }
  0xf3   :  { %v6064_v22 = vunpack.c.l.b16 %v655_v17  ;;  %v466_v24 = vpack.c.bf16 %v446_v16, %v445_v1 }
  0xf4   :  { %v325_v27 = vpop.f32.mrf.mxu0 }
  0xf5   :  { %4695 = vmatmul.msk.bf16.gmra.mxu2 %vm508_vm2, %v466_v24  ;;  %v326_v20 = vadd.f32 %v325_v27, %v5962_v42  ;;  %v5550_v27 = vld [vmem:[#allocation2 + $0x14c] sm:$0xf0] }
  0xf7   :  { %v399_v40 = vadd.f32 %v398_v46, %v326_v20 }
  0xf8   :  { %v405_v35 = vpop.f32.mrf.mxu1 }
  0xf9   :  { %v656_v47 = vpack.c.bf16 %v399_v40, %v399_v40  ;;  %v447_v59 = vmax.f32 %v399_v40, 0.0 }
  0xfb   :  { %v6071_v1 = vunpack.c.l.b16 %v656_v47 }
  0xfc   :  { %v327_v53 = vpop.f32.mrf.mxu0 }
  0xfd   :  { %v328_v55 = vadd.f32 %v327_v53, %v5962_v42  ;;  %v4730_v53 = vld [vmem:[#allocation2 + $0x138] sm:$0xf] }
  0xff   :  { %v401_v58 = vadd.f32 %v400_v52, %v328_v55  ;;  %v4735_v52 = vor.u32 %v5550_v27, %v4734_v26  ;;  %v5549_v55 = vld [vmem:[#allocation2 + $0x13c] sm:$0xf0] }
 0x100   :  { %v408_v0 = vpop.f32.mrf.mxu1 }
 0x101   :  { %v448_v60 = vmax.f32 %v401_v58, 0.0  ;;  %v657_v61 = vpack.c.bf16 %v401_v58, %v401_v58  ;;  %914 = vmatpush.bf16.msra.mxu3 %v4735_v52  ;;  %v4731_v58 = vor.u32 %v5549_v55, %v4730_v53  ;;  %v4722_v52 = vld [vmem:[#allocation2 + $0x118] sm:$0xf]  ;;  %v4718_v55 = vld [vmem:[#allocation2 + $0x108] sm:$0xf] }
 0x103   :  { %v6073_v16 = vunpack.c.l.b16 %v657_v61  ;;  %v467_v17 = vpack.c.bf16 %v448_v60, %v447_v59  ;;  %v4726_v61 = vld [vmem:[#allocation2 + $0x128] sm:$0xf] }
 0x104   :  { %v330_v24 = vpop.f32.mrf.mxu0 }
 0x105   :  { %4696 = vmatmul.msk.bf16.gmra.mxu2 %vm508_vm2, %v467_v17  ;;  %v331_v25 = vadd.f32 %v330_v24, %v5962_v42  ;;  %915 = vmatpush.bf16.msra.mxu3 %v4731_v58  ;;  %v5548_v17 = vld [vmem:[#allocation2 + $0x12c] sm:$0xf0] }
 0x106   :  { %v4727_v32 = vor.u32 %v5548_v17, %v4726_v61 }
 0x107   :  { %v404_v20 = vadd.f32 %v403_v19, %v331_v25 }
 0x108   :  { %v410_v28 = vpop.f32.mrf.mxu1 }
 0x109   :  { %v658_v59 = vpack.c.bf16 %v404_v20, %v404_v20  ;;  %v449_v46 = vmax.f32 %v404_v20, 0.0  ;;  %916 = vmatpush.bf16.msra.mxu3 %v4727_v32  ;;  %v4714_v32 = vld [vmem:[#allocation2 + $0xf8] sm:$0xf] }
 0x10b   :  { %v6080_v26 = vunpack.c.l.b16 %v658_v59 }
 0x10c   :  { %v332_v40 = vpop.f32.mrf.mxu0 }
 0x10d   :  { %v333_v47 = vadd.f32 %v332_v40, %v5962_v42  ;;  %v5547_v40 = vld [vmem:[#allocation2 + $0x11c] sm:$0xf0] }
 0x10f   :  { %v406_v60 = vadd.f32 %v405_v35, %v333_v47  ;;  %v4723_v35 = vor.u32 %v5547_v40, %v4722_v52  ;;  %v5546_v47 = vld [vmem:[#allocation2 + $0x10c] sm:$0xf0]  ;;  %v4710_v52 = vld [vmem:[#allocation2 + $0xe8] sm:$0xf] }
 0x110   :  { %v413_v18 = vpop.f32.mrf.mxu1  ;;  %v4719_v58 = vor.u32 %v5546_v47, %v4718_v55  ;;  %v5544_v40 = vld [vmem:[#allocation2 + $0xec] sm:$0xf0] }
 0x111   :  { %v450_v8 = vmax.f32 %v406_v60, 0.0  ;;  %v659_v24 = vpack.c.bf16 %v406_v60, %v406_v60  ;;  %917 = vmatpush.bf16.msra.mxu3 %v4723_v35  ;;  %v4711_v43 = vor.u32 %v5544_v40, %v4710_v52 }
 0x113   :  { %v6082_v19 = vunpack.c.l.b16 %v659_v24  ;;  %v468_v25 = vpack.c.bf16 %v450_v8, %v449_v46  ;;  %v5545_v46 = vld [vmem:[#allocation2 + $0xfc] sm:$0xf0] }
 0x114   :  { %v335_v27 = vpop.f32.mrf.mxu0  ;;  %v4715_v17 = vor.u32 %v5545_v46, %v4714_v32  ;;  %v4746_v46 = vld [vmem:[#allocation2 + $0x178] sm:$0xf] }
 0x115   :  { %4697 = vmatmul.msk.bf16.gmra.mxu2 %vm508_vm2, %v468_v25  ;;  %v336_v20 = vadd.f32 %v335_v27, %v5962_v42  ;;  %918 = vmatpush.bf16.msra.mxu3 %v4719_v58  ;;  %v4706_v58 = vld [vmem:[#allocation2 + $0xd8] sm:$0xf] }
 0x117   :  { %v409_v60 = vadd.f32 %v408_v0, %v336_v20 }
 0x118   :  { %v415_v59 = vpop.f32.mrf.mxu1 }
 0x119   :  { %v660_v24 = vpack.c.bf16 %v409_v60, %v409_v60  ;;  %919 = vmatpush.bf16.msra.mxu3 %v4715_v17  ;;  %v451_v53 = vmax.f32 %v409_v60, 0.0 }
 0x11b   :  { %v6089_v55 = vunpack.c.l.b16 %v660_v24 }
 0x11c   :  { %v337_v8 = vpop.f32.mrf.mxu0 }
 0x11d   :  { %v338_v61 = vadd.f32 %v337_v8, %v5962_v42  ;;  %920 = vmatpush.bf16.msra.mxu3 %v4711_v43  ;;  %v5543_v8 = vld [vmem:[#allocation2 + $0xdc] sm:$0xf0] }
 0x11f   :  { %v411_v25 = vadd.f32 %v410_v28, %v338_v61  ;;  %v4707_v28 = vor.u32 %v5543_v8, %v4706_v58  ;;  %v5553_v61 = vld [vmem:[#allocation2 + $0x17c] sm:$0xf0] }
 0x120   :  { %v418_v13 = vpop.f32.mrf.mxu1  ;;  %v4747_v17 = vor.u32 %v5553_v61, %v4746_v46 }
 0x121   :  { %v452_v27 = vmax.f32 %v411_v25, 0.0  ;;  %v661_v35 = vpack.c.bf16 %v411_v25, %v411_v25  ;;  %921 = vmatpush.bf16.msra.mxu3 %v4707_v28 }
 0x122   :  { %1102 = vmatpush.bf16.msrb.mxu1 %v4747_v17 }
 0x123   :  { %v6091_v0 = vunpack.c.l.b16 %v661_v35  ;;  %v469_v20 = vpack.c.bf16 %v452_v27, %v451_v53 }
 0x124   :  { %v340_v47 = vpop.f32.mrf.mxu0 }
 0x125   :  { %4698 = vmatmul.msk.bf16.gmra.mxu2 %vm508_vm2, %v469_v20  ;;  %v341_v60 = vadd.f32 %v340_v47, %v5962_v42 }
 0x127   :  { %v414_v25 = vadd.f32 %v413_v18, %v341_v60 }
 0x128   :  { %v420_v24 = vpop.f32.mrf.mxu1 }
 0x129   :  { %v662_v52 = vpack.c.bf16 %v414_v25, %v414_v25  ;;  %v453_v27 = vmax.f32 %v414_v25, 0.0 }
 0x12b   :  { %v6098_v8 = vunpack.c.l.b16 %v662_v52 }
 0x12c   :  { %v342_v53 = vpop.f32.mrf.mxu0 }
 0x12d   :  { %v343_v43 = vadd.f32 %v342_v53, %v5962_v42 }
 0x12f   :  { %v416_v40 = vadd.f32 %v415_v59, %v343_v43  ;;  %v6109_v59 = vld [vmem:[%s8098_s2 + $0x1] ss:$0 sm:$0xff] }
 0x130   :  { %v423_v58 = vpop.f32.mrf.mxu1 }
 0x131   :  { %v454_v35 = vmax.f32 %v416_v40, 0.0  ;;  %v663_v20 = vpack.c.bf16 %v416_v40, %v416_v40 }
 0x133   :  { %v6100_v32 = vunpack.c.l.b16 %v663_v20  ;;  %v470_v47 = vpack.c.bf16 %v454_v35, %v453_v27 }
 0x134   :  { %v345_v3 = vpop.f32.mrf.mxu0 }
 0x135   :  { %4699 = vmatmul.msk.bf16.gmra.mxu2 %vm508_vm2, %v470_v47  ;;  %v346_v28 = vadd.f32 %v345_v3, %v5962_v42 }
 0x137   :  { %v419_v61 = vadd.f32 %v418_v13, %v346_v28 }
 0x138   :  { %v557_v60 = vpop.f32.mrf.mxu2  ;;  %v425_v46 = vpop.f32.mrf.mxu1 }
 0x139   :  { %v558_v25 = vadd.f32 %v557_v60, %v6109_v59  ;;  %v664_v43 = vpack.c.bf16 %v419_v61, %v419_v61  ;;  %v455_v40 = vmax.f32 %v419_v61, 0.0 }
 0x13b   :  { %v621_v35 = vpack.c.bf16 %v558_v25, %v558_v25  ;;  %v6114_v30 = vunpack.c.l.b16 %v664_v43 }
 0x13c   :  { %v347_v17 = vpop.f32.mrf.mxu0 }
 0x13d   :  { %v348_v53 = vadd.f32 %v347_v17, %v5962_v42  ;;  %v696_v60 = vunpack.c.l.b16 %v621_v35 }
 0x13f   :  { %v421_v52 = vadd.f32 %v420_v24, %v348_v53  ;;  %v8160_v53 = vpack.c.b16 %v5985_v7, %v5983_v6 }
 0x140   :  { %v559_v27 = vpop.f32.mrf.mxu2  ;;  %v428_v18 = vpop.f32.mrf.mxu1 }
 0x141   :  { %v456_v20 = vmax.f32 %v421_v52, 0.0  ;;  %v665_v3 = vpack.c.bf16 %v421_v52, %v421_v52  ;;  %v560_v47 = vadd.f32 %v559_v27, %v6109_v59 }
 0x143   :  { %v6116_v2 = vunpack.c.l.b16 %v665_v3  ;;  %v622_v13 = vpack.c.bf16 %v560_v47, %v560_v47  ;;  %v471_v28 = vpack.c.bf16 %v456_v20, %v455_v40 }
 0x144   :  { %v350_v37 = vpop.f32.mrf.mxu0 }
 0x145   :  { %v697_v29 = vunpack.c.l.b16 %v622_v13  ;;  %4700 = vmatmul.msk.bf16.gmra.mxu2 %vm508_vm2, %v471_v28  ;;  %v351_v17 = vadd.f32 %v350_v37, %v5962_v42 }
 0x147   :  { %v721_v61 = vpack.c.b16 %v697_v29, %v696_v60  ;;  %v424_v40 = vadd.f32 %v423_v58, %v351_v17 }
 0x148   :  { %v562_v25 = vpop.f32.mrf.mxu2  ;;  %v430_v52 = vpop.f32.mrf.mxu1 }
 0x149   :  { %v799_v43 = vsel %vm508_vm2, %v721_v61, %v8160_v53  ;;  %v563_v35 = vadd.f32 %v562_v25, %v6109_v59  ;;  %v666_v3 = vpack.c.bf16 %v424_v40, %v424_v40  ;;  %v457_v13 = vmax.f32 %v424_v40, 0.0 }
 0x14a   :  { %922 = vmatmul.bf16.vlgmr.msra.gmra.mxu3 %v799_v43 }
 0x14b   :  { %v623_v28 = vpack.c.bf16 %v563_v35, %v563_v35  ;;  %v6129_v7 = vunpack.c.l.b16 %v666_v3  ;;  %v4742_v35 = vld [vmem:[#allocation2 + $0x168] sm:$0xf] }
 0x14c   :  { %v352_v27 = vpop.f32.mrf.mxu0 }
 0x14d   :  { %v353_v20 = vadd.f32 %v352_v27, %v5962_v42  ;;  %v698_v25 = vunpack.c.l.b16 %v623_v28 }
 0x14f   :  { %v426_v47 = vadd.f32 %v425_v46, %v353_v20  ;;  %v5552_v20 = vld [vmem:[#allocation2 + $0x16c] sm:$0xf0] }
 0x150   :  { %v564_v29 = vpop.f32.mrf.mxu2  ;;  %v433_v6 = vpop.f32.mrf.mxu1 }
 0x151   :  { %v458_v37 = vmax.f32 %v426_v47, 0.0  ;;  %v667_v60 = vpack.c.bf16 %v426_v47, %v426_v47  ;;  %v565_v24 = vadd.f32 %v564_v29, %v6109_v59  ;;  %v4743_v29 = vor.u32 %v5552_v20, %v4742_v35 }
 0x153   :  { %v6131_v61 = vunpack.c.l.b16 %v667_v60  ;;  %v624_v58 = vpack.c.bf16 %v565_v24, %v565_v24  ;;  %v472_v17 = vpack.c.bf16 %v458_v37, %v457_v13  ;;  %v8161_v24 = vpack.c.b16 %v6013_v34, %v6011_v33  ;;  %1103 = vmatpush.bf16.msrb.mxu1 %v4743_v29 }
 0x154   :  { %v355_v53 = vpop.f32.mrf.mxu0 }
 0x155   :  { %v699_v43 = vunpack.c.l.b16 %v624_v58  ;;  %v356_v27 = vadd.f32 %v355_v53, %v5962_v42  ;;  %4701 = vmatmul.msk.bf16.gmra.mxu2 %vm508_vm2, %v472_v17  ;;  %v794_v46 = vpack.c.b16 %v6131_v61, %v6129_v7 }
 0x157   :  { %v722_v40 = vpack.c.b16 %v699_v43, %v698_v25  ;;  %v429_v47 = vadd.f32 %v428_v18, %v356_v27 }
 0x158   :  { %v567_v3 = vpop.f32.mrf.mxu2  ;;  %v435_v28 = vpop.f32.mrf.mxu1 }
 0x159   :  { %v803_v13 = vsel %vm508_vm2, %v722_v40, %v8161_v24  ;;  %v668_v37 = vpack.c.bf16 %v429_v47, %v429_v47  ;;  %v568_v58 = vadd.f32 %v567_v3, %v6109_v59  ;;  %v459_v53 = vmax.f32 %v429_v47, 0.0 }
 0x15a   :  { %927 = vmatmul.bf16.gmra.mxu3 %v803_v13 }
 0x15b   :  { %v6143_v43 = vunpack.c.l.b16 %v668_v37  ;;  %v625_v27 = vpack.c.bf16 %v568_v58, %v568_v58 }
 0x15c   :  { %v357_v60 = vpop.f32.mrf.mxu0 }
 0x15d   :  { %v358_v17 = vadd.f32 %v357_v60, %v5962_v42  ;;  %v700_v13 = vunpack.c.l.b16 %v625_v27  ;;  %v8162_v60 = vpack.c.b16 %v6038_v14, %v6036_v12 }
 0x15f   :  { %v431_v25 = vadd.f32 %v430_v52, %v358_v17 }
 0x160   :  { %v569_v18 = vpop.f32.mrf.mxu2 }
 0x161   :  { %v460_v35 = vmax.f32 %v431_v25, 0.0  ;;  %v669_v20 = vpack.c.bf16 %v431_v25, %v431_v25  ;;  %v570_v33 = vadd.f32 %v569_v18, %v6109_v59 }
 0x163   :  { %v6146_v34 = vunpack.c.l.b16 %v669_v20  ;;  %v626_v40 = vpack.c.bf16 %v570_v33, %v570_v33  ;;  %v473_v29 = vpack.c.bf16 %v460_v35, %v459_v53 }
 0x164   :  { %v360_v24 = vpop.f32.mrf.mxu0 }
 0x165   :  { %v701_v28 = vunpack.c.l.b16 %v626_v40  ;;  %4702 = vmatmul.msk.bf16.gmra.mxu2 %vm508_vm2, %v473_v29  ;;  %v361_v47 = vadd.f32 %v360_v24, %v5962_v42  ;;  %v795_v52 = vpack.c.b16 %v6146_v34, %v6143_v43 }
 0x167   :  { %v723_v3 = vpack.c.b16 %v701_v28, %v700_v13  ;;  %v6156_v17 = vadd.f32 %v433_v6, %v361_v47  ;;  %v8163_v6 = vpack.c.b16 %v6052_v49, %v6050_v48  ;;  %v4779_v28 = vld [vmem:[#allocation2 + $0x1c8] sm:$0xf]  ;;  %v5558_v47 = vld [vmem:[#allocation2 + $0x1cc] sm:$0xf0]  ;;  %v8164_v48 = vpack.c.b16 %v6064_v22, %v6062_v21 }
 0x168   :  { %v572_v37 = vpop.f32.mrf.mxu2  ;;  %v8165_v21 = vpack.c.b16 %v6073_v16, %v6071_v1  ;;  %v4775_v16 = vld [vmem:[#allocation2 + $0x1b8] sm:$0xf] }
 0x169   :  { %v807_v58 = vsel %vm508_vm2, %v723_v3, %v8162_v60  ;;  %v573_v25 = vadd.f32 %v572_v37, %v6109_v59  ;;  %v461_v18 = vmax.f32 %v6156_v17, 0.0  ;;  %v4780_v3 = vor.u32 %v5558_v47, %v4779_v28 }
 0x16a   :  { %932 = vmatmul.bf16.gmra.mxu3 %v807_v58 }
 0x16b   :  { %v627_v42 = vpack.c.bf16 %v573_v25, %v573_v25  ;;  %v474_v35 = vpack.c.bf16 %v461_v18, %v461_v18  ;;  %1284 = vmatpush.bf16.msrb.mxu2 %v4780_v3 }
 0x16c   :  { %v362_v53 = vpop.f32.mrf.mxu0 }
 0x16d   :  { %v702_v40 = vunpack.c.l.b16 %v627_v42 }
 0x170   :  { %v574_v27 = vpop.f32.mrf.mxu2 }
 0x171   :  { %v575_v20 = vadd.f32 %v574_v27, %v6109_v59 }
 0x173   :  { %v628_v33 = vpack.c.bf16 %v575_v20, %v575_v20  ;;  %v4738_v20 = vld [vmem:[#allocation2 + $0x158] sm:$0xf] }
 0x175   :  { %v703_v29 = vunpack.c.l.b16 %v628_v33  ;;  %4703 = vmatmul.msk.bf16.gmra.mxu2 %vm508_vm2, %v474_v35  ;;  %v5551_v33 = vld [vmem:[#allocation2 + $0x15c] sm:$0xf0] }
 0x177   :  { %v724_v12 = vpack.c.b16 %v703_v29, %v702_v40  ;;  %v4739_v40 = vor.u32 %v5551_v33, %v4738_v20 }
 0x178   :  { %v577_v14 = vpop.f32.mrf.mxu2 }
 0x179   :  { %v811_v24 = vsel %vm508_vm2, %v724_v12, %v8163_v6  ;;  %v578_v13 = vadd.f32 %v577_v14, %v6109_v59  ;;  %1104 = vmatpush.bf16.msrb.mxu1 %v4739_v40 }
 0x17a   :  { %937 = vmatmul.bf16.gmra.mxu3 %v811_v24 }
 0x17b   :  { %v629_v60 = vpack.c.bf16 %v578_v13, %v578_v13 }
 0x17d   :  { %v704_v25 = vunpack.c.l.b16 %v629_v60 }
 0x180   :  { %v579_v37 = vpop.f32.mrf.mxu2 }
 0x181   :  { %v580_v58 = vadd.f32 %v579_v37, %v6109_v59 }
 0x183   :  { %v630_v53 = vpack.c.bf16 %v580_v58, %v580_v58 }
 0x185   :  { %v705_v18 = vunpack.c.l.b16 %v630_v53 }
 0x187   :  { %v725_v27 = vpack.c.b16 %v705_v18, %v704_v25 }
 0x188   :  { %v582_v42 = vpop.f32.mrf.mxu2 }
 0x189   :  { %v815_v49 = vsel %vm508_vm2, %v725_v27, %v8164_v48  ;;  %v583_v35 = vadd.f32 %v582_v42, %v6109_v59  ;;  %v8166_v48 = vpack.c.b16 %v6082_v19, %v6080_v26  ;;  %v8167_v26 = vpack.c.b16 %v6091_v0, %v6089_v55 }
 0x18a   :  { %942 = vmatmul.bf16.gmra.mxu3 %v815_v49 }
 0x18b   :  { %v631_v12 = vpack.c.bf16 %v583_v35, %v583_v35  ;;  %v5557_v35 = vld [vmem:[#allocation2 + $0x1bc] sm:$0xf0] }
 0x18c   :  { %v4776_v20 = vor.u32 %v5557_v35, %v4775_v16 }
 0x18d   :  { %v706_v24 = vunpack.c.l.b16 %v631_v12 }
 0x18e   :  { %1285 = vmatpush.bf16.msrb.mxu2 %v4776_v20 }
 0x190   :  { %v584_v29 = vpop.f32.mrf.mxu2 }
 0x191   :  { %v585_v14 = vadd.f32 %v584_v29, %v6109_v59 }
 0x193   :  { %v632_v6 = vpack.c.bf16 %v585_v14, %v585_v14 }
 0x195   :  { %v707_v13 = vunpack.c.l.b16 %v632_v6 }
 0x197   :  { %v726_v28 = vpack.c.b16 %v707_v13, %v706_v24 }
 0x198   :  { %v587_v47 = vpop.f32.mrf.mxu2 }
 0x199   :  { %v819_v22 = vsel %vm508_vm2, %v726_v28, %v8165_v21  ;;  %v588_v3 = vadd.f32 %v587_v47, %v6109_v59 }
 0x19a   :  { %947 = vmatmul.bf16.gmra.mxu3 %v819_v22 }
 0x19b   :  { %v633_v60 = vpack.c.bf16 %v588_v3, %v588_v3 }
 0x19d   :  { %v708_v25 = vunpack.c.l.b16 %v633_v60 }
 0x1a0   :  { %v589_v37 = vpop.f32.mrf.mxu2 }
 0x1a1   :  { %v590_v58 = vadd.f32 %v589_v37, %v6109_v59 }
 0x1a3   :  { %v634_v53 = vpack.c.bf16 %v590_v58, %v590_v58 }
 0x1a5   :  { %v709_v18 = vunpack.c.l.b16 %v634_v53 }
 0x1a7   :  { %v727_v27 = vpack.c.b16 %v709_v18, %v708_v25  ;;  %v8168_v25 = vpack.c.b16 %v6100_v32, %v6098_v8 }
 0x1a8   :  { %v592_v42 = vpop.f32.mrf.mxu2 }
 0x1a9   :  { %v823_v49 = vsel %vm508_vm2, %v727_v27, %v8166_v48  ;;  %v593_v1 = vadd.f32 %v592_v42, %v6109_v59  ;;  %v6200_v48 = vld [vmem:[%s8098_s2 + $0x2] ss:$0 sm:$0xff] }
 0x1aa   :  { %952 = vmatmul.bf16.gmra.mxu3 %v823_v49 }
 0x1ab   :  { %v635_v40 = vpack.c.bf16 %v593_v1, %v593_v1 }
 0x1ad   :  { %v710_v14 = vunpack.c.l.b16 %v635_v40 }
 0x1b0   :  { %v594_v33 = vpop.f32.mrf.mxu2 }
 0x1b1   :  { %v595_v29 = vadd.f32 %v594_v33, %v6109_v59 }
 0x1b3   :  { %v636_v12 = vpack.c.bf16 %v595_v29, %v595_v29 }
 0x1b5   :  { %v711_v6 = vunpack.c.l.b16 %v636_v12 }
 0x1b7   :  { %v728_v24 = vpack.c.b16 %v711_v6, %v710_v14  ;;  %v8169_v14 = vpack.c.b16 %v6116_v2, %v6114_v30 }
 0x1b8   :  { %v597_v13 = vpop.f32.mrf.mxu2 }
 0x1b9   :  { %v827_v19 = vsel %vm508_vm2, %v728_v24, %v8167_v26  ;;  %v598_v28 = vadd.f32 %v597_v13, %v6109_v59 }
 0x1ba   :  { %957 = vmatmul.bf16.gmra.mxu3 %v827_v19 }
 0x1bb   :  { %v637_v21 = vpack.c.bf16 %v598_v28, %v598_v28  ;;  %v4771_v28 = vld [vmem:[#allocation2 + $0x1a8] sm:$0xf] }
 0x1bd   :  { %v712_v37 = vunpack.c.l.b16 %v637_v21 }
 0x1c0   :  { %v599_v47 = vpop.f32.mrf.mxu2 }
 0x1c1   :  { %v600_v22 = vadd.f32 %v599_v47, %v6109_v59  ;;  %v5556_v47 = vld [vmem:[#allocation2 + $0x1ac] sm:$0xf0] }
 0x1c3   :  { %v638_v3 = vpack.c.bf16 %v600_v22, %v600_v22 }
 0x1c5   :  { %v713_v60 = vunpack.c.l.b16 %v638_v3  ;;  %v4772_v3 = vor.u32 %v5556_v47, %v4771_v28  ;;  %v670_v28 = vpack.c.bf16 %v6156_v17, %v6156_v17  ;;  %v4767_v17 = vld [vmem:[#allocation2 + $0x198] sm:$0xf] }
 0x1c7   :  { %v729_v58 = vpack.c.b16 %v713_v60, %v712_v37  ;;  %1286 = vmatpush.bf16.msrb.mxu2 %v4772_v3 }
 0x1c8   :  { %v602_v53 = vpop.f32.mrf.mxu2 }
 0x1c9   :  { %v831_v18 = vsel %vm508_vm2, %v729_v58, %v8168_v25  ;;  %v603_v55 = vadd.f32 %v602_v53, %v6109_v59 }
 0x1ca   :  { %962 = vmatmul.bf16.gmra.mxu3 %v831_v18 }
 0x1cb   :  { %v639_v42 = vpack.c.bf16 %v603_v55, %v603_v55 }
 0x1cd   :  { %v923_v0 = vpop.f32.mrf.mxu3  ;;  %v714_v35 = vunpack.c.l.b16 %v639_v42 }
 0x1ce   :  { %v924_v16 = vadd.f32 %v923_v0, %v6200_v48 }
 0x1d0   :  { %v604_v27 = vpop.f32.mrf.mxu2  ;;  %v987_v40 = vmax.f32 %v924_v16, 0.0 }
 0x1d1   :  { %v605_v49 = vadd.f32 %v604_v27, %v6109_v59 }
 0x1d3   :  { %v640_v1 = vpack.c.bf16 %v605_v49, %v605_v49 }
 0x1d5   :  { %v715_v32 = vunpack.c.l.b16 %v640_v1  ;;  %v925_v8 = vpop.f32.mrf.mxu3 }
 0x1d6   :  { %v926_v20 = vadd.f32 %v925_v8, %v6200_v48 }
 0x1d7   :  { %v730_v33 = vpack.c.b16 %v715_v32, %v714_v35 }
 0x1d8   :  { %v988_v29 = vmax.f32 %v926_v20, 0.0  ;;  %v607_v12 = vpop.f32.mrf.mxu2 }
 0x1d9   :  { %v835_v6 = vsel %vm508_vm2, %v730_v33, %v8169_v14  ;;  %v608_v13 = vadd.f32 %v607_v12, %v6109_v59 }
 0x1da   :  { %v1012_v24 = vpack.c.bf16 %v988_v29, %v987_v40  ;;  %967 = vmatmul.bf16.gmra.mxu3 %v835_v6 }
 0x1db   :  { %v641_v21 = vpack.c.bf16 %v608_v13, %v608_v13 }
 0x1dc   :  { %4752 = vmatmul.msk.bf16.vlgmr.msrb.gmra.mxu1 %vm508_vm2, %v1012_v24 }
 0x1dd   :  { %v928_v26 = vpop.f32.mrf.mxu3  ;;  %v716_v30 = vunpack.c.l.b16 %v641_v21 }
 0x1de   :  { %v929_v2 = vadd.f32 %v928_v26, %v6200_v48 }
 0x1e0   :  { %v609_v19 = vpop.f32.mrf.mxu2  ;;  %v989_v18 = vmax.f32 %v929_v2, 0.0 }
 0x1e1   :  { %v610_v22 = vadd.f32 %v609_v19, %v6109_v59 }
 0x1e3   :  { %v642_v37 = vpack.c.bf16 %v610_v22, %v610_v22  ;;  %v783_v22 = vunpack.c.l.b16 %v670_v28 }
 0x1e5   :  { %v717_v60 = vunpack.c.l.b16 %v642_v37  ;;  %v930_v58 = vpop.f32.mrf.mxu3  ;;  %v796_v34 = vpack.c.b16 %v783_v22, %v783_v22 }
 0x1e6   :  { %v931_v53 = vadd.f32 %v930_v58, %v6200_v48 }
 0x1e7   :  { %v731_v25 = vpack.c.b16 %v717_v60, %v716_v30 }
 0x1e8   :  { %v990_v55 = vmax.f32 %v931_v53, 0.0  ;;  %v612_v0 = vpop.f32.mrf.mxu2  ;;  %v5555_v53 = vld [vmem:[#allocation2 + $0x19c] sm:$0xf0] }
 0x1e9   :  { %v839_v27 = vsel %vm508_vm2, %v731_v25, %v794_v46  ;;  %v613_v49 = vadd.f32 %v612_v0, %v6109_v59  ;;  %v4768_v25 = vor.u32 %v5555_v53, %v4767_v17 }
 0x1ea   :  { %v1013_v42 = vpack.c.bf16 %v990_v55, %v989_v18  ;;  %972 = vmatmul.bf16.gmra.mxu3 %v839_v27 }
 0x1eb   :  { %v643_v35 = vpack.c.bf16 %v613_v49, %v613_v49  ;;  %1287 = vmatpush.bf16.msrb.mxu2 %v4768_v25 }
 0x1ec   :  { %4753 = vmatmul.msk.bf16.gmra.mxu1 %vm508_vm2, %v1013_v42 }
 0x1ed   :  { %v933_v1 = vpop.f32.mrf.mxu3  ;;  %v718_v33 = vunpack.c.l.b16 %v643_v35 }
 0x1ee   :  { %v934_v20 = vadd.f32 %v933_v1, %v6200_v48 }
 0x1f0   :  { %v614_v16 = vpop.f32.mrf.mxu2  ;;  %v991_v46 = vmax.f32 %v934_v20, 0.0 }
 0x1f1   :  { %v615_v32 = vadd.f32 %v614_v16, %v6109_v59 }
 0x1f3   :  { %v644_v8 = vpack.c.bf16 %v615_v32, %v615_v32 }
 0x1f5   :  { %v719_v40 = vunpack.c.l.b16 %v644_v8  ;;  %v935_v29 = vpop.f32.mrf.mxu3 }
 0x1f6   :  { %v936_v7 = vadd.f32 %v935_v29, %v6200_v48 }
 0x1f7   :  { %v732_v61 = vpack.c.b16 %v719_v40, %v718_v33 }
 0x1f8   :  { %v992_v12 = vmax.f32 %v936_v7, 0.0  ;;  %v617_v14 = vpop.f32.mrf.mxu2 }
 0x1f9   :  { %v618_v6 = vadd.f32 %v617_v14, %v6109_v59  ;;  %v843_v24 = vsel %vm508_vm2, %v732_v61, %v795_v52 }
 0x1fa   :  { %v1014_v13 = vpack.c.bf16 %v992_v12, %v991_v46  ;;  %977 = vmatmul.bf16.gmra.mxu3 %v843_v24 }
 0x1fb   :  { %v645_v26 = vpack.c.bf16 %v618_v6, %v618_v6 }
 0x1fc   :  { %4754 = vmatmul.msk.bf16.gmra.mxu1 %vm508_vm2, %v1014_v13 }
 0x1fd   :  { %v938_v19 = vpop.f32.mrf.mxu3  ;;  %v720_v21 = vunpack.c.l.b16 %v645_v26 }
 0x1fe   :  { %v939_v3 = vadd.f32 %v938_v19, %v6200_v48 }
 0x1ff   :  { %v733_v59 = vpack.c.b16 %v720_v21, %v720_v21 }
 0x200   :  { %v619_v47 = vpop.f32.mrf.mxu2  ;;  %v993_v52 = vmax.f32 %v939_v3, 0.0 }
 0x201   :  { %v847_v30 = vsel %vm508_vm2, %v733_v59, %v796_v34 }
 0x205   :  { %v940_v37 = vpop.f32.mrf.mxu3 }
 0x206   :  { %v941_v43 = vadd.f32 %v940_v37, %v6200_v48 }
 0x208   :  { %v994_v2 = vmax.f32 %v941_v43, 0.0 }
 0x20a   :  { %v1015_v60 = vpack.c.bf16 %v994_v2, %v993_v52  ;;  %982 = vmatmul.bf16.gmra.mxu3 %v847_v30  ;;  %v6253_v2 = vld [vmem:[%s8098_s2 + $0x3] ss:$0 sm:$0xff] }
 0x20c   :  { %4755 = vmatmul.msk.bf16.gmra.mxu1 %vm508_vm2, %v1015_v60 }
 0x20d   :  { %v943_v58 = vpop.f32.mrf.mxu3 }
 0x20e   :  { %v944_v18 = vadd.f32 %v943_v58, %v6200_v48 }
 0x210   :  { %v995_v27 = vmax.f32 %v944_v18, 0.0 }
 0x215   :  { %v945_v55 = vpop.f32.mrf.mxu3 }
 0x216   :  { %v946_v0 = vadd.f32 %v945_v55, %v6200_v48 }
 0x218   :  { %v996_v42 = vmax.f32 %v946_v0, 0.0 }
 0x21a   :  { %v1016_v49 = vpack.c.bf16 %v996_v42, %v995_v27 }
 0x21c   :  { %4756 = vmatmul.msk.bf16.gmra.mxu1 %vm508_vm2, %v1016_v49 }
 0x21d   :  { %v948_v1 = vpop.f32.mrf.mxu3 }
 0x21e   :  { %v949_v16 = vadd.f32 %v948_v1, %v6200_v48 }
 0x220   :  { %v997_v8 = vmax.f32 %v949_v16, 0.0 }
 0x225   :  { %v950_v35 = vpop.f32.mrf.mxu3 }
 0x226   :  { %v951_v32 = vadd.f32 %v950_v35, %v6200_v48 }
 0x228   :  { %v998_v20 = vmax.f32 %v951_v32, 0.0 }
 0x22a   :  { %v1017_v33 = vpack.c.bf16 %v998_v20, %v997_v8 }
 0x22c   :  { %4757 = vmatmul.msk.bf16.gmra.mxu1 %vm508_vm2, %v1017_v33 }
 0x22d   :  { %v953_v40 = vpop.f32.mrf.mxu3 }
 0x22e   :  { %v954_v29 = vadd.f32 %v953_v40, %v6200_v48 }
 0x230   :  { %v999_v46 = vmax.f32 %v954_v29, 0.0 }
 0x235   :  { %v955_v7 = vpop.f32.mrf.mxu3 }
 0x236   :  { %v956_v61 = vadd.f32 %v955_v7, %v6200_v48 }
 0x238   :  { %v1000_v12 = vmax.f32 %v956_v61, 0.0 }
 0x23a   :  { %v1018_v14 = vpack.c.bf16 %v1000_v12, %v999_v46 }
 0x23c   :  { %4758 = vmatmul.msk.bf16.gmra.mxu1 %vm508_vm2, %v1018_v14 }
 0x23d   :  { %v958_v6 = vpop.f32.mrf.mxu3 }
 0x23e   :  { %v959_v24 = vadd.f32 %v958_v6, %v6200_v48 }
 0x240   :  { %v1001_v19 = vmax.f32 %v959_v24, 0.0 }
 0x245   :  { %v960_v13 = vpop.f32.mrf.mxu3 }
 0x246   :  { %v961_v26 = vadd.f32 %v960_v13, %v6200_v48  ;;  %v6267_v13 = vld [vmem:[#allocation2 + $0x2a8] sm:$0xff] }
 0x248   :  { %v1002_v28 = vmax.f32 %v961_v26, 0.0 }
 0x24a   :  { %v1019_v47 = vpack.c.bf16 %v1002_v28, %v1001_v19  ;;  %v1606_v19 = vunpack.c.l.b16 %v6267_v13 }
 0x24c   :  { %4759 = vmatmul.msk.bf16.gmra.mxu1 %vm508_vm2, %v1019_v47  ;;  %v1634_v28 = vpack.c.b16 %v1606_v19, %v1606_v19  ;;  %v5584_v19 = vld [vmem:[#allocation2 + $0x29c] sm:$0xf0] }
 0x24d   :  { %v963_v21 = vpop.f32.mrf.mxu3 }
 0x24e   :  { %v964_v22 = vadd.f32 %v963_v21, %v6200_v48 }
 0x250   :  { %v1003_v37 = vmax.f32 %v964_v22, 0.0  ;;  %v1690_v22 = vsel %vm287_vm0, %v1634_v28, 0 }
 0x251   :  { %1770 = vmatpush.bf16.msrb.mxu3 %v1690_v22 }
 0x255   :  { %v965_v3 = vpop.f32.mrf.mxu3 }
 0x256   :  { %v966_v59 = vadd.f32 %v965_v3, %v6200_v48 }
 0x258   :  { %v1004_v43 = vmax.f32 %v966_v59, 0.0 }
 0x259   :  { %v1106_v34 = vpop.f32.mrf.mxu1 }
 0x25a   :  { %v1020_v52 = vpack.c.bf16 %v1004_v43, %v1003_v37  ;;  %v1107_v60 = vadd.f32 %v1106_v34, %v6253_v2 }
 0x25c   :  { %4760 = vmatmul.msk.bf16.gmra.mxu1 %vm508_vm2, %v1020_v52  ;;  %v1170_v53 = vmax.f32 %v1107_v60, 0.0  ;;  %v4853_v60 = vld [vmem:[#allocation2 + $0x248] sm:$0xf] }
 0x25d   :  { %v968_v30 = vpop.f32.mrf.mxu3 }
 0x25e   :  { %v969_v25 = vadd.f32 %v968_v30, %v6200_v48 }
 0x260   :  { %v1005_v42 = vmax.f32 %v969_v25, 0.0 }
 0x261   :  { %v1108_v58 = vpop.f32.mrf.mxu1 }
 0x262   :  { %v1109_v17 = vadd.f32 %v1108_v58, %v6253_v2  ;;  %v5574_v58 = vld [vmem:[#allocation2 + $0x24c] sm:$0xf0] }
 0x264   :  { %v1171_v18 = vmax.f32 %v1109_v17, 0.0  ;;  %v4854_v17 = vor.u32 %v5574_v58, %v4853_v60  ;;  %v5570_v60 = vld [vmem:[#allocation2 + $0x22c] sm:$0xf0] }
 0x265   :  { %v970_v55 = vpop.f32.mrf.mxu3 }
 0x266   :  { %v1195_v0 = vpack.c.bf16 %v1171_v18, %v1170_v53  ;;  %v971_v27 = vadd.f32 %v970_v55, %v6200_v48  ;;  %1695 = vmatpush.bf16.msrb.mxu0 %v4854_v17 }
 0x268   :  { %v1006_v49 = vmax.f32 %v971_v27, 0.0  ;;  %4781 = vmatmul.msk.bf16.vlgmr.msrb.gmra.mxu2 %vm508_vm2, %v1195_v0 }
 0x269   :  { %v1111_v1 = vpop.f32.mrf.mxu1 }
 0x26a   :  { %v1021_v16 = vpack.c.bf16 %v1006_v49, %v1005_v42  ;;  %v1112_v32 = vadd.f32 %v1111_v1, %v6253_v2 }
 0x26c   :  { %4761 = vmatmul.msk.bf16.gmra.mxu1 %vm508_vm2, %v1021_v16  ;;  %v1172_v33 = vmax.f32 %v1112_v32, 0.0 }
 0x26d   :  { %v973_v35 = vpop.f32.mrf.mxu3 }
 0x26e   :  { %v974_v40 = vadd.f32 %v973_v35, %v6200_v48 }
 0x270   :  { %v1007_v12 = vmax.f32 %v974_v40, 0.0 }
 0x271   :  { %v1113_v8 = vpop.f32.mrf.mxu1 }
 0x272   :  { %v1114_v20 = vadd.f32 %v1113_v8, %v6253_v2 }
 0x274   :  { %v1173_v29 = vmax.f32 %v1114_v20, 0.0 }
 0x275   :  { %v975_v7 = vpop.f32.mrf.mxu3 }
 0x276   :  { %v1196_v61 = vpack.c.bf16 %v1173_v29, %v1172_v33  ;;  %v976_v46 = vadd.f32 %v975_v7, %v6200_v48  ;;  %v4845_v29 = vld [vmem:[#allocation2 + $0x238] sm:$0xf]  ;;  %v5572_v7 = vld [vmem:[#allocation2 + $0x23c] sm:$0xf0] }
 0x278   :  { %v1008_v14 = vmax.f32 %v976_v46, 0.0  ;;  %4782 = vmatmul.msk.bf16.gmra.mxu2 %vm508_vm2, %v1196_v61  ;;  %v4846_v61 = vor.u32 %v5572_v7, %v4845_v29 }
 0x279   :  { %v1116_v6 = vpop.f32.mrf.mxu1 }
 0x27a   :  { %v1022_v24 = vpack.c.bf16 %v1008_v14, %v1007_v12  ;;  %v1117_v47 = vadd.f32 %v1116_v6, %v6253_v2  ;;  %1696 = vmatpush.bf16.msrb.mxu0 %v4846_v61 }
 0x27c   :  { %4762 = vmatmul.msk.bf16.gmra.mxu1 %vm508_vm2, %v1022_v24  ;;  %v1174_v59 = vmax.f32 %v1117_v47, 0.0 }
 0x27d   :  { %v978_v26 = vpop.f32.mrf.mxu3 }
 0x27e   :  { %v979_v37 = vadd.f32 %v978_v26, %v6200_v48  ;;  %v4893_v26 = vld [vmem:[#allocation2 + $0x298] sm:$0xf] }
 0x27f   :  { %v4894_v28 = vor.u32 %v5584_v19, %v4893_v26  ;;  %v4847_v26 = vld [vmem:[#allocation2 + $0x240] sm:$0xf0] }
 0x280   :  { %v1009_v53 = vmax.f32 %v979_v37, 0.0 }
 0x281   :  { %v1118_v21 = vpop.f32.mrf.mxu1  ;;  %1771 = vmatpush.bf16.msrb.mxu3 %v4894_v28 }
 0x282   :  { %v1119_v3 = vadd.f32 %v1118_v21, %v6253_v2 }
 0x284   :  { %v1175_v43 = vmax.f32 %v1119_v3, 0.0 }
 0x285   :  { %v980_v34 = vpop.f32.mrf.mxu3 }
 0x286   :  { %v1197_v52 = vpack.c.bf16 %v1175_v43, %v1174_v59  ;;  %v981_v30 = vadd.f32 %v980_v34, %v6200_v48  ;;  %v1607_v34 = vunpack.c.h.b16 %v6267_v13  ;;  %v5573_v13 = vld [vmem:[#allocation2 + $0x24c] sm:$0xf] }
 0x288   :  { %v1010_v25 = vmax.f32 %v981_v30, 0.0  ;;  %4783 = vmatmul.msk.bf16.gmra.mxu2 %vm508_vm2, %v1197_v52  ;;  %v4837_v30 = vld [vmem:[#allocation2 + $0x228] sm:$0xf]  ;;  %v1635_v58 = vpack.c.b16 %v1607_v34, %v1607_v34  ;;  %v4877_v34 = vld [vmem:[#allocation2 + $0x278] sm:$0xf] }
 0x289   :  { %v1121_v18 = vpop.f32.mrf.mxu1  ;;  %v4838_v17 = vor.u32 %v5570_v60, %v4837_v30 }
 0x28a   :  { %v1023_v55 = vpack.c.bf16 %v1010_v25, %v1009_v53  ;;  %v1122_v27 = vadd.f32 %v1121_v18, %v6253_v2  ;;  %v1693_v53 = vsel %vm287_vm0, %v1635_v58, 0 }
 0x28b   :  { %1697 = vmatpush.bf16.msrb.mxu0 %v4838_v17  ;;  %1916 = vmatpush.bf16.msra.mxu2 %v1693_v53  ;;  %v6302_v17 = vld [vmem:[%s8098_s2 + $0x4] ss:$0 sm:$0xff] }
 0x28c   :  { %4763 = vmatmul.msk.bf16.gmra.mxu1 %vm508_vm2, %v1023_v55  ;;  %v1176_v16 = vmax.f32 %v1122_v27, 0.0 }
 0x28d   :  { %v983_v0 = vpop.f32.mrf.mxu3 }
 0x28e   :  { %v984_v49 = vadd.f32 %v983_v0, %v6200_v48 }
 0x290   :  { %v1011_v8 = vmax.f32 %v984_v49, 0.0  ;;  %v4855_v49 = vld [vmem:[#allocation2 + $0x250] sm:$0xf0] }
 0x291   :  { %v1123_v42 = vpop.f32.mrf.mxu1 }
 0x292   :  { %v1124_v1 = vadd.f32 %v1123_v42, %v6253_v2  ;;  %v1024_v40 = vpack.c.bf16 %v1011_v8, %v1011_v8 }
 0x294   :  { %v1177_v35 = vmax.f32 %v1124_v1, 0.0  ;;  %v4885_v1 = vld [vmem:[#allocation2 + $0x288] sm:$0xf] }
 0x295   :  { %v985_v32 = vpop.f32.mrf.mxu3 }
 0x296   :  { %v1198_v20 = vpack.c.bf16 %v1177_v35, %v1176_v16  ;;  %v4858_v16 = vor.u32 %v5573_v13, %v4855_v49  ;;  %v5582_v35 = vld [vmem:[#allocation2 + $0x28c] sm:$0xf0] }
 0x297   :  { %v4886_v32 = vor.u32 %v5582_v35, %v4885_v1 }
 0x298   :  { %4784 = vmatmul.msk.bf16.gmra.mxu2 %vm508_vm2, %v1198_v20  ;;  %1841 = vmatpush.bf16.msra.mxu1 %v4858_v16 }
 0x299   :  { %v1126_v33 = vpop.f32.mrf.mxu1  ;;  %1772 = vmatpush.bf16.msrb.mxu3 %v4886_v32 }
 0x29a   :  { %v1127_v46 = vadd.f32 %v1126_v33, %v6253_v2 }
 0x29c   :  { %4764 = vmatmul.msk.bf16.gmra.mxu1 %vm508_vm2, %v1024_v40  ;;  %v1178_v14 = vmax.f32 %v1127_v46, 0.0  ;;  %v4829_v46 = vld [vmem:[#allocation2 + $0x218] sm:$0xf] }
 0x2a1   :  { %v1128_v48 = vpop.f32.mrf.mxu1 }
 0x2a2   :  { %v1129_v12 = vadd.f32 %v1128_v48, %v6253_v2  ;;  %v5568_v48 = vld [vmem:[#allocation2 + $0x21c] sm:$0xf0] }
 0x2a4   :  { %v1179_v6 = vmax.f32 %v1129_v12, 0.0 }
 0x2a6   :  { %v1199_v24 = vpack.c.bf16 %v1179_v6, %v1178_v14  ;;  %v4830_v14 = vor.u32 %v5568_v48, %v4829_v46 }
 0x2a8   :  { %4785 = vmatmul.msk.bf16.gmra.mxu2 %vm508_vm2, %v1199_v24  ;;  %1698 = vmatpush.bf16.msrb.mxu0 %v4830_v14  ;;  %v5571_v24 = vld [vmem:[#allocation2 + $0x23c] sm:$0xf]  ;;  %v4831_v14 = vld [vmem:[#allocation2 + $0x220] sm:$0xf0] }
 0x2a9   :  { %v1131_v47 = vpop.f32.mrf.mxu1  ;;  %v4850_v28 = vor.u32 %v5571_v24, %v4847_v26 }
 0x2aa   :  { %v1132_v21 = vadd.f32 %v1131_v47, %v6253_v2 }
 0x2ab   :  { %1842 = vmatpush.bf16.msra.mxu1 %v4850_v28  ;;  %v4823_v28 = vld [vmem:[#allocation2 + $0x210] sm:$0xf0] }
 0x2ac   :  { %v1180_v59 = vmax.f32 %v1132_v21, 0.0 }
 0x2b1   :  { %v1133_v22 = vpop.f32.mrf.mxu1 }
 0x2b2   :  { %v1134_v3 = vadd.f32 %v1133_v22, %v6253_v2 }
 0x2b4   :  { %v1181_v37 = vmax.f32 %v1134_v3, 0.0 }
 0x2b6   :  { %v1200_v43 = vpack.c.bf16 %v1181_v37, %v1180_v59  ;;  %v5583_v59 = vld [vmem:[#allocation2 + $0x29c] sm:$0xf]  ;;  %v4895_v37 = vld [vmem:[#allocation2 + $0x2a0] sm:$0xf0] }
 0x2b8   :  { %4786 = vmatmul.msk.bf16.gmra.mxu2 %vm508_vm2, %v1200_v43  ;;  %v4898_v43 = vor.u32 %v5583_v59, %v4895_v37 }
 0x2b9   :  { %v1136_v52 = vpop.f32.mrf.mxu1 }
 0x2ba   :  { %v1137_v25 = vadd.f32 %v1136_v52, %v6253_v2  ;;  %v5580_v52 = vld [vmem:[#allocation2 + $0x27c] sm:$0xf0]  ;;  %1917 = vmatpush.bf16.msra.mxu2 %v4898_v43 }
 0x2bb   :  { %v4878_v60 = vor.u32 %v5580_v52, %v4877_v34  ;;  %v4813_v52 = vld [vmem:[#allocation2 + $0x1f8] sm:$0xf] }
 0x2bc   :  { %v1182_v0 = vmax.f32 %v1137_v25, 0.0 }
 0x2bd   :  { %1773 = vmatpush.bf16.msrb.mxu3 %v4878_v60 }
 0x2c1   :  { %v1138_v18 = vpop.f32.mrf.mxu1 }
 0x2c2   :  { %v1139_v55 = vadd.f32 %v1138_v18, %v6253_v2  ;;  %v4821_v18 = vld [vmem:[#allocation2 + $0x208] sm:$0xf] }
 0x2c4   :  { %v1183_v27 = vmax.f32 %v1139_v55, 0.0  ;;  %v5566_v55 = vld [vmem:[#allocation2 + $0x20c] sm:$0xf0] }
 0x2c6   :  { %v1201_v42 = vpack.c.bf16 %v1183_v27, %v1182_v0  ;;  %v4822_v27 = vor.u32 %v5566_v55, %v4821_v18 }
 0x2c8   :  { %4787 = vmatmul.msk.bf16.gmra.mxu2 %vm508_vm2, %v1201_v42  ;;  %1699 = vmatpush.bf16.msrb.mxu0 %v4822_v27 }
 0x2c9   :  { %v1141_v8 = vpop.f32.mrf.mxu1 }
 0x2ca   :  { %v1142_v20 = vadd.f32 %v1141_v8, %v6253_v2 }
 0x2cc   :  { %v1184_v29 = vmax.f32 %v1142_v20, 0.0 }
 0x2d1   :  { %v1143_v33 = vpop.f32.mrf.mxu1 }
 0x2d2   :  { %v1144_v40 = vadd.f32 %v1143_v33, %v6253_v2 }
 0x2d4   :  { %v1185_v7 = vmax.f32 %v1144_v40, 0.0  ;;  %v5569_v40 = vld [vmem:[#allocation2 + $0x22c] sm:$0xf] }
 0x2d6   :  { %v1202_v61 = vpack.c.bf16 %v1185_v7, %v1184_v29  ;;  %v4839_v29 = vld [vmem:[#allocation2 + $0x230] sm:$0xf0] }
 0x2d8   :  { %4788 = vmatmul.msk.bf16.gmra.mxu2 %vm508_vm2, %v1202_v61  ;;  %v4842_v61 = vor.u32 %v5569_v40, %v4839_v29 }
 0x2d9   :  { %v1146_v12 = vpop.f32.mrf.mxu1 }
 0x2da   :  { %v1147_v6 = vadd.f32 %v1146_v12, %v6253_v2  ;;  %1843 = vmatpush.bf16.msra.mxu1 %v4842_v61  ;;  %v5567_v12 = vld [vmem:[#allocation2 + $0x21c] sm:$0xf]  ;;  %v5560_v61 = vld [vmem:[#allocation2 + $0x1dc] sm:$0xf0] }
 0x2dc   :  { %v1186_v21 = vmax.f32 %v1147_v6, 0.0  ;;  %v4834_v6 = vor.u32 %v5567_v12, %v4831_v14  ;;  %v4799_v12 = vld [vmem:[#allocation2 + $0x1e0] sm:$0xf0] }
 0x2de   :  { %1844 = vmatpush.bf16.msra.mxu1 %v4834_v6 }
 0x2e1   :  { %v1148_v19 = vpop.f32.mrf.mxu1 }
 0x2e2   :  { %v1149_v47 = vadd.f32 %v1148_v19, %v6253_v2  ;;  %v5565_v19 = vld [vmem:[#allocation2 + $0x20c] sm:$0xf] }
 0x2e4   :  { %v1187_v22 = vmax.f32 %v1149_v47, 0.0 }
 0x2e6   :  { %v1203_v3 = vpack.c.bf16 %v1187_v22, %v1186_v21  ;;  %v4826_v21 = vor.u32 %v5565_v19, %v4823_v28  ;;  %v5578_v19 = vld [vmem:[#allocation2 + $0x26c] sm:$0xf0] }
 0x2e8   :  { %4789 = vmatmul.msk.bf16.gmra.mxu2 %vm508_vm2, %v1203_v3  ;;  %1845 = vmatpush.bf16.msra.mxu1 %v4826_v21 }
 0x2e9   :  { %v1151_v30 = vpop.f32.mrf.mxu1 }
 0x2ea   :  { %v1152_v53 = vadd.f32 %v1151_v30, %v6253_v2  ;;  %v5564_v30 = vld [vmem:[#allocation2 + $0x1fc] sm:$0xf0] }
 0x2eb   :  { %v1289_v58 = vpop.f32.mrf.mxu2  ;;  %v4814_v60 = vor.u32 %v5564_v30, %v4813_v52 }
 0x2ec   :  { %v1290_v25 = vadd.f32 %v1289_v58, %v6302_v17  ;;  %v1188_v49 = vmax.f32 %v1152_v53, 0.0  ;;  %v5563_v58 = vld [vmem:[#allocation2 + $0x1fc] sm:$0xf]  ;;  %v4815_v53 = vld [vmem:[#allocation2 + $0x200] sm:$0xf0] }
 0x2ed   :  { %v4818_v55 = vor.u32 %v5563_v58, %v4815_v53  ;;  %1700 = vmatpush.bf16.msrb.mxu0 %v4814_v60 }
 0x2ee   :  { %v1353_v1 = vpack.c.bf16 %v1290_v25, %v1290_v25 }
 0x2ef   :  { %1846 = vmatpush.bf16.msra.mxu1 %v4818_v55 }
 0x2f0   :  { %v1403_v20 = vunpack.c.l.b16 %v1353_v1 }
 0x2f1   :  { %v1153_v0 = vpop.f32.mrf.mxu1 }
 0x2f2   :  { %v1154_v42 = vadd.f32 %v1153_v0, %v6253_v2 }
 0x2f3   :  { %v1291_v13 = vpop.f32.mrf.mxu2 }
 0x2f4   :  { %v1189_v16 = vmax.f32 %v1154_v42, 0.0  ;;  %v1292_v35 = vadd.f32 %v1291_v13, %v6302_v17  ;;  %v5581_v42 = vld [vmem:[#allocation2 + $0x28c] sm:$0xf]  ;;  %v4887_v13 = vld [vmem:[#allocation2 + $0x290] sm:$0xf0] }
 0x2f6   :  { %v1204_v32 = vpack.c.bf16 %v1189_v16, %v1188_v49  ;;  %v1354_v8 = vpack.c.bf16 %v1292_v35, %v1292_v35  ;;  %v4805_v49 = vld [vmem:[#allocation2 + $0x1e8] sm:$0xf]  ;;  %v4890_v16 = vor.u32 %v5581_v42, %v4887_v13  ;;  %v5562_v35 = vld [vmem:[#allocation2 + $0x1ec] sm:$0xf0] }
 0x2f8   :  { %v1404_v33 = vunpack.c.l.b16 %v1354_v8  ;;  %4790 = vmatmul.msk.bf16.gmra.mxu2 %vm508_vm2, %v1204_v32  ;;  %v5561_v32 = vld [vmem:[#allocation2 + $0x1ec] sm:$0xf]  ;;  %v4807_v8 = vld [vmem:[#allocation2 + $0x1f0] sm:$0xf0] }
 0x2f9   :  { %v1156_v7 = vpop.f32.mrf.mxu1  ;;  %v4810_v40 = vor.u32 %v5561_v32, %v4807_v8  ;;  %1918 = vmatpush.bf16.msra.mxu2 %v4890_v16  ;;  %v5579_v8 = vld [vmem:[#allocation2 + $0x27c] sm:$0xf] }
 0x2fa   :  { %v1428_v46 = vpack.c.b16 %v1404_v33, %v1403_v20  ;;  %v1157_v24 = vadd.f32 %v1156_v7, %v6253_v2  ;;  %v4806_v33 = vor.u32 %v5562_v35, %v4805_v49  ;;  %v4797_v7 = vld [vmem:[#allocation2 + $0x1d8] sm:$0xf] }
 0x2fb   :  { %v1294_v48 = vpop.f32.mrf.mxu2  ;;  %1847 = vmatpush.bf16.msra.mxu1 %v4810_v40 }
 0x2fc   :  { %1441 = vrot.lane.b32.xlu0 %v1428_v46, %s5756_s14  ;;  %v1295_v26 = vadd.f32 %v1294_v48, %v6302_v17  ;;  %v1190_v59 = vmax.f32 %v1157_v24, 0.0  ;;  %1701 = vmatpush.bf16.msrb.mxu0 %v4806_v33  ;;  %v4798_v46 = vor.u32 %v5560_v61, %v4797_v7  ;;  %v5559_v48 = vld [vmem:[#allocation2 + $0x1dc] sm:$0xf]  ;;  %v4861_v7 = vld [vmem:[#allocation2 + $0x258] sm:$0xf] }
 0x2fd   :  { %v4802_v14 = vor.u32 %v5559_v48, %v4799_v12  ;;  %v5576_v61 = vld [vmem:[#allocation2 + $0x25c] sm:$0xf0] }
 0x2fe   :  { %v1355_v37 = vpack.c.bf16 %v1295_v26, %v1295_v26  ;;  %v4869_v26 = vld [vmem:[#allocation2 + $0x268] sm:$0xf] }
 0x2ff   :  { %1848 = vmatpush.bf16.msra.mxu1 %v4802_v14 }
 0x300   :  { %v1405_v0 = vunpack.c.l.b16 %v1355_v37  ;;  %1702 = vmatpush.bf16.msrb.mxu0 %v4798_v46  ;;  %v4862_v46 = vor.u32 %v5576_v61, %v4861_v7 }
 0x301   :  { %v1158_v47 = vpop.f32.mrf.mxu1 }
 0x302   :  { %v1159_v22 = vadd.f32 %v1158_v47, %v6253_v2  ;;  %v4870_v47 = vor.u32 %v5578_v19, %v4869_v26  ;;  %1849 = vmatmul.bf16.vlgmr.msra.gmra.mxu1 %v5805_v39 }
 0x303   :  { %v1296_v3 = vpop.f32.mrf.mxu2  ;;  %1703 = vmatmul.bf16.vlgmr.msrb.gmra.mxu0 %v5805_v39 }
 0x304   :  { %v1191_v43 = vmax.f32 %v1159_v22, 0.0  ;;  %v1297_v34 = vadd.f32 %v1296_v3, %v6302_v17  ;;  %1774 = vmatpush.bf16.msrb.mxu3 %v4870_v47 }
 0x306   :  { %v1205_v25 = vpack.c.bf16 %v1191_v43, %v1190_v59  ;;  %v1356_v18 = vpack.c.bf16 %v1297_v34, %v1297_v34 }
 0x308   :  { %v1406_v27 = vunpack.c.l.b16 %v1356_v18  ;;  %4791 = vmatmul.msk.bf16.gmra.mxu2 %vm508_vm2, %v1205_v25  ;;  %1775 = vmatpush.bf16.msrb.mxu3 %v4862_v46 }
 0x309   :  { %v1161_v1 = vpop.f32.mrf.mxu1 }
 0x30a   :  { %v1429_v20 = vpack.c.b16 %v1406_v27, %v1405_v0  ;;  %v1162_v6 = vadd.f32 %v1161_v1, %v6253_v2 }
 0x30b   :  { %v1299_v29 = vpop.f32.mrf.mxu2 }
 0x30c   :  { %1443 = vrot.lane.b32.xlu0 %v1429_v20, %s5756_s14  ;;  %v1300_v24 = vadd.f32 %v1299_v29, %v6302_v17  ;;  %v1192_v3 = vmax.f32 %v1162_v6, 0.0 }
 0x30e   :  { %v1357_v59 = vpack.c.bf16 %v1300_v24, %v1300_v24 }
 0x310   :  { %v1407_v30 = vunpack.c.l.b16 %v1357_v59 }
 0x311   :  { %v1163_v28 = vpop.f32.mrf.mxu1 }
 0x312   :  { %v1164_v21 = vadd.f32 %v1163_v28, %v6253_v2  ;;  %1854 = vmatmul.bf16.gmra.mxu1 %v5824_v45 }
 0x313   :  { %v1301_v22 = vpop.f32.mrf.mxu2  ;;  %1708 = vmatmul.bf16.gmra.mxu0 %v5824_v45 }
 0x314   :  { %v1193_v37 = vmax.f32 %v1164_v21, 0.0  ;;  %v1302_v43 = vadd.f32 %v1301_v22, %v6302_v17 }
 0x316   :  { %v1206_v34 = vpack.c.bf16 %v1193_v37, %v1192_v3  ;;  %v1358_v52 = vpack.c.bf16 %v1302_v43, %v1302_v43  ;;  %v5577_v37 = vld [vmem:[#allocation2 + $0x26c] sm:$0xf]  ;;  %v4871_v43 = vld [vmem:[#allocation2 + $0x270] sm:$0xf0] }
 0x318   :  { %v1408_v60 = vunpack.c.l.b16 %v1358_v52  ;;  %4792 = vmatmul.msk.bf16.gmra.mxu2 %vm508_vm2, %v1206_v34  ;;  %v4874_v34 = vor.u32 %v5577_v37, %v4871_v43 }
 0x319   :  { %v1166_v58 = vpop.f32.mrf.mxu1 }
 0x31a   :  { %v1430_v53 = vpack.c.b16 %v1408_v60, %v1407_v30  ;;  %v1167_v18 = vadd.f32 %v1166_v58, %v6253_v2  ;;  %v4879_v2 = vld [vmem:[#allocation2 + $0x280] sm:$0xf0]  ;;  %v5575_v58 = vld [vmem:[#allocation2 + $0x25c] sm:$0xf] }
 0x31b   :  { %v1304_v25 = vpop.f32.mrf.mxu2  ;;  %v4882_v20 = vor.u32 %v5579_v8, %v4879_v2  ;;  %v4984_v8 = vld [vmem:[#allocation2 + $0x320] sm:$0xf]  ;;  %v5600_v2 = vld [vmem:[#allocation2 + $0x324] sm:$0xf0] }
 0x31c   :  { %1445 = vrot.lane.b32.xlu1 %v1430_v53, %s5756_s14  ;;  %v1305_v55 = vadd.f32 %v1304_v25, %v6302_v17  ;;  %v1194_v27 = vmax.f32 %v1167_v18, 0.0  ;;  %v4863_v53 = vld [vmem:[#allocation2 + $0x260] sm:$0xf0] }
 0x31d   :  { %1919 = vmatpush.bf16.msra.mxu2 %v4882_v20  ;;  %v4866_v18 = vor.u32 %v5575_v58, %v4863_v53  ;;  %v4985_v20 = vor.u32 %v5600_v2, %v4984_v8  ;;  %v5596_v8 = vld [vmem:[#allocation2 + $0x304] sm:$0xf0] }
 0x31e   :  { %v1359_v13 = vpack.c.bf16 %v1305_v55, %v1305_v55  ;;  %v1207_v1 = vpack.c.bf16 %v1194_v27, %v1194_v27  ;;  %v5616_v27 = vld [vmem:[#allocation2 + $0x3a4] sm:$0xf0] }
 0x31f   :  { %2262 = vmatpush.bf16.msra.mxu0 %v4985_v20 }
 0x320   :  { %v1409_v35 = vunpack.c.l.b16 %v1359_v13 }
 0x321   :  { %v1168_v0 = vpop.f32.mrf.mxu1  ;;  %1920 = vmatpush.bf16.msra.mxu2 %v4874_v34 }
 0x322   :  { %1859 = vmatmul.bf16.gmra.mxu1 %v5843_v51  ;;  %v5048_v0 = vld [vmem:[#allocation2 + $0x3a0] sm:$0xf] }
 0x323   :  { %v1306_v42 = vpop.f32.mrf.mxu2  ;;  %1713 = vmatmul.bf16.gmra.mxu0 %v5843_v51 }
 0x324   :  { %v1307_v49 = vadd.f32 %v1306_v42, %v6302_v17  ;;  %v5049_v42 = vor.u32 %v5616_v27, %v5048_v0 }
 0x325   :  { %1921 = vmatpush.bf16.msra.mxu2 %v4866_v18 }
 0x326   :  { %v1360_v16 = vpack.c.bf16 %v1307_v49, %v1307_v49  ;;  %2335 = vmatpush.bf16.msra.mxu3 %v5049_v42 }
 0x328   :  { %v1410_v32 = vunpack.c.l.b16 %v1360_v16  ;;  %4793 = vmatmul.msk.bf16.gmra.mxu2 %vm508_vm2, %v1207_v1 }
 0x32a   :  { %v1431_v33 = vpack.c.b16 %v1410_v32, %v1409_v35 }
 0x32b   :  { %v1309_v40 = vpop.f32.mrf.mxu2 }
 0x32c   :  { %1447 = vrot.lane.b32.xlu1 %v1431_v33, %s5756_s14  ;;  %v1310_v29 = vadd.f32 %v1309_v40, %v6302_v17 }
 0x32e   :  { %v1361_v12 = vpack.c.bf16 %v1310_v29, %v1310_v29 }
 0x330   :  { %v1411_v24 = vunpack.c.l.b16 %v1361_v12 }
 0x332   :  { %1864 = vmatmul.bf16.gmra.mxu1 %v5862_v57 }
 0x333   :  { %v1311_v48 = vpop.f32.mrf.mxu2  ;;  %1718 = vmatmul.bf16.gmra.mxu0 %v5862_v57 }
 0x334   :  { %v1312_v14 = vadd.f32 %v1311_v48, %v6302_v17 }
 0x336   :  { %v1362_v6 = vpack.c.bf16 %v1312_v14, %v1312_v14 }
 0x338   :  { %v1412_v26 = vunpack.c.l.b16 %v1362_v6  ;;  %v5040_v6 = vld [vmem:[#allocation2 + $0x390] sm:$0xf] }
 0x33a   :  { %v1432_v19 = vpack.c.b16 %v1412_v26, %v1411_v24  ;;  %v5614_v24 = vld [vmem:[#allocation2 + $0x394] sm:$0xf0] }
 0x33b   :  { %v1314_v28 = vpop.f32.mrf.mxu2  ;;  %v5041_v26 = vor.u32 %v5614_v24, %v5040_v6 }
 0x33c   :  { %1449 = vrot.lane.b32.xlu2 %v1432_v19, %s5756_s14  ;;  %v1315_v47 = vadd.f32 %v1314_v28, %v6302_v17 }
 0x33d   :  { %2336 = vmatpush.bf16.msra.mxu3 %v5041_v26  ;;  %v4986_v26 = vld [vmem:[#allocation2 + $0x328] sm:$0xf0] }
 0x33e   :  { %v1363_v22 = vpack.c.bf16 %v1315_v47, %v1315_v47 }
 0x340   :  { %v1413_v52 = vunpack.c.l.b16 %v1363_v22 }
 0x342   :  { %1869 = vmatmul.bf16.gmra.mxu1 %v5881_v63 }
 0x343   :  { %v1316_v21 = vpop.f32.mrf.mxu2  ;;  %1723 = vmatmul.bf16.gmra.mxu0 %v5881_v63 }
 0x344   :  { %v1317_v3 = vadd.f32 %v1316_v21, %v6302_v17 }
 0x346   :  { %v1364_v59 = vpack.c.bf16 %v1317_v3, %v1317_v3  ;;  %v4976_v3 = vld [vmem:[#allocation2 + $0x310] sm:$0xf] }
 0x348   :  { %v1414_v30 = vunpack.c.l.b16 %v1364_v59  ;;  %v5598_v59 = vld [vmem:[#allocation2 + $0x314] sm:$0xf0] }
 0x349   :  { %v4977_v37 = vor.u32 %v5598_v59, %v4976_v3 }
 0x34a   :  { %v1433_v60 = vpack.c.b16 %v1414_v30, %v1413_v52 }
 0x34b   :  { %v1319_v25 = vpop.f32.mrf.mxu2  ;;  %2263 = vmatpush.bf16.msra.mxu0 %v4977_v37 }
 0x34c   :  { %1451 = vrot.lane.b32.xlu2 %v1433_v60, %s5756_s14  ;;  %v1320_v55 = vadd.f32 %v1319_v25, %v6302_v17 }
 0x34e   :  { %v1365_v49 = vpack.c.bf16 %v1320_v55, %v1320_v55 }
 0x350   :  { %v1415_v35 = vunpack.c.l.b16 %v1365_v49 }
 0x352   :  { %1874 = vmatmul.bf16.gmra.mxu1 %v5900_v5 }
 0x353   :  { %v1321_v13 = vpop.f32.mrf.mxu2  ;;  %1728 = vmatmul.bf16.gmra.mxu0 %v5900_v5 }
 0x354   :  { %v1322_v1 = vadd.f32 %v1321_v13, %v6302_v17 }
 0x356   :  { %v1366_v16 = vpack.c.bf16 %v1322_v1, %v1322_v1  ;;  %v5032_v1 = vld [vmem:[#allocation2 + $0x380] sm:$0xf] }
 0x358   :  { %v1416_v32 = vunpack.c.l.b16 %v1366_v16  ;;  %v5612_v16 = vld [vmem:[#allocation2 + $0x384] sm:$0xf0] }
 0x35a   :  { %v1434_v33 = vpack.c.b16 %v1416_v32, %v1415_v35  ;;  %v4968_v35 = vld [vmem:[#allocation2 + $0x300] sm:$0xf]  ;;  %v5033_v32 = vor.u32 %v5612_v16, %v5032_v1 }
 0x35b   :  { %v1324_v40 = vpop.f32.mrf.mxu2  ;;  %v4969_v20 = vor.u32 %v5596_v8, %v4968_v35 }
 0x35c   :  { %1453 = vrot.lane.b32.xlu0 %v1434_v33, %s5756_s14  ;;  %v1325_v29 = vadd.f32 %v1324_v40, %v6302_v17  ;;  %2337 = vmatpush.bf16.msra.mxu3 %v5033_v32 }
 0x35d   :  { %2264 = vmatpush.bf16.msra.mxu0 %v4969_v20 }
 0x35e   :  { %v1367_v61 = vpack.c.bf16 %v1325_v29, %v1325_v29 }
 0x360   :  { %v1417_v12 = vunpack.c.l.b16 %v1367_v61 }
 0x362   :  { %1879 = vmatmul.bf16.gmra.mxu1 %v5919_v11 }
 0x363   :  { %v1326_v7 = vpop.f32.mrf.mxu2  ;;  %1733 = vmatmul.bf16.gmra.mxu0 %v5919_v11 }
 0x364   :  { %v1327_v46 = vadd.f32 %v1326_v7, %v6302_v17 }
 0x366   :  { %v1368_v48 = vpack.c.bf16 %v1327_v46, %v1327_v46 }
 0x368   :  { %v1418_v14 = vunpack.c.l.b16 %v1368_v48  ;;  %v5615_v48 = vld [vmem:[#allocation2 + $0x3a4] sm:$0xf] }
 0x36a   :  { %v1435_v19 = vpack.c.b16 %v1418_v14, %v1417_v12  ;;  %v5050_v12 = vld [vmem:[#allocation2 + $0x3a8] sm:$0xf0]  ;;  %v5599_v14 = vld [vmem:[#allocation2 + $0x324] sm:$0xf] }
 0x36b   :  { %v1329_v28 = vpop.f32.mrf.mxu2  ;;  %v5053_v24 = vor.u32 %v5615_v48, %v5050_v12 }
 0x36c   :  { %1455 = vrot.lane.b32.xlu1 %v1435_v19, %s5756_s14  ;;  %v1330_v22 = vadd.f32 %v1329_v28, %v6302_v17  ;;  %v4989_v28 = vor.u32 %v5599_v14, %v4986_v26 }
 0x36d   :  { %2481 = vmatpush.bf16.msrb.mxu2 %v5053_v24 }
 0x36e   :  { %v1442_v47 = vpop.permute.xlu0 %1441  ;;  %v1369_v34 = vpack.c.bf16 %v1330_v22, %v1330_v22  ;;  %v5610_v22 = vld [vmem:[#allocation2 + $0x374] sm:$0xf0]  ;;  %2408 = vmatpush.bf16.msrb.mxu1 %v4989_v28 }
 0x36f   :  { %v6353_v21 = vsel %vm247_vm1, %v5787_v23, %v1442_v47  ;;  %v5024_v47 = vld [vmem:[#allocation2 + $0x370] sm:$0xf] }
 0x370   :  { %4899 = vmatmul.msk.bf16.vlgmr.msrb.gmra.mxu3 %vm1662_vm3, %v6353_v21  ;;  %4912 = vmatmul.msk.bf16.vlgmr.msra.gmra.mxu2 %vm1662_vm3, %v6353_v21  ;;  %v1419_v30 = vunpack.c.l.b16 %v1369_v34  ;;  %v5025_v3 = vor.u32 %v5610_v22, %v5024_v47  ;;  %v5608_v22 = vld [vmem:[#allocation2 + $0x364] sm:$0xf0] }
 0x372   :  { %1884 = vmatmul.bf16.gmra.mxu1 %v5938_v31  ;;  %2338 = vmatpush.bf16.msra.mxu3 %v5025_v3  ;;  %v4952_v3 = vld [vmem:[#allocation2 + $0x2e0] sm:$0xf] }
 0x373   :  { %v1331_v43 = vpop.f32.mrf.mxu2  ;;  %1738 = vmatmul.bf16.gmra.mxu0 %v5938_v31  ;;  %v5662_v31 = vld [vmem:[#allocation2 + $0x514] sm:$0xf0] }
 0x374   :  { %v1332_v52 = vadd.f32 %v1331_v43, %v6302_v17 }
 0x376   :  { %v1370_v23 = vpack.c.bf16 %v1332_v52, %v1332_v52 }
 0x378   :  { %v1420_v60 = vunpack.c.l.b16 %v1370_v23 }
 0x37a   :  { %v1436_v58 = vpack.c.b16 %v1420_v60, %v1419_v30 }
 0x37b   :  { %v1334_v53 = vpop.f32.mrf.mxu2 }
 0x37c   :  { %1457 = vrot.lane.b32.xlu2 %v1436_v58, %s5756_s14  ;;  %v1335_v55 = vadd.f32 %v1334_v53, %v6302_v17 }
 0x37e   :  { %v1444_v25 = vpop.permute.xlu0 %1443  ;;  %v1371_v27 = vpack.c.bf16 %v1335_v55, %v1335_v55  ;;  %v4960_v55 = vld [vmem:[#allocation2 + $0x2f0] sm:$0xf] }
 0x37f   :  { %v6366_v18 = vsel %vm247_vm1, %v5803_v38, %v1444_v25  ;;  %v6388_v46 = vpop.f32.mrf.mxu1 }
 0x380   :  { %4900 = vmatmul.msk.bf16.gmra.mxu3 %vm1662_vm3, %v6366_v18  ;;  %4913 = vmatmul.msk.bf16.gmra.mxu2 %vm1662_vm3, %v6366_v18  ;;  %v1421_v49 = vunpack.c.l.b16 %v1371_v27  ;;  %v6386_v61 = vpop.f32.mrf.mxu0  ;;  %v5613_v27 = vld [vmem:[#allocation2 + $0x394] sm:$0xf] }
 0x382   :  { %1889 = vmatmul.bf16.gmra.mxu1 %v5957_v41 }
 0x383   :  { %v1336_v0 = vpop.f32.mrf.mxu2  ;;  %1743 = vmatmul.bf16.gmra.mxu0 %v5957_v41 }
 0x384   :  { %v1337_v42 = vadd.f32 %v1336_v0, %v6302_v17  ;;  %v5594_v0 = vld [vmem:[#allocation2 + $0x2f4] sm:$0xf0] }
 0x386   :  { %v1372_v13 = vpack.c.bf16 %v1337_v42, %v1337_v42 }
 0x387   :  { %v6395_v52 = vpop.f32.mrf.mxu1 }
 0x388   :  { %v1422_v38 = vunpack.c.l.b16 %v1372_v13  ;;  %v6393_v34 = vpop.f32.mrf.mxu0  ;;  %v4961_v13 = vor.u32 %v5594_v0, %v4960_v55  ;;  %v5611_v0 = vld [vmem:[#allocation2 + $0x384] sm:$0xf] }
 0x38a   :  { %v1437_v2 = vpack.c.b16 %v1422_v38, %v1421_v49  ;;  %v5042_v49 = vld [vmem:[#allocation2 + $0x398] sm:$0xf0]  ;;  %v5597_v38 = vld [vmem:[#allocation2 + $0x314] sm:$0xf]  ;;  %2265 = vmatpush.bf16.msra.mxu0 %v4961_v13  ;;  %v5595_v13 = vld [vmem:[#allocation2 + $0x304] sm:$0xf] }
 0x38b   :  { %v1339_v33 = vpop.f32.mrf.mxu2  ;;  %v5045_v1 = vor.u32 %v5613_v27, %v5042_v49  ;;  %v5034_v27 = vld [vmem:[#allocation2 + $0x388] sm:$0xf0] }
 0x38c   :  { %1459 = vrot.lane.b32.xlu0 %v1437_v2, %s5756_s14  ;;  %v1340_v7 = vadd.f32 %v1339_v33, %v6302_v17 }
 0x38d   :  { %2482 = vmatpush.bf16.msrb.mxu2 %v5045_v1  ;;  %v5593_v1 = vld [vmem:[#allocation2 + $0x2f4] sm:$0xf] }
 0x38e   :  { %v1446_v40 = vpop.permute.xlu1 %1445 }
 0x38f   :  { %v6379_v29 = vsel %vm247_vm1, %v5822_v44, %v1446_v40  ;;  %v1373_v44 = vpack.c.bf16 %v1340_v7, %v1340_v7  ;;  %v6409_v42 = vpop.f32.mrf.mxu1 }
 0x390   :  { %8170 = vst [vmem:[#allocation18_spill] sm:$0xff] %v6379_v29  ;;  %4901 = vmatmul.msk.bf16.gmra.mxu3 %vm1662_vm3, %v6379_v29  ;;  %4914 = vmatmul.msk.bf16.gmra.mxu2 %vm1662_vm3, %v6379_v29  ;;  %v6407_v25 = vpop.f32.mrf.mxu0 }
 0x391   :  { %v1423_v37 = vunpack.c.l.b16 %v1373_v44 }
 0x392   :  { %1894 = vmatmul.bf16.gmra.mxu1 %v5987_v9 }
 0x393   :  { %v1341_v6 = vpop.f32.mrf.mxu2  ;;  %1748 = vmatmul.bf16.gmra.mxu0 %v5987_v9 }
 0x394   :  { %v1342_v19 = vadd.f32 %v1341_v6, %v6302_v17 }
 0x396   :  { %v1374_v59 = vpack.c.bf16 %v1342_v19, %v1342_v19  ;;  %v1450_v14 = vpop.permute.xlu2 %1449 }
 0x397   :  { %v6416_v7 = vpop.f32.mrf.mxu1  ;;  %v6422_v26 = vsel %vm247_vm1, %v5860_v56, %v1450_v14  ;;  %v5016_v56 = vld [vmem:[#allocation2 + $0x360] sm:$0xf]  ;;  %v5591_v14 = vld [vmem:[#allocation2 + $0x2e4] sm:$0xf] }
 0x398   :  { %v1424_v43 = vunpack.c.l.b16 %v1374_v59  ;;  %v6414_v40 = vpop.f32.mrf.mxu0  ;;  %8172 = vst [vmem:[#allocation20_spill] sm:$0xff] %v6422_v26 }
 0x39a   :  { %v1438_v23 = vpack.c.b16 %v1424_v43, %v1423_v37  ;;  %v5017_v37 = vor.u32 %v5608_v22, %v5016_v56  ;;  %v5592_v43 = vld [vmem:[#allocation2 + $0x2e4] sm:$0xf0]  ;;  %v5589_v56 = vld [vmem:[#allocation2 + $0x2d4] sm:$0xf] }
 0x39b   :  { %v1344_v30 = vpop.f32.mrf.mxu2 }
 0x39c   :  { %1461 = vrot.lane.b32.xlu1 %v1438_v23, %s5756_s14  ;;  %v1345_v53 = vadd.f32 %v1344_v30, %v6302_v17  ;;  %v4953_v30 = vor.u32 %v5592_v43, %v4952_v3  ;;  %2339 = vmatpush.bf16.msra.mxu3 %v5017_v37  ;;  %v4946_v3 = vld [vmem:[#allocation2 + $0x2d8] sm:$0xf0] }
 0x39d   :  { %v4949_v37 = vor.u32 %v5589_v56, %v4946_v3 }
 0x39e   :  { %v1448_v60 = vpop.permute.xlu1 %1447  ;;  %v1375_v32 = vpack.c.bf16 %v1345_v53, %v1345_v53  ;;  %2266 = vmatpush.bf16.msra.mxu0 %v4953_v30  ;;  %v4936_v30 = vld [vmem:[#allocation2 + $0x2c0] sm:$0xf] }
 0x39f   :  { %v6400_v58 = vsel %vm247_vm1, %v5841_v50, %v1448_v60  ;;  %v4978_v50 = vld [vmem:[#allocation2 + $0x318] sm:$0xf0]  ;;  %v6430_v28 = vpop.f32.mrf.mxu1 }
 0x3a0   :  { %8171 = vst [vmem:[#allocation19_spill] sm:$0xff] %v6400_v58  ;;  %4902 = vmatmul.msk.bf16.gmra.mxu3 %vm1662_vm3, %v6400_v58  ;;  %4915 = vmatmul.msk.bf16.gmra.mxu2 %vm1662_vm3, %v6400_v58  ;;  %v4981_v16 = vor.u32 %v5597_v38, %v4978_v50  ;;  %v1425_v20 = vunpack.c.l.b16 %v1375_v32  ;;  %v6428_v19 = vpop.f32.mrf.mxu0  ;;  %v5037_v38 = vor.u32 %v5611_v0, %v5034_v27  ;;  %v4970_v50 = vld [vmem:[#allocation2 + $0x308] sm:$0xf0]  ;;  %v5587_v0 = vld [vmem:[#allocation2 + $0x2c4] sm:$0xf] }
 0x3a2   :  { %2409 = vmatpush.bf16.msrb.mxu1 %v4981_v16  ;;  %v4962_v16 = vld [vmem:[#allocation2 + $0x2f8] sm:$0xf0]  ;;  %2483 = vmatpush.bf16.msrb.mxu2 %v5037_v38  ;;  %v4938_v38 = vld [vmem:[#allocation2 + $0x2c8] sm:$0xf0] }
 0x3a3   :  { %v1346_v35 = vpop.f32.mrf.mxu2  ;;  %1753 = vmatmul.bf16.gmra.mxu0 %v6015_v36  ;;  %1899 = vmatmul.bf16.gmra.mxu1 %v6015_v36 }
 0x3a4   :  { %v1347_v8 = vadd.f32 %v1346_v35, %v6302_v17  ;;  %v4973_v35 = vor.u32 %v5595_v13, %v4970_v50  ;;  %v4941_v50 = vor.u32 %v5587_v0, %v4938_v38  ;;  %v8176_v0 = vld [vmem:[#allocation7_spill] sm:$0xff] }
 0x3a6   :  { %v1376_v2 = vpack.c.bf16 %v1347_v8, %v1347_v8  ;;  %v1452_v60 = vpop.permute.xlu2 %1451  ;;  %2410 = vmatpush.bf16.msrb.mxu1 %v4973_v35  ;;  %v5585_v35 = vld [vmem:[#allocation2 + $0x2b4] sm:$0xf] }
 0x3a7   :  { %v6437_v23 = vpop.f32.mrf.mxu1  ;;  %v6441_v53 = vsel %vm247_vm1, %v5879_v62, %v1452_v60  ;;  %v4965_v62 = vor.u32 %v5593_v1, %v4962_v16  ;;  %v5588_v60 = vld [vmem:[#allocation2 + $0x2c4] sm:$0xf0]  ;;  %v4928_v1 = vld [vmem:[#allocation2 + $0x2b0] sm:$0xf]  ;;  %v5586_v16 = vld [vmem:[#allocation2 + $0x2b4] sm:$0xf0] }
 0x3a8   :  { %v1426_v33 = vunpack.c.l.b16 %v1376_v2  ;;  %v6435_v59 = vpop.f32.mrf.mxu0  ;;  %8173 = vst [vmem:[#allocation21_spill] sm:$0xff] %v6441_v53  ;;  %v4937_v13 = vor.u32 %v5588_v60, %v4936_v30  ;;  %v5000_v30 = vld [vmem:[#allocation2 + $0x340] sm:$0xf]  ;;  %v5604_v60 = vld [vmem:[#allocation2 + $0x344] sm:$0xf0] }
 0x3a9   :  { %v5001_v38 = vor.u32 %v5604_v60, %v5000_v30 }
 0x3aa   :  { %v1439_v48 = vpack.c.b16 %v1426_v33, %v1425_v20  ;;  %2411 = vmatpush.bf16.msrb.mxu1 %v4965_v62  ;;  %v4929_v62 = vor.u32 %v5586_v16, %v4928_v1 }
 0x3ab   :  { %v1349_v12 = vpop.f32.mrf.mxu2 }
 0x3ac   :  { %v1350_v6 = vadd.f32 %v1349_v12, %v6302_v17  ;;  %1463 = vrot.lane.b32.xlu2 %v1439_v48, %s5756_s14  ;;  %v5008_v48 = vld [vmem:[#allocation2 + $0x350] sm:$0xf]  ;;  %v5606_v12 = vld [vmem:[#allocation2 + $0x354] sm:$0xf0] }
 0x3ae   :  { %v1377_v24 = vpack.c.bf16 %v1350_v6, %v1350_v6 }
 0x3af   :  { %v6449_v49 = vpop.f32.mrf.mxu1 }
 0x3b0   :  { %v1427_v44 = vunpack.c.l.b16 %v1377_v24  ;;  %4903 = vmatmul.msk.bf16.gmra.mxu3 %vm1662_vm3, %v6422_v26  ;;  %4916 = vmatmul.msk.bf16.gmra.mxu2 %vm1662_vm3, %v6422_v26  ;;  %v6447_v55 = vpop.f32.mrf.mxu0  ;;  %v5009_v24 = vor.u32 %v5606_v12, %v5008_v48 }
 0x3b2   :  { %v1440_v47 = vpack.c.b16 %v1427_v44, %v1427_v44  ;;  %v4954_v44 = vld [vmem:[#allocation2 + $0x2e8] sm:$0xf0]  ;;  %2340 = vmatpush.bf16.msra.mxu3 %v5009_v24  ;;  %v5609_v24 = vld [vmem:[#allocation2 + $0x374] sm:$0xf] }
 0x3b3   :  { %v1351_v17 = vpop.f32.mrf.mxu2  ;;  %1758 = vmatmul.bf16.gmra.mxu0 %v6040_v15  ;;  %1904 = vmatmul.bf16.gmra.mxu1 %v6040_v15  ;;  %v8178_v15 = vld [vmem:[#allocation9_spill] sm:$0xff] }
 0x3b4   :  { %1465 = vrot.lane.b32.xlu0 %v1440_v47, %s5756_s14  ;;  %v4957_v47 = vor.u32 %v5591_v14, %v4954_v44  ;;  %v5590_v17 = vld [vmem:[#allocation2 + $0x2d4] sm:$0xf0]  ;;  %v5026_v44 = vld [vmem:[#allocation2 + $0x378] sm:$0xf0] }
 0x3b6   :  { %2412 = vmatpush.bf16.msrb.mxu1 %v4957_v47  ;;  %2341 = vmatpush.bf16.msra.mxu3 %v5001_v38 }
 0x3b7   :  { %v6455_v8 = vpop.f32.mrf.mxu1 }
 0x3b8   :  { %v6453_v32 = vpop.f32.mrf.mxu0 }
 0x3ba   :  { %2413 = vmatpush.bf16.msrb.mxu1 %v4949_v37 }
 0x3be   :  { %2414 = vmatpush.bf16.msrb.mxu1 %v4941_v50 }
 0x3bf   :  { %v6467_v6 = vpop.f32.mrf.mxu1 }
 0x3c0   :  { %4904 = vmatmul.msk.bf16.gmra.mxu3 %vm1662_vm3, %v6441_v53  ;;  %4917 = vmatmul.msk.bf16.gmra.mxu2 %vm1662_vm3, %v6441_v53  ;;  %v6465_v33 = vpop.f32.mrf.mxu0 }
 0x3c3   :  { %1763 = vmatmul.bf16.gmra.mxu0 %v6054_v54  ;;  %1909 = vmatmul.bf16.gmra.mxu1 %v6054_v54 }
 0x3c7   :  { %v6473_v27 = vpop.f32.mrf.mxu1 }
 0x3c8   :  { %v6471_v43 = vpop.f32.mrf.mxu0 }
 0x3ce   :  { %v1454_v2 = vpop.permute.xlu0 %1453 }
 0x3cf   :  { %v6459_v20 = vsel %vm247_vm1, %v5898_v4, %v1454_v2  ;;  %v4944_v4 = vld [vmem:[#allocation2 + $0x2d0] sm:$0xf]  ;;  %v4930_v2 = vld [vmem:[#allocation2 + $0x2b8] sm:$0xf0] }
 0x3d0   :  { %8174 = vst [vmem:[#allocation22_spill] sm:$0xff] %v6459_v20  ;;  %4905 = vmatmul.msk.bf16.gmra.mxu3 %vm1662_vm3, %v6459_v20  ;;  %4918 = vmatmul.msk.bf16.gmra.mxu2 %vm1662_vm3, %v6459_v20  ;;  %v4945_v22 = vor.u32 %v5590_v17, %v4944_v4  ;;  %v4933_v12 = vor.u32 %v5585_v35, %v4930_v2  ;;  %v6483_v47 = vpop.f32.mrf.mxu0  ;;  %v6485_v17 = vpop.f32.mrf.mxu1 }
 0x3d1   :  { %v5029_v4 = vor.u32 %v5609_v24, %v5026_v44  ;;  %v5018_v24 = vld [vmem:[#allocation2 + $0x368] sm:$0xf0] }
 0x3d2   :  { %2267 = vmatpush.bf16.msra.mxu0 %v4945_v22  ;;  %2415 = vmatpush.bf16.msrb.mxu1 %v4933_v12 }
 0x3d3   :  { %2484 = vmatpush.bf16.msrb.mxu2 %v5029_v4 }
 0x3d6   :  { %2268 = vmatpush.bf16.msra.mxu0 %v4937_v13  ;;  %v1458_v37 = vpop.permute.xlu2 %1457 }
 0x3d7   :  { %v6498_v13 = vsel %vm247_vm1, %v8176_v0, %v1458_v37 }
 0x3d8   :  { %v6487_v56 = vpop.f32.mrf.mxu0  ;;  %v6492_v22 = vpop.f32.mrf.mxu1  ;;  %8177 = vst [vmem:[#allocation7_spill] sm:$0xff] %v6498_v13 }
 0x3da   :  { %2269 = vmatpush.bf16.msra.mxu0 %v4929_v62 }
 0x3de   :  { %v1456_v48 = vpop.permute.xlu1 %1455 }
 0x3df   :  { %v6477_v14 = vsel %vm247_vm1, %v5917_v10, %v1456_v48  ;;  %v4794_v10 = vld [vmem:[%s8098_s2 + $0x5] ss:$8 sm:$0x3] }
 0x3e0   :  { %8175 = vst [vmem:[#allocation23_spill] sm:$0xff] %v6477_v14  ;;  %4906 = vmatmul.msk.bf16.gmra.mxu3 %vm1662_vm3, %v6477_v14  ;;  %4919 = vmatmul.msk.bf16.gmra.mxu2 %vm1662_vm3, %v6477_v14  ;;  %v6494_v3 = vperm.slane %v4794_v10, 1  ;;  %v6506_v1 = vpop.f32.mrf.mxu0  ;;  %v6508_v16 = vpop.f32.mrf.mxu1  ;;  %v6510_v35 = vperm.slane %v4794_v10, 0 }
 0x3e2   :  { %v1851_v50 = vadd.f32 %v6388_v46, %v6494_v3  ;;  %v1705_v12 = vadd.f32 %v6386_v61, %v6510_v35  ;;  %v5607_v46 = vld [vmem:[#allocation2 + $0x364] sm:$0xf]  ;;  %v1853_v4 = vadd.f32 %v6395_v52, %v6494_v3  ;;  %v1707_v10 = vadd.f32 %v6393_v34, %v6510_v35 }
 0x3e3   :  { %v5021_v44 = vor.u32 %v5607_v46, %v5018_v24 }
 0x3e5   :  { %2485 = vmatpush.bf16.msrb.mxu2 %v5021_v44  ;;  %v1856_v44 = vadd.f32 %v6409_v42, %v6494_v3  ;;  %v4992_v42 = vld [vmem:[#allocation2 + $0x330] sm:$0xf] }
 0x3e8   :  { %v6516_v37 = vpop.f32.mrf.mxu0  ;;  %v6518_v30 = vpop.f32.mrf.mxu1 }
 0x3f0   :  { %4907 = vmatmul.msk.bf16.gmra.mxu3 %vm1662_vm3, %v6498_v13  ;;  %4920 = vmatmul.msk.bf16.gmra.mxu2 %vm1662_vm3, %v6498_v13  ;;  %v6534_v34 = vpop.f32.mrf.mxu0 }
 0x3f3   :  { %v1777_v62 = vpop.f32.mrf.mxu3  ;;  %v1923_v2 = vpop.f32.mrf.mxu2 }
 0x3f4   :  { %v1924_v48 = vadd.f32 %v1923_v2, %v1851_v50  ;;  %v1778_v60 = vadd.f32 %v1777_v62, %v1705_v12  ;;  %v6536_v62 = vpop.f32.mrf.mxu1 }
 0x3f6   :  { %v1987_v61 = vmax.f32 %v1778_v60, 0.0  ;;  %v1988_v54 = vmax.f32 %v1924_v48, 0.0 }
 0x3fb   :  { %v1779_v0 = vpop.f32.mrf.mxu3  ;;  %v1925_v38 = vpop.f32.mrf.mxu2 }
 0x3fc   :  { %v1780_v50 = vadd.f32 %v1779_v0, %v1707_v10  ;;  %v1926_v2 = vadd.f32 %v1925_v38, %v1853_v4  ;;  %v6542_v10 = vpop.f32.mrf.mxu0  ;;  %v6544_v60 = vpop.f32.mrf.mxu1  ;;  %v1712_v0 = vadd.f32 %v6414_v40, %v6510_v35 }
 0x3fe   :  { %v1989_v13 = vmax.f32 %v1780_v50, 0.0  ;;  %v1990_v46 = vmax.f32 %v1926_v2, 0.0  ;;  %v1460_v24 = vpop.permute.xlu0 %1459 }
 0x3ff   :  { %v6524_v52 = vsel %vm247_vm1, %v8178_v15, %v1460_v24 }
 0x400   :  { %8179 = vst [vmem:[#allocation9_spill] sm:$0xff] %v6524_v52  ;;  %v2037_v14 = vpack.c.bf16 %v1989_v13, %v1987_v61  ;;  %v6528_v36 = vpack.c.bf16 %v1990_v46, %v1988_v54  ;;  %4908 = vmatmul.msk.bf16.gmra.mxu3 %vm1662_vm3, %v6524_v52  ;;  %4921 = vmatmul.msk.bf16.gmra.mxu2 %vm1662_vm3, %v6524_v52  ;;  %v5602_v13 = vld [vmem:[#allocation2 + $0x334] sm:$0xf0] }
 0x401   :  { %v1710_v54 = vadd.f32 %v6407_v25, %v6510_v35  ;;  %v4993_v4 = vor.u32 %v5602_v13, %v4992_v42  ;;  %v8180_v25 = vld [vmem:[#allocation11_spill] sm:$0xff] }
 0x402   :  { %2270 = vmatmul.bf16.vlgmr.msra.gmra.mxu0 %v2037_v14  ;;  %2416 = vmatmul.bf16.vlgmr.msrb.gmra.mxu1 %v2037_v14 }
 0x403   :  { %v1782_v15 = vpop.f32.mrf.mxu3  ;;  %v1928_v48 = vpop.f32.mrf.mxu2  ;;  %2342 = vmatpush.bf16.msra.mxu3 %v4993_v4 }
 0x404   :  { %v6538_v12 = vadd.f32 %v1928_v48, %v1856_v44  ;;  %v1783_v38 = vadd.f32 %v1782_v15, %v1710_v54  ;;  %v1861_v48 = vadd.f32 %v6430_v28, %v6494_v3  ;;  %v5605_v15 = vld [vmem:[#allocation2 + $0x354] sm:$0xf]  ;;  %v5010_v54 = vld [vmem:[#allocation2 + $0x358] sm:$0xf0]  ;;  %v6560_v42 = vpop.f32.mrf.mxu0  ;;  %v6562_v13 = vpop.f32.mrf.mxu1 }
 0x405   :  { %v5013_v4 = vor.u32 %v5605_v15, %v5010_v54  ;;  %v1717_v15 = vadd.f32 %v6435_v59, %v6510_v35  ;;  %v5601_v54 = vld [vmem:[#allocation2 + $0x334] sm:$0xf] }
 0x406   :  { %v1991_v61 = vmax.f32 %v1783_v38, 0.0  ;;  %v1464_v52 = vpop.permute.xlu2 %1463 }
 0x407   :  { %2486 = vmatpush.bf16.msrb.mxu2 %v5013_v4 }
 0x40b   :  { %v1784_v14 = vpop.f32.mrf.mxu3  ;;  %v6548_v50 = vpop.f32.mrf.mxu2 }
 0x40c   :  { %v1785_v2 = vadd.f32 %v1784_v14, %v1712_v0  ;;  %v1715_v14 = vadd.f32 %v6428_v19, %v6510_v35 }
 0x40e   :  { %v1993_v46 = vmax.f32 %v1785_v2, 0.0  ;;  %v1462_v24 = vpop.permute.xlu1 %1461  ;;  %v5603_v2 = vld [vmem:[#allocation2 + $0x344] sm:$0xf] }
 0x40f   :  { %v6552_v44 = vsel %vm247_vm1, %v8180_v25, %v1462_v24  ;;  %v5002_v24 = vld [vmem:[#allocation2 + $0x348] sm:$0xf0]  ;;  %v6570_v25 = vpop.f32.mrf.mxu1 }
 0x410   :  { %8181 = vst [vmem:[#allocation11_spill] sm:$0xff] %v6552_v44  ;;  %4909 = vmatmul.msk.bf16.gmra.mxu3 %vm1662_vm3, %v6552_v44  ;;  %4922 = vmatmul.msk.bf16.gmra.mxu2 %vm1662_vm3, %v6552_v44  ;;  %v2039_v40 = vpack.c.bf16 %v1993_v46, %v1991_v61  ;;  %v5005_v61 = vor.u32 %v5603_v2, %v5002_v24  ;;  %v6568_v46 = vpop.f32.mrf.mxu0  ;;  %v4994_v44 = vld [vmem:[#allocation2 + $0x338] sm:$0xf0]  ;;  %v8182_v24 = vld [vmem:[#allocation13_spill] sm:$0xff] }
 0x411   :  { %v6578_v9 = vsel %vm247_vm1, %v8182_v24, %v1464_v52 }
 0x412   :  { %2275 = vmatmul.bf16.gmra.mxu0 %v2039_v40  ;;  %2421 = vmatmul.bf16.gmra.mxu1 %v2039_v40  ;;  %8183 = vst [vmem:[#allocation13_spill] sm:$0xff] %v6578_v9 }
 0x413   :  { %v1787_v0 = vpop.f32.mrf.mxu3  ;;  %v1933_v38 = vpop.f32.mrf.mxu2  ;;  %2487 = vmatpush.bf16.msrb.mxu2 %v5005_v61  ;;  %v1866_v61 = vadd.f32 %v6449_v49, %v6494_v3 }
 0x414   :  { %v6564_v28 = vadd.f32 %v1933_v38, %v1861_v48  ;;  %v1788_v40 = vadd.f32 %v1787_v0, %v1715_v14  ;;  %v4997_v38 = vor.u32 %v5601_v54, %v4994_v44  ;;  %v6586_v44 = vld [vmem:[#allocation2 + $0x580] sm:$0xff] }
 0x416   :  { %v1995_v20 = vmax.f32 %v1788_v40, 0.0 }
 0x417   :  { %2488 = vmatpush.bf16.msrb.mxu2 %v4997_v38  ;;  %v6590_v14 = vpop.f32.mrf.mxu1  ;;  %v5113_v38 = vld [vmem:[#allocation2 + $0x520] sm:$0xf] }
 0x418   :  { %v6588_v0 = vpop.f32.mrf.mxu0 }
 0x41b   :  { %v1789_v4 = vpop.f32.mrf.mxu3  ;;  %v6574_v48 = vpop.f32.mrf.mxu2 }
 0x41c   :  { %v1790_v19 = vadd.f32 %v1789_v4, %v1717_v15  ;;  %v2775_v15 = vunpack.c.l.b16 %v6586_v44 }
 0x41e   :  { %v1997_v2 = vmax.f32 %v1790_v19, 0.0  ;;  %v2803_v49 = vpack.c.b16 %v2775_v15, %v2775_v15  ;;  %v5664_v19 = vld [vmem:[#allocation2 + $0x524] sm:$0xf0] }
 0x420   :  { %4910 = vmatmul.msk.bf16.gmra.mxu3 %vm1662_vm3, %v6578_v9  ;;  %4923 = vmatmul.msk.bf16.gmra.mxu2 %vm1662_vm3, %v6578_v9  ;;  %v2041_v59 = vpack.c.bf16 %v1997_v2, %v1995_v20  ;;  %v2832_v4 = vsel %vm287_vm0, %v2803_v49, 0  ;;  %v1720_v20 = vadd.f32 %v6447_v55, %v6510_v35  ;;  %v5114_v2 = vor.u32 %v5664_v19, %v5113_v38  ;;  %v6598_v24 = vpop.f32.mrf.mxu0  ;;  %v6600_v9 = vpop.f32.mrf.mxu1 }
 0x421   :  { %2912 = vmatpush.bf16.msrb.mxu3 %v2832_v4  ;;  %v8184_v4 = vld [vmem:[#allocation15_spill] sm:$0xff]  ;;  %v1871_v38 = vadd.f32 %v6467_v6, %v6494_v3  ;;  %v1725_v6 = vadd.f32 %v6465_v33, %v6510_v35 }
 0x422   :  { %2280 = vmatmul.bf16.gmra.mxu0 %v2041_v59  ;;  %2426 = vmatmul.bf16.gmra.mxu1 %v2041_v59  ;;  %v1722_v59 = vadd.f32 %v6453_v32, %v6510_v35 }
 0x423   :  { %v1792_v52 = vpop.f32.mrf.mxu3  ;;  %v1938_v40 = vpop.f32.mrf.mxu2  ;;  %2837 = vmatpush.bf16.msrb.mxu0 %v5114_v2 }
 0x424   :  { %v6593_v54 = vadd.f32 %v1938_v40, %v1866_v61  ;;  %v1793_v15 = vadd.f32 %v1792_v52, %v1720_v20 }
 0x426   :  { %v1466_v49 = vpop.permute.xlu0 %1465  ;;  %v1999_v41 = vmax.f32 %v1793_v15, 0.0  ;;  %v1727_v15 = vadd.f32 %v6471_v43, %v6510_v35 }
 0x427   :  { %v6608_v26 = vsel %vm247_vm1, %v8184_v4, %v1466_v49 }
 0x428   :  { %8185 = vst [vmem:[#allocation15_spill] sm:$0xff] %v6608_v26  ;;  %v6616_v52 = vpop.f32.mrf.mxu0  ;;  %v6618_v20 = vpop.f32.mrf.mxu1 }
 0x42b   :  { %v1794_v61 = vpop.f32.mrf.mxu3  ;;  %v6604_v40 = vpop.f32.mrf.mxu2 }
 0x42c   :  { %v1795_v53 = vadd.f32 %v1794_v61, %v1722_v59 }
 0x42e   :  { %v2001_v55 = vmax.f32 %v1795_v53, 0.0 }
 0x430   :  { %4911 = vmatmul.msk.bf16.gmra.mxu3 %vm1662_vm3, %v6608_v26  ;;  %4924 = vmatmul.msk.bf16.gmra.mxu2 %vm1662_vm3, %v6608_v26  ;;  %v2043_v32 = vpack.c.bf16 %v2001_v55, %v1999_v41  ;;  %v6624_v59 = vpop.f32.mrf.mxu0  ;;  %v6628_v41 = vpop.f32.mrf.mxu1 }
 0x432   :  { %2285 = vmatmul.bf16.gmra.mxu0 %v2043_v32  ;;  %2431 = vmatmul.bf16.gmra.mxu1 %v2043_v32 }
 0x433   :  { %v1797_v53 = vpop.f32.mrf.mxu3  ;;  %v1943_v19 = vpop.f32.mrf.mxu2 }
 0x434   :  { %v6620_v2 = vadd.f32 %v1943_v19, %v1871_v38  ;;  %v1798_v61 = vadd.f32 %v1797_v53, %v1725_v6  ;;  %v1876_v38 = vadd.f32 %v6485_v17, %v6494_v3  ;;  %v5105_v19 = vld [vmem:[#allocation2 + $0x510] sm:$0xf]  ;;  %v1858_v6 = vadd.f32 %v6416_v7, %v6494_v3 }
 0x435   :  { %v5106_v53 = vor.u32 %v5662_v31, %v5105_v19  ;;  %v1732_v7 = vadd.f32 %v6487_v56, %v6510_v35 }
 0x436   :  { %v2003_v32 = vmax.f32 %v1798_v61, 0.0 }
 0x437   :  { %2838 = vmatpush.bf16.msrb.mxu0 %v5106_v53 }
 0x438   :  { %v6636_v43 = vpop.f32.mrf.mxu0 }
 0x43b   :  { %v1799_v49 = vpop.f32.mrf.mxu3  ;;  %v6630_v55 = vpop.f32.mrf.mxu2 }
 0x43c   :  { %v1800_v4 = vadd.f32 %v1799_v49, %v1727_v15  ;;  %v6640_v15 = vpop.f32.mrf.mxu1 }
 0x43e   :  { %v2005_v26 = vmax.f32 %v1800_v4, 0.0  ;;  %v5153_v4 = vld [vmem:[#allocation2 + $0x570] sm:$0xf] }
 0x440   :  { %2343 = vmatmul.bf16.vlgmr.msra.gmra.mxu3 %v6528_v36  ;;  %2489 = vmatmul.bf16.vlgmr.msrb.gmra.mxu2 %v6528_v36  ;;  %v2045_v33 = vpack.c.bf16 %v2005_v26, %v2003_v32  ;;  %v1730_v36 = vadd.f32 %v6483_v47, %v6510_v35  ;;  %v1931_v26 = vadd.f32 %v6548_v50, %v1858_v6  ;;  %v5674_v32 = vld [vmem:[#allocation2 + $0x574] sm:$0xf0]  ;;  %v6647_v19 = vpop.f32.mrf.mxu0  ;;  %v1992_v47 = vmax.f32 %v6538_v12, 0.0 }
 0x441   :  { %v5154_v31 = vor.u32 %v5674_v32, %v5153_v4  ;;  %v1881_v4 = vadd.f32 %v6508_v16, %v6494_v3 }
 0x442   :  { %2290 = vmatmul.bf16.gmra.mxu0 %v2045_v33  ;;  %2436 = vmatmul.bf16.gmra.mxu1 %v2045_v33  ;;  %v1994_v33 = vmax.f32 %v1931_v26, 0.0 }
 0x443   :  { %v1802_v61 = vpop.f32.mrf.mxu3  ;;  %v1948_v49 = vpop.f32.mrf.mxu2  ;;  %2913 = vmatpush.bf16.msrb.mxu3 %v5154_v31  ;;  %v1735_v31 = vadd.f32 %v6506_v1, %v6510_v35 }
 0x444   :  { %v6642_v17 = vadd.f32 %v1948_v49, %v1876_v38  ;;  %v1803_v58 = vadd.f32 %v1802_v61, %v1730_v36  ;;  %v6651_v11 = vpop.f32.mrf.mxu1  ;;  %v2040_v29 = vpack.c.bf16 %v1994_v33, %v1992_v47  ;;  %v1863_v61 = vadd.f32 %v6437_v23, %v6494_v3 }
 0x445   :  { %v1737_v23 = vadd.f32 %v6516_v37, %v6510_v35 }
 0x446   :  { %v2007_v50 = vmax.f32 %v1803_v58, 0.0  ;;  %v1936_v16 = vadd.f32 %v6574_v48, %v1863_v61  ;;  %v2776_v61 = vunpack.c.h.b16 %v6586_v44 }
 0x448   :  { %v6658_v56 = vpop.f32.mrf.mxu0  ;;  %v1998_v47 = vmax.f32 %v1936_v16, 0.0  ;;  %v2804_v16 = vpack.c.b16 %v2776_v61, %v2776_v61 }
 0x44b   :  { %v1804_v38 = vpop.f32.mrf.mxu3  ;;  %v6653_v53 = vpop.f32.mrf.mxu2 }
 0x44c   :  { %v1805_v49 = vadd.f32 %v1804_v38, %v1732_v7  ;;  %v6662_v36 = vpop.f32.mrf.mxu1  ;;  %v5660_v7 = vld [vmem:[#allocation2 + $0x504] sm:$0xf0] }
 0x44e   :  { %v2009_v6 = vmax.f32 %v1805_v49, 0.0 }
 0x450   :  { %2348 = vmatmul.bf16.gmra.mxu3 %v2040_v29  ;;  %2494 = vmatmul.bf16.gmra.mxu2 %v2040_v29  ;;  %v2047_v32 = vpack.c.bf16 %v2009_v6, %v2007_v50  ;;  %v5097_v29 = vld [vmem:[#allocation2 + $0x500] sm:$0xf]  ;;  %v1766_v38 = vpop.f32.mrf.mxu0 }
 0x451   :  { %v5098_v33 = vor.u32 %v5660_v7, %v5097_v29  ;;  %v1886_v29 = vadd.f32 %v6536_v62, %v6494_v3  ;;  %v5115_v7 = vld [vmem:[#allocation2 + $0x528] sm:$0xf0] }
 0x452   :  { %2295 = vmatmul.bf16.gmra.mxu0 %v2047_v32  ;;  %2441 = vmatmul.bf16.gmra.mxu1 %v2047_v32 }
 0x453   :  { %v1807_v12 = vpop.f32.mrf.mxu3  ;;  %v1953_v26 = vpop.f32.mrf.mxu2  ;;  %2839 = vmatpush.bf16.msrb.mxu0 %v5098_v33 }
 0x454   :  { %v6664_v58 = vadd.f32 %v1953_v26, %v1881_v4  ;;  %v1808_v49 = vadd.f32 %v1807_v12, %v1735_v31  ;;  %v1912_v50 = vpop.f32.mrf.mxu1  ;;  %v1996_v4 = vmax.f32 %v6564_v28, 0.0  ;;  %v1868_v12 = vadd.f32 %v6455_v8, %v6494_v3  ;;  %v5663_v31 = vld [vmem:[#allocation2 + $0x524] sm:$0xf]  ;;  %v5672_v8 = vld [vmem:[#allocation2 + $0x564] sm:$0xf0] }
 0x455   :  { %v2835_v28 = vsel %vm287_vm0, %v2804_v16, 0  ;;  %v5118_v44 = vor.u32 %v5663_v31, %v5115_v7  ;;  %v1742_v50 = vadd.f32 %v6542_v10, %v6510_v35  ;;  %v1873_v10 = vadd.f32 %v6473_v27, %v6494_v3 }
 0x456   :  { %v2011_v1 = vmax.f32 %v1808_v49, 0.0  ;;  %v2042_v48 = vpack.c.bf16 %v1998_v47, %v1996_v4  ;;  %3058 = vmatpush.bf16.msra.mxu2 %v2835_v28  ;;  %v1941_v62 = vadd.f32 %v6604_v40, %v1868_v12  ;;  %v5145_v47 = vld [vmem:[#allocation2 + $0x560] sm:$0xf]  ;;  %v1891_v40 = vadd.f32 %v6562_v13, %v6494_v3 }
 0x457   :  { %2983 = vmatpush.bf16.msra.mxu1 %v5118_v44  ;;  %v5146_v49 = vor.u32 %v5672_v8, %v5145_v47  ;;  %v1946_v7 = vadd.f32 %v6630_v55, %v1873_v10  ;;  %v1747_v44 = vadd.f32 %v6568_v46, %v6510_v35  ;;  %v2004_v8 = vmax.f32 %v6620_v2, 0.0  ;;  %v5107_v55 = vld [vmem:[#allocation2 + $0x518] sm:$0xf0] }
 0x458   :  { %v1896_v46 = vadd.f32 %v6590_v14, %v6494_v3  ;;  %v1750_v14 = vadd.f32 %v6588_v0, %v6510_v35  ;;  %v2008_v0 = vmax.f32 %v6642_v17, 0.0  ;;  %v1883_v17 = vadd.f32 %v6518_v30, %v6494_v3 }
 0x459   :  { %2914 = vmatpush.bf16.msrb.mxu3 %v5146_v49  ;;  %v1757_v30 = vadd.f32 %v6624_v59, %v6510_v35  ;;  %v1906_v59 = vadd.f32 %v6640_v15, %v6494_v3  ;;  %v1760_v15 = vadd.f32 %v6636_v43, %v6510_v35  ;;  %v1762_v43 = vadd.f32 %v6647_v19, %v6510_v35 }
 0x45b   :  { %v1809_v6 = vpop.f32.mrf.mxu3  ;;  %v6671_v32 = vpop.f32.mrf.mxu2 }
 0x45c   :  { %v1810_v26 = vadd.f32 %v1809_v6, %v1737_v23  ;;  %v2002_v6 = vmax.f32 %v1941_v62, 0.0 }
 0x45e   :  { %v2013_v5 = vmax.f32 %v1810_v26, 0.0 }
 0x460   :  { %2353 = vmatmul.bf16.gmra.mxu3 %v2042_v48  ;;  %2499 = vmatmul.bf16.gmra.mxu2 %v2042_v48  ;;  %v2049_v37 = vpack.c.bf16 %v2013_v5, %v2011_v1  ;;  %v1740_v5 = vadd.f32 %v6534_v34, %v6510_v35  ;;  %v2000_v48 = vmax.f32 %v6593_v54, 0.0  ;;  %v1745_v54 = vadd.f32 %v6560_v42, %v6510_v35 }
 0x462   :  { %2300 = vmatmul.bf16.gmra.mxu0 %v2049_v37  ;;  %2446 = vmatmul.bf16.gmra.mxu1 %v2049_v37  ;;  %v2044_v34 = vpack.c.bf16 %v2002_v6, %v2000_v48 }
 0x463   :  { %v1812_v33 = vpop.f32.mrf.mxu3  ;;  %v1958_v38 = vpop.f32.mrf.mxu2 }
 0x464   :  { %v6680_v23 = vadd.f32 %v1958_v38, %v1886_v29  ;;  %v1813_v4 = vadd.f32 %v1812_v33, %v1740_v5  ;;  %v5089_v33 = vld [vmem:[#allocation2 + $0x4f0] sm:$0xf]  ;;  %v5658_v38 = vld [vmem:[#allocation2 + $0x4f4] sm:$0xf0]  ;;  %v2006_v5 = vmax.f32 %v1946_v7, 0.0 }
 0x465   :  { %v5090_v13 = vor.u32 %v5658_v38, %v5089_v33  ;;  %v5137_v33 = vld [vmem:[#allocation2 + $0x550] sm:$0xf]  ;;  %v5670_v38 = vld [vmem:[#allocation2 + $0x554] sm:$0xf0] }
 0x466   :  { %v2015_v29 = vmax.f32 %v1813_v4, 0.0  ;;  %v2046_v42 = vpack.c.bf16 %v2006_v5, %v2004_v8  ;;  %v5661_v4 = vld [vmem:[#allocation2 + $0x514] sm:$0xf] }
 0x467   :  { %2840 = vmatpush.bf16.msrb.mxu0 %v5090_v13  ;;  %v5138_v13 = vor.u32 %v5670_v38, %v5137_v33 }
 0x469   :  { %2915 = vmatpush.bf16.msrb.mxu3 %v5138_v13 }
 0x46b   :  { %v1814_v26 = vpop.f32.mrf.mxu3  ;;  %v6687_v1 = vpop.f32.mrf.mxu2 }
 0x46c   :  { %v1815_v61 = vadd.f32 %v1814_v26, %v1742_v50 }
 0x46e   :  { %v2017_v37 = vmax.f32 %v1815_v61, 0.0  ;;  %v5110_v61 = vor.u32 %v5661_v4, %v5107_v55 }
 0x470   :  { %2358 = vmatmul.bf16.gmra.mxu3 %v2044_v34  ;;  %2504 = vmatmul.bf16.gmra.mxu2 %v2044_v34  ;;  %v2051_v16 = vpack.c.bf16 %v2017_v37, %v2015_v29  ;;  %v5673_v37 = vld [vmem:[#allocation2 + $0x574] sm:$0xf]  ;;  %v5155_v34 = vld [vmem:[#allocation2 + $0x578] sm:$0xf0] }
 0x471   :  { %2984 = vmatpush.bf16.msra.mxu1 %v5110_v61  ;;  %v5158_v2 = vor.u32 %v5673_v37, %v5155_v34 }
 0x472   :  { %2305 = vmatmul.bf16.gmra.mxu0 %v2051_v16  ;;  %2451 = vmatmul.bf16.gmra.mxu1 %v2051_v16 }
 0x473   :  { %v1817_v12 = vpop.f32.mrf.mxu3  ;;  %v1963_v28 = vpop.f32.mrf.mxu2  ;;  %3059 = vmatpush.bf16.msra.mxu2 %v5158_v2  ;;  %v1755_v2 = vadd.f32 %v6616_v52, %v6510_v35  ;;  %v2012_v52 = vmax.f32 %v6664_v58, 0.0  ;;  %v5083_v58 = vld [vmem:[#allocation2 + $0x4e8] sm:$0xf0] }
 0x474   :  { %v6694_v31 = vadd.f32 %v1963_v28, %v1891_v40  ;;  %v1818_v27 = vadd.f32 %v1817_v12, %v1745_v54  ;;  %v1878_v40 = vadd.f32 %v6492_v22, %v6494_v3  ;;  %v1752_v22 = vadd.f32 %v6598_v24, %v6510_v35 }
 0x475   :  { %v1901_v24 = vadd.f32 %v6618_v20, %v6494_v3 }
 0x476   :  { %v2019_v50 = vmax.f32 %v1818_v27, 0.0  ;;  %v1951_v28 = vadd.f32 %v6653_v53, %v1878_v40  ;;  %v1956_v40 = vadd.f32 %v6671_v32, %v1883_v17  ;;  %v5657_v32 = vld [vmem:[#allocation2 + $0x4f4] sm:$0xf] }
 0x478   :  { %v2014_v33 = vmax.f32 %v1956_v40, 0.0  ;;  %v5653_v40 = vld [vmem:[#allocation2 + $0x4d4] sm:$0xf] }
 0x47b   :  { %v1819_v62 = vpop.f32.mrf.mxu3  ;;  %v6701_v47 = vpop.f32.mrf.mxu2 }
 0x47c   :  { %v1820_v49 = vadd.f32 %v1819_v62, %v1747_v44  ;;  %v2010_v44 = vmax.f32 %v1951_v28, 0.0 }
 0x47e   :  { %v2021_v6 = vmax.f32 %v1820_v49, 0.0 }
 0x47f   :  { %v6704_v26 = vpop.f32.mrf.mxu0  ;;  %v6706_v48 = vpop.f32.mrf.mxu1 }
 0x480   :  { %2363 = vmatmul.bf16.gmra.mxu3 %v2046_v42  ;;  %2509 = vmatmul.bf16.gmra.mxu2 %v2046_v42  ;;  %v2053_v29 = vpack.c.bf16 %v2021_v6, %v2019_v50  ;;  %v2048_v50 = vpack.c.bf16 %v2010_v44, %v2008_v0  ;;  %v5081_v6 = vld [vmem:[#allocation2 + $0x4e0] sm:$0xf]  ;;  %v5656_v42 = vld [vmem:[#allocation2 + $0x4e4] sm:$0xf0] }
 0x481   :  { %v5082_v61 = vor.u32 %v5656_v42, %v5081_v6  ;;  %v5655_v42 = vld [vmem:[#allocation2 + $0x4e4] sm:$0xf] }
 0x482   :  { %2310 = vmatmul.bf16.gmra.mxu0 %v2053_v29  ;;  %2456 = vmatmul.bf16.gmra.mxu1 %v2053_v29 }
 0x483   :  { %v1822_v16 = vpop.f32.mrf.mxu3  ;;  %v1968_v10 = vpop.f32.mrf.mxu2  ;;  %2841 = vmatpush.bf16.msrb.mxu0 %v5082_v61  ;;  %v1888_v61 = vadd.f32 %v6544_v60, %v6494_v3 }
 0x484   :  { %v6712_v12 = vadd.f32 %v1968_v10, %v1896_v46  ;;  %v1823_v5 = vadd.f32 %v1822_v16, %v1750_v14  ;;  %v5659_v10 = vld [vmem:[#allocation2 + $0x504] sm:$0xf]  ;;  %v5099_v14 = vld [vmem:[#allocation2 + $0x508] sm:$0xf0] }
 0x485   :  { %v5102_v28 = vor.u32 %v5659_v10, %v5099_v14  ;;  %v1961_v10 = vadd.f32 %v6687_v1, %v1888_v61  ;;  %v5671_v14 = vld [vmem:[#allocation2 + $0x564] sm:$0xf]  ;;  %v5057_v61 = vld [vmem:[#allocation2 + $0x4b0] sm:$0xf] }
 0x486   :  { %v2023_v53 = vmax.f32 %v1823_v5, 0.0  ;;  %v5091_v5 = vld [vmem:[#allocation2 + $0x4f8] sm:$0xf0] }
 0x487   :  { %v6717_v54 = vpop.f32.mrf.mxu0  ;;  %v6719_v7 = vpop.f32.mrf.mxu1  ;;  %2985 = vmatpush.bf16.msra.mxu1 %v5102_v28  ;;  %v5147_v28 = vld [vmem:[#allocation2 + $0x568] sm:$0xf0] }
 0x48b   :  { %v1824_v27 = vpop.f32.mrf.mxu3  ;;  %v6723_v62 = vpop.f32.mrf.mxu2 }
 0x48c   :  { %v1825_v8 = vadd.f32 %v1824_v27, %v1752_v22  ;;  %v5094_v27 = vor.u32 %v5657_v32, %v5091_v5  ;;  %v5652_v32 = vld [vmem:[#allocation2 + $0x4c4] sm:$0xf0]  ;;  %v5651_v5 = vld [vmem:[#allocation2 + $0x4c4] sm:$0xf] }
 0x48e   :  { %v2025_v49 = vmax.f32 %v1825_v8, 0.0  ;;  %2986 = vmatpush.bf16.msra.mxu1 %v5094_v27  ;;  %v2018_v27 = vmax.f32 %v1961_v10, 0.0 }
 0x48f   :  { %v6726_v4 = vpop.f32.mrf.mxu0  ;;  %v6728_v55 = vpop.f32.mrf.mxu1 }
 0x490   :  { %2368 = vmatmul.bf16.gmra.mxu3 %v2048_v50  ;;  %2514 = vmatmul.bf16.gmra.mxu2 %v2048_v50  ;;  %v2055_v46 = vpack.c.bf16 %v2025_v49, %v2023_v53  ;;  %v2050_v53 = vpack.c.bf16 %v2014_v33, %v2012_v52 }
 0x492   :  { %2315 = vmatmul.bf16.gmra.mxu0 %v2055_v46  ;;  %2461 = vmatmul.bf16.gmra.mxu1 %v2055_v46 }
 0x493   :  { %v1827_v29 = vpop.f32.mrf.mxu3  ;;  %v1973_v37 = vpop.f32.mrf.mxu2 }
 0x494   :  { %v6734_v34 = vadd.f32 %v1973_v37, %v1901_v24  ;;  %v1828_v38 = vadd.f32 %v1827_v29, %v1755_v2  ;;  %v5086_v24 = vor.u32 %v5655_v42, %v5083_v58  ;;  %v5073_v37 = vld [vmem:[#allocation2 + $0x4d0] sm:$0xf]  ;;  %v5654_v2 = vld [vmem:[#allocation2 + $0x4d4] sm:$0xf0]  ;;  %v2016_v42 = vmax.f32 %v6680_v23, 0.0 }
 0x496   :  { %v2027_v0 = vmax.f32 %v1828_v38, 0.0  ;;  %2987 = vmatpush.bf16.msra.mxu1 %v5086_v24  ;;  %v5150_v38 = vor.u32 %v5671_v14, %v5147_v28  ;;  %v5650_v24 = vld [vmem:[#allocation2 + $0x4b4] sm:$0xf0]  ;;  %v1911_v28 = vadd.f32 %v6662_v36, %v6494_v3 }
 0x497   :  { %v6739_v16 = vpop.f32.mrf.mxu0  ;;  %v6741_v20 = vpop.f32.mrf.mxu1  ;;  %v5058_v19 = vor.u32 %v5650_v24, %v5057_v61 }
 0x498   :  { %3060 = vmatpush.bf16.msra.mxu2 %v5150_v38  ;;  %v5668_v38 = vld [vmem:[#allocation2 + $0x544] sm:$0xf0] }
 0x49b   :  { %v1829_v13 = vpop.f32.mrf.mxu3  ;;  %v6745_v22 = vpop.f32.mrf.mxu2 }
 0x49c   :  { %v1830_v44 = vadd.f32 %v1829_v13, %v1757_v30  ;;  %v5074_v30 = vor.u32 %v5654_v2, %v5073_v37  ;;  %v5075_v13 = vld [vmem:[#allocation2 + $0x4d8] sm:$0xf0] }
 0x49d   :  { %v5078_v52 = vor.u32 %v5653_v40, %v5075_v13  ;;  %v2052_v40 = vpack.c.bf16 %v2018_v27, %v2016_v42  ;;  %v2020_v42 = vmax.f32 %v6694_v31, 0.0 }
 0x49e   :  { %v2029_v8 = vmax.f32 %v1830_v44, 0.0  ;;  %2842 = vmatpush.bf16.msrb.mxu0 %v5074_v30  ;;  %v5065_v44 = vld [vmem:[#allocation2 + $0x4c0] sm:$0xf] }
 0x49f   :  { %v6748_v49 = vpop.f32.mrf.mxu0  ;;  %v6750_v50 = vpop.f32.mrf.mxu1  ;;  %2988 = vmatpush.bf16.msra.mxu1 %v5078_v52  ;;  %v5129_v30 = vld [vmem:[#allocation2 + $0x540] sm:$0xf]  ;;  %v1893_v52 = vadd.f32 %v6570_v25, %v6494_v3  ;;  %v4925_v25 = vld [vmem:[%s8098_s2 + $0x6] ss:$8 sm:$0x3] }
 0x4a0   :  { %2373 = vmatmul.bf16.gmra.mxu3 %v2050_v53  ;;  %2519 = vmatmul.bf16.gmra.mxu2 %v2050_v53  ;;  %v2057_v6 = vpack.c.bf16 %v2029_v8, %v2027_v0  ;;  %v5066_v0 = vor.u32 %v5652_v32, %v5065_v44  ;;  %v5067_v8 = vld [vmem:[#allocation2 + $0x4c8] sm:$0xf0]  ;;  %v5130_v13 = vor.u32 %v5668_v38, %v5129_v30  ;;  %v5139_v30 = vld [vmem:[#allocation2 + $0x558] sm:$0xf0] }
 0x4a2   :  { %2320 = vmatmul.bf16.gmra.mxu0 %v2057_v6  ;;  %2466 = vmatmul.bf16.gmra.mxu1 %v2057_v6  ;;  %v5070_v6 = vor.u32 %v5651_v5, %v5067_v8  ;;  %v1765_v5 = vadd.f32 %v6658_v56, %v6510_v35  ;;  %v6791_v35 = vperm.slane %v4925_v25, 0  ;;  %v6793_v56 = vperm.slane %v4925_v25, 1 }
 0x4a3   :  { %v1832_v46 = vpop.f32.mrf.mxu3  ;;  %v1978_v17 = vpop.f32.mrf.mxu2  ;;  %2843 = vmatpush.bf16.msrb.mxu0 %v5066_v0  ;;  %2916 = vmatpush.bf16.msrb.mxu3 %v5130_v13 }
 0x4a4   :  { %v6756_v29 = vadd.f32 %v1978_v17, %v1906_v59  ;;  %v1833_v1 = vadd.f32 %v1832_v46, %v1760_v15  ;;  %v5649_v17 = vld [vmem:[#allocation2 + $0x4b4] sm:$0xf]  ;;  %2989 = vmatpush.bf16.msra.mxu1 %v5070_v6  ;;  %v5059_v46 = vld [vmem:[#allocation2 + $0x4b8] sm:$0xf0]  ;;  %v2418_v31 = vadd.f32 %v6706_v48, %v6793_v56  ;;  %v2420_v48 = vadd.f32 %v6719_v7, %v6793_v56 }
 0x4a5   :  { %v5062_v14 = vor.u32 %v5649_v17, %v5059_v46 }
 0x4a6   :  { %v2031_v37 = vmax.f32 %v1833_v1, 0.0 }
 0x4a7   :  { %v6761_v60 = vpop.f32.mrf.mxu0  ;;  %v6763_v33 = vpop.f32.mrf.mxu1  ;;  %2844 = vmatpush.bf16.msrb.mxu0 %v5058_v19 }
 0x4a8   :  { %2990 = vmatpush.bf16.msra.mxu1 %v5062_v14 }
 0x4ab   :  { %v1834_v53 = vpop.f32.mrf.mxu3  ;;  %v6767_v59 = vpop.f32.mrf.mxu2 }
 0x4ac   :  { %v1835_v58 = vadd.f32 %v1834_v53, %v1762_v43  ;;  %v1966_v43 = vadd.f32 %v6701_v47, %v1893_v52 }
 0x4ae   :  { %v2033_v2 = vmax.f32 %v1835_v58, 0.0  ;;  %v2022_v8 = vmax.f32 %v1966_v43, 0.0 }
 0x4af   :  { %v6770_v15 = vpop.f32.mrf.mxu0  ;;  %v6772_v10 = vpop.f32.mrf.mxu1 }
 0x4b0   :  { %2378 = vmatmul.bf16.gmra.mxu3 %v2052_v40  ;;  %2524 = vmatmul.bf16.gmra.mxu2 %v2052_v40  ;;  %v2059_v23 = vpack.c.bf16 %v2033_v2, %v2031_v37  ;;  %v2054_v47 = vpack.c.bf16 %v2022_v8, %v2020_v42  ;;  %v1898_v37 = vadd.f32 %v6600_v9, %v6494_v3  ;;  %v5121_v42 = vld [vmem:[#allocation2 + $0x530] sm:$0xf] }
 0x4b1   :  { %v2272_v2 = vadd.f32 %v6704_v26, %v6791_v35  ;;  %v2274_v26 = vadd.f32 %v6717_v54, %v6791_v35 }
 0x4b2   :  { %2325 = vmatmul.bf16.gmra.mxu0 %v2059_v23  ;;  %2471 = vmatmul.bf16.gmra.mxu1 %v2059_v23  ;;  %v5669_v23 = vld [vmem:[#allocation2 + $0x554] sm:$0xf] }
 0x4b3   :  { %v1837_v44 = vpop.f32.mrf.mxu3  ;;  %v1983_v32 = vpop.f32.mrf.mxu2  ;;  %v5142_v9 = vor.u32 %v5669_v23, %v5139_v30 }
 0x4b4   :  { %v6780_v36 = vadd.f32 %v1983_v32, %v1911_v28  ;;  %v1838_v0 = vadd.f32 %v1837_v44, %v1765_v5  ;;  %v1971_v28 = vadd.f32 %v6723_v62, %v1898_v37  ;;  %v2024_v5 = vmax.f32 %v6712_v12, 0.0 }
 0x4b5   :  { %3061 = vmatpush.bf16.msra.mxu2 %v5142_v9  ;;  %v1903_v12 = vadd.f32 %v6628_v41, %v6494_v3  ;;  %v2028_v9 = vmax.f32 %v6734_v34, 0.0  ;;  %v1908_v34 = vadd.f32 %v6651_v11, %v6494_v3  ;;  %v5667_v3 = vld [vmem:[#allocation2 + $0x544] sm:$0xf] }
 0x4b6   :  { %v2035_v58 = vmax.f32 %v1838_v0, 0.0  ;;  %v2026_v52 = vmax.f32 %v1971_v28, 0.0 }
 0x4b7   :  { %v6783_v27 = vpop.f32.mrf.mxu0  ;;  %v6785_v1 = vpop.f32.mrf.mxu1  ;;  %v1976_v28 = vadd.f32 %v6745_v22, %v1903_v12 }
 0x4b8   :  { %v2061_v17 = vpack.c.bf16 %v2035_v58, %v2035_v58  ;;  %v5666_v58 = vld [vmem:[#allocation2 + $0x534] sm:$0xf0] }
 0x4b9   :  { %v2030_v30 = vmax.f32 %v1976_v28, 0.0 }
 0x4bb   :  { %v1839_v53 = vpop.f32.mrf.mxu3  ;;  %v1985_v6 = vpop.f32.mrf.mxu2 }
 0x4bc   :  { %v2056_v6 = vpack.c.bf16 %v2026_v52, %v2024_v5 }
 0x4bf   :  { %v6795_v61 = vpop.f32.mrf.mxu0  ;;  %v6797_v24 = vpop.f32.mrf.mxu1 }
 0x4c0   :  { %2383 = vmatmul.bf16.gmra.mxu3 %v2054_v47  ;;  %2529 = vmatmul.bf16.gmra.mxu2 %v2054_v47 }
 0x4c2   :  { %2330 = vmatmul.bf16.gmra.mxu0 %v2061_v17  ;;  %2476 = vmatmul.bf16.gmra.mxu1 %v2061_v17  ;;  %v5122_v17 = vor.u32 %v5666_v58, %v5121_v42 }
 0x4c3   :  { %v2344_v40 = vpop.f32.mrf.mxu3  ;;  %v2490_v19 = vpop.f32.mrf.mxu2 }
 0x4c4   :  { %v2345_v46 = vadd.f32 %v2344_v40, %v2272_v2  ;;  %v2491_v14 = vadd.f32 %v2490_v19, %v2418_v31  ;;  %2917 = vmatpush.bf16.msrb.mxu3 %v5122_v17  ;;  %v2277_v2 = vadd.f32 %v6726_v4, %v6791_v35  ;;  %v2423_v31 = vadd.f32 %v6728_v55, %v6793_v56 }
 0x4c5   :  { %v2279_v4 = vadd.f32 %v6739_v16, %v6791_v35  ;;  %v2425_v55 = vadd.f32 %v6741_v20, %v6793_v56  ;;  %v2282_v20 = vadd.f32 %v6748_v49, %v6791_v35  ;;  %v1981_v17 = vadd.f32 %v6767_v59, %v1908_v34  ;;  %v5665_v59 = vld [vmem:[#allocation2 + $0x534] sm:$0xf] }
 0x4c6   :  { %v2554_v0 = vmax.f32 %v2345_v46, 0.0  ;;  %v2555_v8 = vmax.f32 %v2491_v14, 0.0 }
 0x4c7   :  { %v6806_v38 = vpop.f32.mrf.mxu0  ;;  %v6808_v13 = vpop.f32.mrf.mxu1 }
 0x4cb   :  { %v2346_v44 = vpop.f32.mrf.mxu3  ;;  %v2492_v32 = vpop.f32.mrf.mxu2 }
 0x4cc   :  { %v2347_v62 = vadd.f32 %v2346_v44, %v2274_v26  ;;  %v2493_v43 = vadd.f32 %v2492_v32, %v2420_v48  ;;  %v2058_v44 = vpack.c.bf16 %v2030_v30, %v2028_v9 }
 0x4ce   :  { %v2556_v25 = vmax.f32 %v2347_v62, 0.0  ;;  %v2557_v53 = vmax.f32 %v2493_v43, 0.0 }
 0x4cf   :  { %v6815_v47 = vpop.f32.mrf.mxu0  ;;  %v6817_v54 = vpop.f32.mrf.mxu1 }
 0x4d0   :  { %v6819_v7 = vpack.c.bf16 %v2556_v25, %v2554_v0  ;;  %v6821_v37 = vpack.c.bf16 %v2557_v53, %v2555_v8  ;;  %2388 = vmatmul.bf16.gmra.mxu3 %v2056_v6  ;;  %2534 = vmatmul.bf16.gmra.mxu2 %v2056_v6  ;;  %v2428_v25 = vadd.f32 %v6750_v50, %v6793_v56 }
 0x4d1   :  { %v2284_v50 = vadd.f32 %v6761_v60, %v6791_v35 }
 0x4d2   :  { %2845 = vmatmul.bf16.vlgmr.msrb.gmra.mxu0 %v5805_v39  ;;  %2991 = vmatmul.bf16.vlgmr.msra.gmra.mxu1 %v5805_v39 }
 0x4d3   :  { %v2349_v40 = vpop.f32.mrf.mxu3  ;;  %v2495_v19 = vpop.f32.mrf.mxu2 }
 0x4d4   :  { %v2350_v46 = vadd.f32 %v2349_v40, %v2277_v2  ;;  %v2496_v14 = vadd.f32 %v2495_v19, %v2423_v31  ;;  %v5131_v2 = vld [vmem:[#allocation2 + $0x548] sm:$0xf0]  ;;  %v2034_v31 = vmax.f32 %v1981_v17, 0.0  ;;  %v2032_v40 = vmax.f32 %v6756_v29, 0.0 }
 0x4d5   :  { %v5134_v49 = vor.u32 %v5667_v3, %v5131_v2  ;;  %v2036_v3 = vmax.f32 %v6780_v36, 0.0 }
 0x4d6   :  { %v2558_v32 = vmax.f32 %v2350_v46, 0.0  ;;  %v2559_v22 = vmax.f32 %v2496_v14, 0.0  ;;  %v5123_v14 = vld [vmem:[#allocation2 + $0x538] sm:$0xf0] }
 0x4d7   :  { %v6832_v23 = vpop.f32.mrf.mxu0  ;;  %v6834_v41 = vpop.f32.mrf.mxu1  ;;  %3062 = vmatpush.bf16.msra.mxu2 %v5134_v49 }
 0x4db   :  { %v2351_v39 = vpop.f32.mrf.mxu3  ;;  %v2497_v26 = vpop.f32.mrf.mxu2 }
 0x4dc   :  { %v2352_v48 = vadd.f32 %v2351_v39, %v2279_v4  ;;  %v2498_v52 = vadd.f32 %v2497_v26, %v2425_v55  ;;  %v5126_v4 = vor.u32 %v5665_v59, %v5123_v14  ;;  %v2060_v55 = vpack.c.bf16 %v2034_v31, %v2032_v40 }
 0x4de   :  { %v2560_v5 = vmax.f32 %v2352_v48, 0.0  ;;  %v2561_v62 = vmax.f32 %v2498_v52, 0.0  ;;  %3063 = vmatpush.bf16.msra.mxu2 %v5126_v4 }
 0x4df   :  { %v6841_v43 = vpop.f32.mrf.mxu0  ;;  %v6843_v0 = vpop.f32.mrf.mxu1 }
 0x4e0   :  { %2393 = vmatmul.bf16.gmra.mxu3 %v2058_v44  ;;  %v6845_v16 = vpack.c.bf16 %v2560_v5, %v2558_v32  ;;  %v6847_v8 = vpack.c.bf16 %v2561_v62, %v2559_v22  ;;  %2539 = vmatmul.bf16.gmra.mxu2 %v2058_v44  ;;  %v5307_v44 = vld [vmem:[#allocation2 + $0x4a0] sm:$0xf]  ;;  %v5648_v32 = vld [vmem:[#allocation2 + $0x4a4] sm:$0xf0]  ;;  %v2287_v22 = vadd.f32 %v6770_v15, %v6791_v35 }
 0x4e1   :  { %v2433_v5 = vadd.f32 %v6772_v10, %v6793_v56  ;;  %v5308_v62 = vor.u32 %v5648_v32, %v5307_v44  ;;  %v2289_v10 = vadd.f32 %v6783_v27, %v6791_v35  ;;  %v5299_v44 = vld [vmem:[#allocation2 + $0x490] sm:$0xf]  ;;  %v5646_v32 = vld [vmem:[#allocation2 + $0x494] sm:$0xf0] }
 0x4e2   :  { %2850 = vmatmul.bf16.gmra.mxu0 %v5824_v45  ;;  %2996 = vmatmul.bf16.gmra.mxu1 %v5824_v45  ;;  %v2430_v45 = vadd.f32 %v6763_v33, %v6793_v56 }
 0x4e3   :  { %v2354_v53 = vpop.f32.mrf.mxu3  ;;  %v2500_v6 = vpop.f32.mrf.mxu2  ;;  %3362 = vmatpush.bf16.msra.mxu3 %v5308_v62 }
 0x4e4   :  { %v2355_v42 = vadd.f32 %v2354_v53, %v2282_v20  ;;  %v2501_v58 = vadd.f32 %v2500_v6, %v2428_v25  ;;  %v5243_v6 = vld [vmem:[#allocation2 + $0x420] sm:$0xf] }
 0x4e6   :  { %v2562_v9 = vmax.f32 %v2355_v42, 0.0  ;;  %v2563_v39 = vmax.f32 %v2501_v58, 0.0  ;;  %v5632_v42 = vld [vmem:[#allocation2 + $0x424] sm:$0xf0] }
 0x4e7   :  { %v6858_v12 = vpop.f32.mrf.mxu0  ;;  %v6860_v11 = vpop.f32.mrf.mxu1  ;;  %v5244_v15 = vor.u32 %v5632_v42, %v5243_v6 }
 0x4e9   :  { %3289 = vmatpush.bf16.msra.mxu0 %v5244_v15 }
 0x4eb   :  { %v2356_v19 = vpop.f32.mrf.mxu3  ;;  %v2502_v46 = vpop.f32.mrf.mxu2 }
 0x4ec   :  { %v2357_v28 = vadd.f32 %v2356_v19, %v2284_v50  ;;  %v2503_v30 = vadd.f32 %v2502_v46, %v2430_v45  ;;  %v2062_v45 = vpack.c.bf16 %v2036_v3, %v2036_v3 }
 0x4ee   :  { %v2564_v26 = vmax.f32 %v2357_v28, 0.0  ;;  %v2565_v48 = vmax.f32 %v2503_v30, 0.0  ;;  %v2438_v30 = vadd.f32 %v6797_v24, %v6793_v56  ;;  %v2440_v24 = vadd.f32 %v6808_v13, %v6793_v56  ;;  %v5235_v13 = vld [vmem:[#allocation2 + $0x410] sm:$0xf] }
 0x4ef   :  { %v6867_v60 = vpop.f32.mrf.mxu0  ;;  %v6869_v52 = vpop.f32.mrf.mxu1 }
 0x4f0   :  { %2398 = vmatmul.bf16.gmra.mxu3 %v2060_v55  ;;  %v6871_v33 = vpack.c.bf16 %v2564_v26, %v2562_v9  ;;  %v6873_v29 = vpack.c.bf16 %v2565_v48, %v2563_v39  ;;  %2544 = vmatmul.bf16.gmra.mxu2 %v2060_v55 }
 0x4f2   :  { %2855 = vmatmul.bf16.gmra.mxu0 %v5843_v51  ;;  %3001 = vmatmul.bf16.gmra.mxu1 %v5843_v51  ;;  %v2435_v51 = vadd.f32 %v6785_v1, %v6793_v56  ;;  %v2292_v1 = vadd.f32 %v6795_v61, %v6791_v35  ;;  %v2294_v61 = vadd.f32 %v6806_v38, %v6791_v35 }
 0x4f3   :  { %v2359_v34 = vpop.f32.mrf.mxu3  ;;  %v2505_v20 = vpop.f32.mrf.mxu2 }
 0x4f4   :  { %v2360_v25 = vadd.f32 %v2359_v34, %v2287_v22  ;;  %v2506_v53 = vadd.f32 %v2505_v20, %v2433_v5  ;;  %v5300_v22 = vor.u32 %v5646_v32, %v5299_v44 }
 0x4f6   :  { %v2566_v40 = vmax.f32 %v2360_v25, 0.0  ;;  %v2567_v19 = vmax.f32 %v2506_v53, 0.0  ;;  %3363 = vmatpush.bf16.msra.mxu3 %v5300_v22  ;;  %v2448_v22 = vadd.f32 %v6843_v0, %v6793_v56  ;;  %v2304_v0 = vadd.f32 %v6858_v12, %v6791_v35  ;;  %v8187_v12 = vld [vmem:[#allocation18_spill] sm:$0xff] }
 0x4f7   :  { %v6881_v58 = vpop.f32.mrf.mxu0  ;;  %v6883_v17 = vpop.f32.mrf.mxu1 }
 0x4fb   :  { %v2361_v2 = vpop.f32.mrf.mxu3  ;;  %v2507_v49 = vpop.f32.mrf.mxu2 }
 0x4fc   :  { %v2362_v31 = vadd.f32 %v2361_v2, %v2289_v10  ;;  %v2508_v50 = vadd.f32 %v2507_v49, %v2435_v51  ;;  %v5630_v10 = vld [vmem:[#allocation2 + $0x414] sm:$0xf0]  ;;  %v2297_v51 = vadd.f32 %v6815_v47, %v6791_v35  ;;  %v2443_v2 = vadd.f32 %v6817_v54, %v6793_v56 }
 0x4fd   :  { %v5236_v49 = vor.u32 %v5630_v10, %v5235_v13  ;;  %v2299_v47 = vadd.f32 %v6832_v23, %v6791_v35  ;;  %v2445_v54 = vadd.f32 %v6834_v41, %v6793_v56  ;;  %v2302_v41 = vadd.f32 %v6841_v43, %v6791_v35  ;;  %v5628_v43 = vld [vmem:[#allocation2 + $0x404] sm:$0xf0] }
 0x4fe   :  { %v2568_v46 = vmax.f32 %v2362_v31, 0.0  ;;  %v2569_v59 = vmax.f32 %v2508_v50, 0.0  ;;  %v2450_v10 = vadd.f32 %v6860_v11, %v6793_v56 }
 0x4ff   :  { %v6890_v14 = vpop.f32.mrf.mxu0  ;;  %v6892_v28 = vpop.f32.mrf.mxu1  ;;  %3290 = vmatpush.bf16.msra.mxu0 %v5236_v49 }
 0x500   :  { %2403 = vmatmul.bf16.gmra.mxu3 %v2062_v45  ;;  %v6894_v36 = vpack.c.bf16 %v2568_v46, %v2566_v40  ;;  %v6896_v27 = vpack.c.bf16 %v2569_v59, %v2567_v19  ;;  %2549 = vmatmul.bf16.gmra.mxu2 %v2062_v45 }
 0x502   :  { %2860 = vmatmul.bf16.gmra.mxu0 %v5862_v57  ;;  %3006 = vmatmul.bf16.gmra.mxu1 %v5862_v57 }
 0x503   :  { %v2364_v4 = vpop.f32.mrf.mxu3  ;;  %v2510_v55 = vpop.f32.mrf.mxu2 }
 0x504   :  { %v2365_v9 = vadd.f32 %v2364_v4, %v2292_v1  ;;  %v2511_v39 = vadd.f32 %v2510_v55, %v2438_v30 }
 0x506   :  { %v2570_v20 = vmax.f32 %v2365_v9, 0.0  ;;  %v2571_v25 = vmax.f32 %v2511_v39, 0.0 }
 0x507   :  { %v6904_v26 = vpop.f32.mrf.mxu0  ;;  %v6906_v48 = vpop.f32.mrf.mxu1 }
 0x50b   :  { %v2366_v5 = vpop.f32.mrf.mxu3  ;;  %v2512_v62 = vpop.f32.mrf.mxu2 }
 0x50c   :  { %v2367_v57 = vadd.f32 %v2366_v5, %v2294_v61  ;;  %v2513_v34 = vadd.f32 %v2512_v62, %v2440_v24  ;;  %v8186_v61 = vld [vmem:[#allocation5_spill] sm:$0xff] }
 0x50e   :  { %v2572_v53 = vmax.f32 %v2367_v57, 0.0  ;;  %v2573_v6 = vmax.f32 %v2513_v34, 0.0  ;;  %v5291_v34 = vld [vmem:[#allocation2 + $0x480] sm:$0xf] }
 0x50f   :  { %v6912_v42 = vpop.f32.mrf.mxu0  ;;  %v6914_v15 = vpop.f32.mrf.mxu1 }
 0x510   :  { %5159 = vmatmul.msk.bf16.vlgmr.msrb.gmra.mxu3 %vm1662_vm3, %v6353_v21  ;;  %v6918_v38 = vpack.c.bf16 %v2572_v53, %v2570_v20  ;;  %v6920_v3 = vpack.c.bf16 %v2573_v6, %v2571_v25  ;;  %5172 = vmatmul.msk.bf16.vlgmr.msra.gmra.mxu2 %vm1662_vm3, %v6353_v21  ;;  %v5644_v20 = vld [vmem:[#allocation2 + $0x484] sm:$0xf0]  ;;  %v5227_v6 = vld [vmem:[#allocation2 + $0x400] sm:$0xf] }
 0x511   :  { %v5228_v13 = vor.u32 %v5628_v43, %v5227_v6 }
 0x512   :  { %2865 = vmatmul.bf16.gmra.mxu0 %v5881_v63  ;;  %3011 = vmatmul.bf16.gmra.mxu1 %v5881_v63 }
 0x513   :  { %v2369_v31 = vpop.f32.mrf.mxu3  ;;  %v2515_v50 = vpop.f32.mrf.mxu2  ;;  %3291 = vmatpush.bf16.msra.mxu0 %v5228_v13 }
 0x514   :  { %v2370_v45 = vadd.f32 %v2369_v31, %v2297_v51  ;;  %v2516_v40 = vadd.f32 %v2515_v50, %v2443_v2 }
 0x516   :  { %v2574_v30 = vmax.f32 %v2370_v45, 0.0  ;;  %v2575_v4 = vmax.f32 %v2516_v40, 0.0  ;;  %v5647_v40 = vld [vmem:[#allocation2 + $0x4a4] sm:$0xf] }
 0x517   :  { %v6930_v19 = vpop.f32.mrf.mxu0  ;;  %v6932_v21 = vpop.f32.mrf.mxu1 }
 0x51b   :  { %v2371_v46 = vpop.f32.mrf.mxu3  ;;  %v2517_v59 = vpop.f32.mrf.mxu2 }
 0x51c   :  { %v2372_v1 = vadd.f32 %v2371_v46, %v2299_v47  ;;  %v2518_v63 = vadd.f32 %v2517_v59, %v2445_v54  ;;  %v5309_v47 = vld [vmem:[#allocation2 + $0x4a8] sm:$0xf0] }
 0x51e   :  { %v2576_v55 = vmax.f32 %v2372_v1, 0.0  ;;  %v2577_v9 = vmax.f32 %v2518_v63, 0.0  ;;  %v5312_v63 = vor.u32 %v5647_v40, %v5309_v47  ;;  %v8189_v40 = vld [vmem:[#allocation19_spill] sm:$0xff] }
 0x51f   :  { %v6938_v39 = vpop.f32.mrf.mxu0  ;;  %v6940_v44 = vpop.f32.mrf.mxu1 }
 0x520   :  { %5160 = vmatmul.msk.bf16.gmra.mxu3 %vm1662_vm3, %v6366_v18  ;;  %v6944_v32 = vpack.c.bf16 %v2576_v55, %v2574_v30  ;;  %v6946_v23 = vpack.c.bf16 %v2577_v9, %v2575_v4  ;;  %5173 = vmatmul.msk.bf16.gmra.mxu2 %vm1662_vm3, %v6366_v18  ;;  %v5292_v18 = vor.u32 %v5644_v20, %v5291_v34  ;;  %v8188_v9 = vld [vmem:[#allocation6_spill] sm:$0xff] }
 0x521   :  { %v2307_v4 = vadd.f32 %v6867_v60, %v6791_v35  ;;  %v2453_v55 = vadd.f32 %v6869_v52, %v6793_v56  ;;  %3508 = vmatpush.bf16.msrb.mxu2 %v5312_v63  ;;  %v2309_v60 = vadd.f32 %v6881_v58, %v6791_v35  ;;  %v2455_v52 = vadd.f32 %v6883_v17, %v6793_v56  ;;  %v8190_v63 = vld [vmem:[#allocation8_spill] sm:$0xff] }
 0x522   :  { %2870 = vmatmul.bf16.gmra.mxu0 %v8186_v61  ;;  %3016 = vmatmul.bf16.gmra.mxu1 %v8186_v61 }
 0x523   :  { %v2374_v24 = vpop.f32.mrf.mxu3  ;;  %v2520_v5 = vpop.f32.mrf.mxu2  ;;  %3364 = vmatpush.bf16.msra.mxu3 %v5292_v18 }
 0x524   :  { %v2375_v62 = vadd.f32 %v2374_v24, %v2302_v41  ;;  %v2521_v57 = vadd.f32 %v2520_v5, %v2448_v22  ;;  %v5631_v41 = vld [vmem:[#allocation2 + $0x424] sm:$0xf]  ;;  %v5245_v22 = vld [vmem:[#allocation2 + $0x428] sm:$0xf0] }
 0x525   :  { %v5248_v5 = vor.u32 %v5631_v41, %v5245_v22 }
 0x526   :  { %v2578_v54 = vmax.f32 %v2375_v62, 0.0  ;;  %v2579_v46 = vmax.f32 %v2521_v57, 0.0 }
 0x527   :  { %v6956_v25 = vpop.f32.mrf.mxu0  ;;  %v6958_v53 = vpop.f32.mrf.mxu1  ;;  %3435 = vmatpush.bf16.msrb.mxu1 %v5248_v5 }
 0x52b   :  { %v2376_v51 = vpop.f32.mrf.mxu3  ;;  %v2522_v2 = vpop.f32.mrf.mxu2 }
 0x52c   :  { %v2377_v49 = vadd.f32 %v2376_v51, %v2304_v0  ;;  %v2523_v31 = vadd.f32 %v2522_v2, %v2450_v10 }
 0x52e   :  { %v2580_v50 = vmax.f32 %v2377_v49, 0.0  ;;  %v2581_v45 = vmax.f32 %v2523_v31, 0.0 }
 0x52f   :  { %v6964_v59 = vpop.f32.mrf.mxu0  ;;  %v6966_v1 = vpop.f32.mrf.mxu1 }
 0x530   :  { %5161 = vmatmul.msk.bf16.gmra.mxu3 %vm1662_vm3, %v8187_v12  ;;  %5174 = vmatmul.msk.bf16.gmra.mxu2 %vm1662_vm3, %v8187_v12  ;;  %v6972_v11 = vpack.c.bf16 %v2580_v50, %v2578_v54  ;;  %v6974_v30 = vpack.c.bf16 %v2581_v45, %v2579_v46  ;;  %v5283_v50 = vld [vmem:[#allocation2 + $0x470] sm:$0xf]  ;;  %v5642_v45 = vld [vmem:[#allocation2 + $0x474] sm:$0xf0]  ;;  %v2312_v54 = vadd.f32 %v6890_v14, %v6791_v35 }
 0x531   :  { %v5284_v58 = vor.u32 %v5642_v45, %v5283_v50  ;;  %v2458_v46 = vadd.f32 %v6892_v28, %v6793_v56  ;;  %v2314_v28 = vadd.f32 %v6904_v26, %v6791_v35  ;;  %v5629_v45 = vld [vmem:[#allocation2 + $0x414] sm:$0xf]  ;;  %v8191_v26 = vld [vmem:[#allocation20_spill] sm:$0xff] }
 0x532   :  { %2875 = vmatmul.bf16.gmra.mxu0 %v8188_v9  ;;  %3021 = vmatmul.bf16.gmra.mxu1 %v8188_v9 }
 0x533   :  { %v2379_v61 = vpop.f32.mrf.mxu3  ;;  %v2525_v24 = vpop.f32.mrf.mxu2  ;;  %3365 = vmatpush.bf16.msra.mxu3 %v5284_v58 }
 0x534   :  { %v2380_v62 = vadd.f32 %v2379_v61, %v2307_v4  ;;  %v2526_v57 = vadd.f32 %v2525_v24, %v2453_v55  ;;  %v5219_v61 = vld [vmem:[#allocation2 + $0x3f0] sm:$0xf]  ;;  %v5626_v24 = vld [vmem:[#allocation2 + $0x3f4] sm:$0xf0] }
 0x535   :  { %v5220_v5 = vor.u32 %v5626_v24, %v5219_v61  ;;  %v5275_v24 = vld [vmem:[#allocation2 + $0x460] sm:$0xf] }
 0x536   :  { %v2582_v0 = vmax.f32 %v2380_v62, 0.0  ;;  %v2583_v2 = vmax.f32 %v2526_v57, 0.0  ;;  %v5645_v62 = vld [vmem:[#allocation2 + $0x494] sm:$0xf]  ;;  %v5301_v57 = vld [vmem:[#allocation2 + $0x498] sm:$0xf0] }
 0x537   :  { %v6982_v34 = vpop.f32.mrf.mxu0  ;;  %v6984_v20 = vpop.f32.mrf.mxu1  ;;  %v5304_v14 = vor.u32 %v5645_v62, %v5301_v57  ;;  %3292 = vmatpush.bf16.msra.mxu0 %v5220_v5  ;;  %v5640_v5 = vld [vmem:[#allocation2 + $0x464] sm:$0xf0]  ;;  %v2465_v57 = vadd.f32 %v6932_v21, %v6793_v56 }
 0x538   :  { %v5276_v62 = vor.u32 %v5640_v5, %v5275_v24 }
 0x539   :  { %3509 = vmatpush.bf16.msrb.mxu2 %v5304_v14 }
 0x53a   :  { %3366 = vmatpush.bf16.msra.mxu3 %v5276_v62 }
 0x53b   :  { %v2381_v18 = vpop.f32.mrf.mxu3  ;;  %v2527_v6 = vpop.f32.mrf.mxu2 }
 0x53c   :  { %v2382_v43 = vadd.f32 %v2381_v18, %v2309_v60  ;;  %v2528_v13 = vadd.f32 %v2527_v6, %v2455_v52  ;;  %v2460_v60 = vadd.f32 %v6906_v48, %v6793_v56 }
 0x53e   :  { %v2584_v10 = vmax.f32 %v2382_v43, 0.0  ;;  %v2585_v51 = vmax.f32 %v2528_v13, 0.0 }
 0x53f   :  { %v6990_v49 = vpop.f32.mrf.mxu0  ;;  %v6992_v31 = vpop.f32.mrf.mxu1 }
 0x540   :  { %5162 = vmatmul.msk.bf16.gmra.mxu3 %vm1662_vm3, %v8189_v40  ;;  %v6996_v47 = vpack.c.bf16 %v2584_v10, %v2582_v0  ;;  %5175 = vmatmul.msk.bf16.gmra.mxu2 %vm1662_vm3, %v8189_v40  ;;  %v7000_v17 = vpack.c.bf16 %v2585_v51, %v2583_v2  ;;  %v5237_v40 = vld [vmem:[#allocation2 + $0x418] sm:$0xf0] }
 0x541   :  { %v5240_v48 = vor.u32 %v5629_v45, %v5237_v40  ;;  %v8194_v45 = vld [vmem:[#allocation21_spill] sm:$0xff] }
 0x542   :  { %2880 = vmatmul.bf16.gmra.mxu0 %v8190_v63  ;;  %3026 = vmatmul.bf16.gmra.mxu1 %v8190_v63  ;;  %v8193_v63 = vld [vmem:[#allocation10_spill] sm:$0xff] }
 0x543   :  { %v2384_v12 = vpop.f32.mrf.mxu3  ;;  %v2530_v4 = vpop.f32.mrf.mxu2  ;;  %3436 = vmatpush.bf16.msrb.mxu1 %v5240_v48  ;;  %v8196_v48 = vld [vmem:[#allocation12_spill] sm:$0xff] }
 0x544   :  { %v2385_v55 = vadd.f32 %v2384_v12, %v2312_v54  ;;  %v2531_v9 = vadd.f32 %v2530_v4, %v2458_v46  ;;  %v2317_v46 = vadd.f32 %v6912_v42, %v6791_v35  ;;  %v2463_v12 = vadd.f32 %v6914_v15, %v6793_v56 }
 0x545   :  { %v2319_v42 = vadd.f32 %v6930_v19, %v6791_v35 }
 0x546   :  { %v2586_v13 = vmax.f32 %v2385_v55, 0.0  ;;  %v2587_v51 = vmax.f32 %v2531_v9, 0.0 }
 0x547   :  { %v2333_v41 = vpop.f32.mrf.mxu0  ;;  %v2479_v22 = vpop.f32.mrf.mxu1 }
 0x54b   :  { %v2386_v52 = vpop.f32.mrf.mxu3  ;;  %v2532_v18 = vpop.f32.mrf.mxu2 }
 0x54c   :  { %v2387_v6 = vadd.f32 %v2386_v52, %v2314_v28  ;;  %v2533_v43 = vadd.f32 %v2532_v18, %v2460_v60 }
 0x54e   :  { %v2588_v0 = vmax.f32 %v2387_v6, 0.0  ;;  %v2589_v10 = vmax.f32 %v2533_v43, 0.0 }
 0x54f   :  { %v7012_v2 = vpop.f32.mrf.mxu0  ;;  %v7014_v50 = vpop.f32.mrf.mxu1 }
 0x550   :  { %5163 = vmatmul.msk.bf16.gmra.mxu3 %vm1662_vm3, %v8191_v26  ;;  %v7018_v58 = vpack.c.bf16 %v2588_v0, %v2586_v13  ;;  %5176 = vmatmul.msk.bf16.gmra.mxu2 %vm1662_vm3, %v8191_v26  ;;  %v7022_v54 = vpack.c.bf16 %v2589_v10, %v2587_v51  ;;  %v5211_v10 = vld [vmem:[#allocation2 + $0x3e0] sm:$0xf]  ;;  %v5624_v51 = vld [vmem:[#allocation2 + $0x3e4] sm:$0xf0]  ;;  %v2322_v26 = vadd.f32 %v6938_v39, %v6791_v35  ;;  %v5627_v39 = vld [vmem:[#allocation2 + $0x404] sm:$0xf] }
 0x551   :  { %v5212_v19 = vor.u32 %v5624_v51, %v5211_v10 }
 0x552   :  { %8192 = vst [vmem:[#allocation5_spill] sm:$0xff] %v7022_v54  ;;  %2885 = vmatmul.bf16.gmra.mxu0 %v8193_v63  ;;  %3031 = vmatmul.bf16.gmra.mxu1 %v8193_v63  ;;  %v5293_v63 = vld [vmem:[#allocation2 + $0x488] sm:$0xf0] }
 0x553   :  { %v2389_v4 = vpop.f32.mrf.mxu3  ;;  %v2535_v9 = vpop.f32.mrf.mxu2  ;;  %3293 = vmatpush.bf16.msra.mxu0 %v5212_v19 }
 0x554   :  { %v2390_v55 = vadd.f32 %v2389_v4, %v2317_v46  ;;  %v2536_v41 = vadd.f32 %v2535_v9, %v2463_v12  ;;  %v5643_v46 = vld [vmem:[#allocation2 + $0x484] sm:$0xf]  ;;  %v2468_v12 = vadd.f32 %v6940_v44, %v6793_v56  ;;  %v2470_v44 = vadd.f32 %v6958_v53, %v6793_v56 }
 0x556   :  { %v2590_v52 = vmax.f32 %v2390_v55, 0.0  ;;  %v2591_v6 = vmax.f32 %v2536_v41, 0.0  ;;  %v5296_v55 = vor.u32 %v5643_v46, %v5293_v63  ;;  %v5623_v46 = vld [vmem:[#allocation2 + $0x3e4] sm:$0xf]  ;;  %v5213_v63 = vld [vmem:[#allocation2 + $0x3e8] sm:$0xf0] }
 0x557   :  { %v7030_v22 = vpop.f32.mrf.mxu0  ;;  %v7032_v61 = vpop.f32.mrf.mxu1 }
 0x558   :  { %3510 = vmatpush.bf16.msrb.mxu2 %v5296_v55  ;;  %v8199_v55 = vld [vmem:[#allocation14_spill] sm:$0xff] }
 0x55b   :  { %v2391_v14 = vpop.f32.mrf.mxu3  ;;  %v2537_v28 = vpop.f32.mrf.mxu2 }
 0x55c   :  { %v2392_v15 = vadd.f32 %v2391_v14, %v2319_v42  ;;  %v2538_v60 = vadd.f32 %v2537_v28, %v2465_v57  ;;  %v5229_v42 = vld [vmem:[#allocation2 + $0x408] sm:$0xf0]  ;;  %v2324_v57 = vadd.f32 %v6956_v25, %v6791_v35  ;;  %v8197_v25 = vld [vmem:[#allocation22_spill] sm:$0xff] }
 0x55d   :  { %v5232_v14 = vor.u32 %v5627_v39, %v5229_v42  ;;  %v2473_v39 = vadd.f32 %v6966_v1, %v6793_v56  ;;  %v5195_v1 = vld [vmem:[#allocation2 + $0x3c0] sm:$0xf] }
 0x55e   :  { %v2592_v18 = vmax.f32 %v2392_v15, 0.0  ;;  %v2593_v43 = vmax.f32 %v2538_v60, 0.0 }
 0x55f   :  { %v7038_v13 = vpop.f32.mrf.mxu0  ;;  %v7040_v0 = vpop.f32.mrf.mxu1  ;;  %3437 = vmatpush.bf16.msrb.mxu1 %v5232_v14 }
 0x560   :  { %5164 = vmatmul.msk.bf16.gmra.mxu3 %vm1662_vm3, %v8194_v45  ;;  %v7044_v21 = vpack.c.bf16 %v2592_v18, %v2590_v52  ;;  %5177 = vmatmul.msk.bf16.gmra.mxu2 %vm1662_vm3, %v8194_v45  ;;  %v7048_v40 = vpack.c.bf16 %v2593_v43, %v2591_v6  ;;  %v5625_v18 = vld [vmem:[#allocation2 + $0x3f4] sm:$0xf]  ;;  %v5221_v6 = vld [vmem:[#allocation2 + $0x3f8] sm:$0xf0] }
 0x561   :  { %v5224_v51 = vor.u32 %v5625_v18, %v5221_v6  ;;  %v5205_v18 = vld [vmem:[#allocation2 + $0x3d8] sm:$0xf0] }
 0x562   :  { %8195 = vst [vmem:[#allocation18_spill] sm:$0xff] %v7048_v40  ;;  %2890 = vmatmul.bf16.gmra.mxu0 %v8196_v48  ;;  %3036 = vmatmul.bf16.gmra.mxu1 %v8196_v48 }
 0x563   :  { %v2394_v4 = vpop.f32.mrf.mxu3  ;;  %v2540_v41 = vpop.f32.mrf.mxu2  ;;  %3438 = vmatpush.bf16.msrb.mxu1 %v5224_v51  ;;  %v5620_v51 = vld [vmem:[#allocation2 + $0x3c4] sm:$0xf0] }
 0x564   :  { %v2395_v9 = vadd.f32 %v2394_v4, %v2322_v26  ;;  %v2541_v24 = vadd.f32 %v2540_v41, %v2468_v12  ;;  %v2327_v4 = vadd.f32 %v6964_v59, %v6791_v35  ;;  %v5638_v41 = vld [vmem:[#allocation2 + $0x454] sm:$0xf0]  ;;  %v5621_v59 = vld [vmem:[#allocation2 + $0x3d4] sm:$0xf] }
 0x566   :  { %v2594_v43 = vmax.f32 %v2395_v9, 0.0  ;;  %v2595_v45 = vmax.f32 %v2541_v24, 0.0  ;;  %v5267_v9 = vld [vmem:[#allocation2 + $0x450] sm:$0xf]  ;;  %v5216_v24 = vor.u32 %v5623_v46, %v5213_v63  ;;  %v5197_v46 = vld [vmem:[#allocation2 + $0x3c8] sm:$0xf0]  ;;  %v2475_v63 = vadd.f32 %v6984_v20, %v6793_v56 }
 0x567   :  { %v7056_v5 = vpop.f32.mrf.mxu0  ;;  %v7058_v62 = vpop.f32.mrf.mxu1 }
 0x568   :  { %3439 = vmatpush.bf16.msrb.mxu1 %v5216_v24 }
 0x56b   :  { %v2396_v15 = vpop.f32.mrf.mxu3  ;;  %v2542_v60 = vpop.f32.mrf.mxu2 }
 0x56c   :  { %v2397_v28 = vadd.f32 %v2396_v15, %v2324_v57  ;;  %v2543_v52 = vadd.f32 %v2542_v60, %v2470_v44  ;;  %v5268_v57 = vor.u32 %v5638_v41, %v5267_v9  ;;  %v5622_v60 = vld [vmem:[#allocation2 + $0x3d4] sm:$0xf0] }
 0x56e   :  { %v2596_v10 = vmax.f32 %v2397_v28, 0.0  ;;  %v2597_v19 = vmax.f32 %v2543_v52, 0.0  ;;  %3367 = vmatpush.bf16.msra.mxu3 %v5268_v57  ;;  %v5203_v28 = vld [vmem:[#allocation2 + $0x3d0] sm:$0xf] }
 0x56f   :  { %v7064_v26 = vpop.f32.mrf.mxu0  ;;  %v7066_v48 = vpop.f32.mrf.mxu1  ;;  %v5204_v52 = vor.u32 %v5622_v60, %v5203_v28  ;;  %v5187_v57 = vld [vmem:[#allocation2 + $0x3b0] sm:$0xf]  ;;  %v5618_v60 = vld [vmem:[#allocation2 + $0x3b4] sm:$0xf0] }
 0x570   :  { %5165 = vmatmul.msk.bf16.gmra.mxu3 %vm1662_vm3, %v8197_v25  ;;  %v7070_v53 = vpack.c.bf16 %v2596_v10, %v2594_v43  ;;  %5178 = vmatmul.msk.bf16.gmra.mxu2 %vm1662_vm3, %v8197_v25  ;;  %v7074_v12 = vpack.c.bf16 %v2597_v19, %v2595_v45  ;;  %v5208_v10 = vor.u32 %v5621_v59, %v5205_v18  ;;  %v5619_v45 = vld [vmem:[#allocation2 + $0x3c4] sm:$0xf]  ;;  %v5617_v59 = vld [vmem:[#allocation2 + $0x3b4] sm:$0xf] }
 0x571   :  { %3294 = vmatpush.bf16.msra.mxu0 %v5204_v52  ;;  %v2329_v19 = vadd.f32 %v6982_v34, %v6791_v35  ;;  %v5196_v25 = vor.u32 %v5620_v51, %v5195_v1  ;;  %v5188_v1 = vor.u32 %v5618_v60, %v5187_v57  ;;  %v5189_v51 = vld [vmem:[#allocation2 + $0x3b8] sm:$0xf0] }
 0x572   :  { %8198 = vst [vmem:[#allocation6_spill] sm:$0xff] %v7074_v12  ;;  %2895 = vmatmul.bf16.gmra.mxu0 %v8199_v55  ;;  %3041 = vmatmul.bf16.gmra.mxu1 %v8199_v55  ;;  %v5200_v55 = vor.u32 %v5619_v45, %v5197_v46  ;;  %v8200_v45 = vld [vmem:[#allocation23_spill] sm:$0xff]  ;;  %v8202_v46 = vld [vmem:[#allocation16_spill] sm:$0xff] }
 0x573   :  { %v2399_v42 = vpop.f32.mrf.mxu3  ;;  %v2545_v44 = vpop.f32.mrf.mxu2  ;;  %3440 = vmatpush.bf16.msrb.mxu1 %v5208_v10 }
 0x574   :  { %v2400_v14 = vadd.f32 %v2399_v42, %v2327_v4  ;;  %v2546_v15 = vadd.f32 %v2545_v44, %v2473_v39  ;;  %v5641_v39 = vld [vmem:[#allocation2 + $0x474] sm:$0xf]  ;;  %v5285_v42 = vld [vmem:[#allocation2 + $0x478] sm:$0xf0] }
 0x575   :  { %3295 = vmatpush.bf16.msra.mxu0 %v5196_v25  ;;  %v5288_v28 = vor.u32 %v5641_v39, %v5285_v42 }
 0x576   :  { %v2598_v34 = vmax.f32 %v2400_v14, 0.0  ;;  %v2599_v52 = vmax.f32 %v2546_v15, 0.0  ;;  %v2332_v15 = vadd.f32 %v6990_v49, %v6791_v35  ;;  %v5054_v35 = vld [vmem:[%s8098_s2 + $0x7] ss:$8 sm:$0x3] }
 0x577   :  { %v7082_v6 = vpop.f32.mrf.mxu0  ;;  %v7084_v43 = vpop.f32.mrf.mxu1  ;;  %3441 = vmatpush.bf16.msrb.mxu1 %v5200_v55  ;;  %3511 = vmatpush.bf16.msrb.mxu2 %v5288_v28  ;;  %v7119_v42 = vperm.slane %v5054_v35, 0 }
 0x579   :  { %3296 = vmatpush.bf16.msra.mxu0 %v5188_v1  ;;  %v8206_v1 = vld [vmem:[#allocation17_spill] sm:$0xff] }
 0x57b   :  { %v2401_v4 = vpop.f32.mrf.mxu3  ;;  %v2547_v41 = vpop.f32.mrf.mxu2 }
 0x57c   :  { %v2402_v9 = vadd.f32 %v2401_v4, %v2329_v19  ;;  %v2548_v24 = vadd.f32 %v2547_v41, %v2475_v63  ;;  %v5192_v19 = vor.u32 %v5617_v59, %v5189_v51  ;;  %v2478_v63 = vadd.f32 %v6992_v31, %v6793_v56  ;;  %v5259_v31 = vld [vmem:[#allocation2 + $0x440] sm:$0xf] }
 0x57d   :  { %v7121_v56 = vperm.slane %v5054_v35, 1  ;;  %v2849_v35 = vadd.f32 %v7030_v22, %v7119_v42 }
 0x57e   :  { %v2600_v44 = vmax.f32 %v2402_v9, 0.0  ;;  %v2601_v18 = vmax.f32 %v2548_v24, 0.0  ;;  %3442 = vmatpush.bf16.msrb.mxu1 %v5192_v19 }
 0x57f   :  { %v7090_v10 = vpop.f32.mrf.mxu0  ;;  %v7092_v20 = vpop.f32.mrf.mxu1 }
 0x580   :  { %5166 = vmatmul.msk.bf16.gmra.mxu3 %vm1662_vm3, %v8200_v45  ;;  %5179 = vmatmul.msk.bf16.gmra.mxu2 %vm1662_vm3, %v8200_v45  ;;  %v7098_v25 = vpack.c.bf16 %v2600_v44, %v2598_v34  ;;  %v7100_v14 = vpack.c.bf16 %v2601_v18, %v2599_v52  ;;  %v5636_v44 = vld [vmem:[#allocation2 + $0x444] sm:$0xf0]  ;;  %v2847_v34 = vadd.f32 %v7012_v2, %v7119_v42  ;;  %v8205_v52 = vld [vmem:[#allocation7_spill] sm:$0xff]  ;;  %v5639_v2 = vld [vmem:[#allocation2 + $0x464] sm:$0xf] }
 0x581   :  { %v5260_v28 = vor.u32 %v5636_v44, %v5259_v31  ;;  %v2993_v18 = vadd.f32 %v7014_v50, %v7121_v56 }
 0x582   :  { %8201 = vst [vmem:[#allocation19_spill] sm:$0xff] %v7100_v14  ;;  %2900 = vmatmul.bf16.gmra.mxu0 %v8202_v46  ;;  %3046 = vmatmul.bf16.gmra.mxu1 %v8202_v46  ;;  %v5277_v46 = vld [vmem:[#allocation2 + $0x468] sm:$0xf0]  ;;  %v3005_v14 = vadd.f32 %v7084_v43, %v7121_v56  ;;  %v2862_v43 = vadd.f32 %v7090_v10, %v7119_v42 }
 0x583   :  { %v2404_v4 = vpop.f32.mrf.mxu3  ;;  %v2550_v9 = vpop.f32.mrf.mxu2  ;;  %3368 = vmatpush.bf16.msra.mxu3 %v5260_v28 }
 0x584   :  { %v7108_v55 = vadd.f32 %v2404_v4, %v2332_v15  ;;  %v7110_v41 = vadd.f32 %v2550_v9, %v2478_v63  ;;  %v5280_v63 = vor.u32 %v5639_v2, %v5277_v46  ;;  %v2995_v9 = vadd.f32 %v7032_v61, %v7121_v56  ;;  %v5634_v2 = vld [vmem:[#allocation2 + $0x434] sm:$0xf0] }
 0x585   :  { %v2998_v61 = vadd.f32 %v7040_v0, %v7121_v56  ;;  %v3000_v0 = vadd.f32 %v7058_v62, %v7121_v56  ;;  %v3003_v62 = vadd.f32 %v7066_v48, %v7121_v56 }
 0x586   :  { %8203 = vst [vmem:[#allocation8_spill] sm:$0xff] %v7108_v55  ;;  %3512 = vmatpush.bf16.msrb.mxu2 %v5280_v63 }
 0x587   :  { %8204 = vst [vmem:[#allocation20_spill] sm:$0xff] %v7110_v41  ;;  %v7112_v24 = vpop.f32.mrf.mxu0  ;;  %v7114_v39 = vpop.f32.mrf.mxu1 }
 0x588   :  { %v3010_v54 = vadd.f32 %v7114_v39, %v7121_v56 }
 0x58b   :  { %v2406_v49 = vpop.f32.mrf.mxu3  ;;  %v2552_v57 = vpop.f32.mrf.mxu2 }
 0x58f   :  { %v7123_v60 = vpop.f32.mrf.mxu0  ;;  %v7125_v59 = vpop.f32.mrf.mxu1 }
 0x590   :  { %5167 = vmatmul.msk.bf16.gmra.mxu3 %vm1662_vm3, %v8205_v52  ;;  %5180 = vmatmul.msk.bf16.gmra.mxu2 %vm1662_vm3, %v8205_v52  ;;  %v2852_v52 = vadd.f32 %v7038_v13, %v7119_v42  ;;  %v5251_v13 = vld [vmem:[#allocation2 + $0x430] sm:$0xf]  ;;  %v3013_v39 = vadd.f32 %v7125_v59, %v7121_v56 }
 0x591   :  { %v5252_v46 = vor.u32 %v5634_v2, %v5251_v13  ;;  %v5269_v13 = vld [vmem:[#allocation2 + $0x458] sm:$0xf0] }
 0x592   :  { %2905 = vmatmul.bf16.gmra.mxu0 %v8206_v1  ;;  %3051 = vmatmul.bf16.gmra.mxu1 %v8206_v1 }
 0x593   :  { %v2919_v51 = vpop.f32.mrf.mxu3  ;;  %v3065_v19 = vpop.f32.mrf.mxu2  ;;  %3369 = vmatpush.bf16.msra.mxu3 %v5252_v46 }
 0x594   :  { %v7137_v45 = vadd.f32 %v2919_v51, %v2847_v34  ;;  %v7139_v15 = vadd.f32 %v3065_v19, %v2993_v18  ;;  %v8207_v18 = vld [vmem:[#allocation9_spill] sm:$0xff] }
 0x597   :  { %v7141_v4 = vpop.f32.mrf.mxu0  ;;  %v7143_v50 = vpop.f32.mrf.mxu1 }
 0x598   :  { %v3015_v59 = vadd.f32 %v7143_v50, %v7121_v56  ;;  %v2869_v55 = vadd.f32 %v7141_v4, %v7119_v42  ;;  %v5364_v4 = vld [vmem:[#allocation2 + $0x5e8] sm:$0xf] }
 0x59b   :  { %v2921_v49 = vpop.f32.mrf.mxu3  ;;  %v3067_v31 = vpop.f32.mrf.mxu2 }
 0x59c   :  { %v7149_v57 = vadd.f32 %v2921_v49, %v2849_v35  ;;  %v7151_v44 = vadd.f32 %v3067_v31, %v2995_v9 }
 0x59f   :  { %v7153_v28 = vpop.f32.mrf.mxu0  ;;  %v7155_v34 = vpop.f32.mrf.mxu1 }
 0x5a0   :  { %5168 = vmatmul.msk.bf16.gmra.mxu3 %vm1662_vm3, %v8207_v18  ;;  %5181 = vmatmul.msk.bf16.gmra.mxu2 %vm1662_vm3, %v8207_v18  ;;  %v3018_v50 = vadd.f32 %v7155_v34, %v7121_v56 }
 0x5a2   :  { %3297 = vmatmul.bf16.vlgmr.msra.gmra.mxu0 %v6819_v7  ;;  %3443 = vmatmul.bf16.vlgmr.msrb.gmra.mxu1 %v6819_v7  ;;  %v2854_v7 = vadd.f32 %v7056_v5, %v7119_v42  ;;  %v5637_v5 = vld [vmem:[#allocation2 + $0x454] sm:$0xf] }
 0x5a3   :  { %v2924_v22 = vpop.f32.mrf.mxu3  ;;  %v3070_v51 = vpop.f32.mrf.mxu2  ;;  %v5272_v2 = vor.u32 %v5637_v5, %v5269_v13  ;;  %v5633_v5 = vld [vmem:[#allocation2 + $0x434] sm:$0xf]  ;;  %v5253_v13 = vld [vmem:[#allocation2 + $0x438] sm:$0xf0] }
 0x5a4   :  { %v7167_v1 = vadd.f32 %v2924_v22, %v2852_v52  ;;  %v7169_v19 = vadd.f32 %v3070_v51, %v2998_v61  ;;  %v2857_v22 = vadd.f32 %v7064_v26, %v7119_v42  ;;  %v8208_v51 = vld [vmem:[#allocation11_spill] sm:$0xff] }
 0x5a5   :  { %3513 = vmatpush.bf16.msrb.mxu2 %v5272_v2 }
 0x5a7   :  { %v7171_v63 = vpop.f32.mrf.mxu0  ;;  %v7173_v9 = vpop.f32.mrf.mxu1 }
 0x5a8   :  { %v2874_v34 = vadd.f32 %v7171_v63, %v7119_v42 }
 0x5ab   :  { %v2926_v35 = vpop.f32.mrf.mxu3  ;;  %v3072_v31 = vpop.f32.mrf.mxu2 }
 0x5ac   :  { %v7179_v49 = vadd.f32 %v2926_v35, %v2854_v7  ;;  %v7181_v52 = vadd.f32 %v3072_v31, %v3000_v0  ;;  %v5635_v31 = vld [vmem:[#allocation2 + $0x444] sm:$0xf] }
 0x5af   :  { %v7183_v18 = vpop.f32.mrf.mxu0  ;;  %v7185_v61 = vpop.f32.mrf.mxu1 }
 0x5b0   :  { %5169 = vmatmul.msk.bf16.gmra.mxu3 %vm1662_vm3, %v8208_v51  ;;  %5182 = vmatmul.msk.bf16.gmra.mxu2 %vm1662_vm3, %v8208_v51  ;;  %v5261_v51 = vld [vmem:[#allocation2 + $0x448] sm:$0xf0] }
 0x5b1   :  { %v5264_v41 = vor.u32 %v5635_v31, %v5261_v51  ;;  %v8209_v51 = vld [vmem:[#allocation13_spill] sm:$0xff] }
 0x5b2   :  { %3302 = vmatmul.bf16.gmra.mxu0 %v6845_v16  ;;  %3448 = vmatmul.bf16.gmra.mxu1 %v6845_v16  ;;  %v2859_v16 = vadd.f32 %v7082_v6, %v7119_v42  ;;  %v3008_v6 = vadd.f32 %v7092_v20, %v7121_v56 }
 0x5b3   :  { %v2929_v46 = vpop.f32.mrf.mxu3  ;;  %v3075_v26 = vpop.f32.mrf.mxu2  ;;  %3514 = vmatpush.bf16.msrb.mxu2 %v5264_v41  ;;  %v5436_v41 = vld [vmem:[#allocation2 + $0x678] sm:$0xf] }
 0x5b4   :  { %v7197_v0 = vadd.f32 %v2929_v46, %v2857_v22  ;;  %v7199_v7 = vadd.f32 %v3075_v26, %v3003_v62  ;;  %v5256_v46 = vor.u32 %v5633_v5, %v5253_v13 }
 0x5b7   :  { %v7201_v35 = vpop.f32.mrf.mxu0  ;;  %v7203_v48 = vpop.f32.mrf.mxu1  ;;  %3515 = vmatpush.bf16.msrb.mxu2 %v5256_v46  ;;  %v5690_v46 = vld [vmem:[#allocation2 + $0x5fc] sm:$0xf0] }
 0x5bb   :  { %v2931_v22 = vpop.f32.mrf.mxu3  ;;  %v3077_v62 = vpop.f32.mrf.mxu2 }
 0x5bc   :  { %v7209_v2 = vadd.f32 %v2931_v22, %v2859_v16  ;;  %v7211_v26 = vadd.f32 %v3077_v62, %v3005_v14  ;;  %v5706_v14 = vld [vmem:[#allocation2 + $0x67c] sm:$0xf0]  ;;  %v5372_v62 = vld [vmem:[#allocation2 + $0x5f8] sm:$0xf] }
 0x5bd   :  { %v5437_v16 = vor.u32 %v5706_v14, %v5436_v41  ;;  %v5373_v20 = vor.u32 %v5690_v46, %v5372_v62  ;;  %v8210_v62 = vld [vmem:[#allocation15_spill] sm:$0xff] }
 0x5bf   :  { %v7213_v12 = vpop.f32.mrf.mxu0  ;;  %v7215_v31 = vpop.f32.mrf.mxu1  ;;  %3929 = vmatpush.bf16.msrb.mxu3 %v5437_v16  ;;  %3856 = vmatpush.bf16.msrb.mxu0 %v5373_v20 }
 0x5c0   :  { %5170 = vmatmul.msk.bf16.gmra.mxu3 %vm1662_vm3, %v8209_v51  ;;  %5183 = vmatmul.msk.bf16.gmra.mxu2 %vm1662_vm3, %v8209_v51 }
 0x5c2   :  { %3307 = vmatmul.bf16.gmra.mxu0 %v6871_v33  ;;  %3453 = vmatmul.bf16.gmra.mxu1 %v6871_v33  ;;  %v2864_v33 = vadd.f32 %v7112_v24, %v7119_v42 }
 0x5c3   :  { %v2934_v22 = vpop.f32.mrf.mxu3  ;;  %v3080_v10 = vpop.f32.mrf.mxu2 }
 0x5c4   :  { %v7227_v5 = vadd.f32 %v2934_v22, %v2862_v43  ;;  %v7229_v13 = vadd.f32 %v3080_v10, %v3008_v6  ;;  %v2867_v10 = vadd.f32 %v7123_v60, %v7119_v42 }
 0x5c7   :  { %v7231_v40 = vpop.f32.mrf.mxu0  ;;  %v7233_v51 = vpop.f32.mrf.mxu1 }
 0x5cb   :  { %v2936_v43 = vpop.f32.mrf.mxu3  ;;  %v3082_v14 = vpop.f32.mrf.mxu2 }
 0x5cc   :  { %v7239_v41 = vadd.f32 %v2936_v43, %v2864_v33  ;;  %v7241_v6 = vadd.f32 %v3082_v14, %v3010_v54  ;;  %v5428_v43 = vld [vmem:[#allocation2 + $0x668] sm:$0xf]  ;;  %v5704_v14 = vld [vmem:[#allocation2 + $0x66c] sm:$0xf0] }
 0x5cf   :  { %v7243_v16 = vpop.f32.mrf.mxu0  ;;  %v7245_v22 = vpop.f32.mrf.mxu1 }
 0x5d0   :  { %5171 = vmatmul.msk.bf16.gmra.mxu3 %vm1662_vm3, %v8210_v62  ;;  %5184 = vmatmul.msk.bf16.gmra.mxu2 %vm1662_vm3, %v8210_v62  ;;  %v5429_v62 = vor.u32 %v5704_v14, %v5428_v43 }
 0x5d2   :  { %3312 = vmatmul.bf16.gmra.mxu0 %v6894_v36  ;;  %3458 = vmatmul.bf16.gmra.mxu1 %v6894_v36 }
 0x5d3   :  { %v2939_v54 = vpop.f32.mrf.mxu3  ;;  %v3085_v46 = vpop.f32.mrf.mxu2  ;;  %3930 = vmatpush.bf16.msrb.mxu3 %v5429_v62 }
 0x5d4   :  { %v7257_v24 = vadd.f32 %v2939_v54, %v2867_v10  ;;  %v7259_v20 = vadd.f32 %v3085_v46, %v3013_v39 }
 0x5d6   :  { %8211 = vst [vmem:[#allocation10_spill] sm:$0xff] %v7257_v24  ;;  %v2872_v24 = vadd.f32 %v7153_v28, %v7119_v42 }
 0x5d7   :  { %8212 = vst [vmem:[#allocation21_spill] sm:$0xff] %v7259_v20  ;;  %v7261_v60 = vpop.f32.mrf.mxu0  ;;  %v7263_v33 = vpop.f32.mrf.mxu1 }
 0x5db   :  { %v2941_v36 = vpop.f32.mrf.mxu3  ;;  %v3087_v54 = vpop.f32.mrf.mxu2 }
 0x5dc   :  { %v7269_v10 = vadd.f32 %v2941_v36, %v2869_v55  ;;  %v7271_v39 = vadd.f32 %v3087_v54, %v3015_v59  ;;  %v5688_v55 = vld [vmem:[#allocation2 + $0x5ec] sm:$0xf0] }
 0x5dd   :  { %v5365_v43 = vor.u32 %v5688_v55, %v5364_v4 }
 0x5de   :  { %8213 = vst [vmem:[#allocation12_spill] sm:$0xff] %v7271_v39 }
 0x5df   :  { %v7273_v46 = vpop.f32.mrf.mxu0  ;;  %v7275_v20 = vpop.f32.mrf.mxu1  ;;  %3857 = vmatpush.bf16.msrb.mxu0 %v5365_v43  ;;  %v2877_v43 = vadd.f32 %v7183_v18, %v7119_v42 }
 0x5e0   :  { %3370 = vmatmul.bf16.vlgmr.msra.gmra.mxu3 %v6821_v37  ;;  %3516 = vmatmul.bf16.vlgmr.msrb.gmra.mxu2 %v6821_v37  ;;  %v3020_v37 = vadd.f32 %v7173_v9, %v7121_v56  ;;  %v3023_v9 = vadd.f32 %v7185_v61, %v7121_v56  ;;  %v5356_v61 = vld [vmem:[#allocation2 + $0x5d8] sm:$0xf] }
 0x5e2   :  { %3317 = vmatmul.bf16.gmra.mxu0 %v6918_v38  ;;  %3463 = vmatmul.bf16.gmra.mxu1 %v6918_v38 }
 0x5e3   :  { %v2944_v14 = vpop.f32.mrf.mxu3  ;;  %v3090_v62 = vpop.f32.mrf.mxu2 }
 0x5e4   :  { %v7285_v59 = vadd.f32 %v2944_v14, %v2872_v24  ;;  %v7287_v28 = vadd.f32 %v3090_v62, %v3018_v50 }
 0x5e6   :  { %8214 = vst [vmem:[#allocation22_spill] sm:$0xff] %v7287_v28 }
 0x5e7   :  { %v7289_v36 = vpop.f32.mrf.mxu0  ;;  %v7291_v54 = vpop.f32.mrf.mxu1 }
 0x5eb   :  { %v2946_v39 = vpop.f32.mrf.mxu3  ;;  %v3092_v4 = vpop.f32.mrf.mxu2 }
 0x5ec   :  { %v7297_v38 = vadd.f32 %v2946_v39, %v2874_v34  ;;  %v7299_v24 = vadd.f32 %v3092_v4, %v3020_v37  ;;  %v5420_v37 = vld [vmem:[#allocation2 + $0x658] sm:$0xf]  ;;  %v5702_v34 = vld [vmem:[#allocation2 + $0x65c] sm:$0xf0] }
 0x5ed   :  { %v5421_v18 = vor.u32 %v5702_v34, %v5420_v37  ;;  %v5705_v34 = vld [vmem:[#allocation2 + $0x67c] sm:$0xf] }
 0x5ee   :  { %8215 = vst [vmem:[#allocation14_spill] sm:$0xff] %v7297_v38  ;;  %v5686_v38 = vld [vmem:[#allocation2 + $0x5dc] sm:$0xf0] }
 0x5ef   :  { %8216 = vst [vmem:[#allocation23_spill] sm:$0xff] %v7299_v24  ;;  %v7301_v55 = vpop.f32.mrf.mxu0  ;;  %v7303_v50 = vpop.f32.mrf.mxu1  ;;  %3931 = vmatpush.bf16.msrb.mxu3 %v5421_v18 }
 0x5f0   :  { %3375 = vmatmul.bf16.gmra.mxu3 %v6847_v8  ;;  %3521 = vmatmul.bf16.gmra.mxu2 %v6847_v8  ;;  %v5357_v8 = vor.u32 %v5686_v38, %v5356_v61  ;;  %v5689_v38 = vld [vmem:[#allocation2 + $0x5fc] sm:$0xf] }
 0x5f2   :  { %3322 = vmatmul.bf16.gmra.mxu0 %v6944_v32  ;;  %3468 = vmatmul.bf16.gmra.mxu1 %v6944_v32  ;;  %v3025_v32 = vadd.f32 %v7203_v48, %v7121_v56  ;;  %v2882_v48 = vadd.f32 %v7213_v12, %v7119_v42 }
 0x5f3   :  { %v2949_v63 = vpop.f32.mrf.mxu3  ;;  %v3095_v14 = vpop.f32.mrf.mxu2  ;;  %3858 = vmatpush.bf16.msrb.mxu0 %v5357_v8 }
 0x5f4   :  { %v7313_v39 = vadd.f32 %v2949_v63, %v2877_v43  ;;  %v7315_v62 = vadd.f32 %v3095_v14, %v3023_v9  ;;  %v2879_v43 = vadd.f32 %v7201_v35, %v7119_v42  ;;  %v3028_v35 = vadd.f32 %v7215_v31, %v7121_v56 }
 0x5f6   :  { %8217 = vst [vmem:[#allocation16_spill] sm:$0xff] %v7313_v39 }
 0x5f7   :  { %8218 = vst [vmem:[#allocation7_spill] sm:$0xff] %v7315_v62  ;;  %v7317_v4 = vpop.f32.mrf.mxu0  ;;  %v7319_v24 = vpop.f32.mrf.mxu1  ;;  %v5438_v62 = vld [vmem:[#allocation2 + $0x680] sm:$0xf0] }
 0x5f8   :  { %v5441_v39 = vor.u32 %v5705_v34, %v5438_v62  ;;  %v5374_v62 = vld [vmem:[#allocation2 + $0x600] sm:$0xf0] }
 0x5f9   :  { %v5377_v8 = vor.u32 %v5689_v38, %v5374_v62  ;;  %v5412_v38 = vld [vmem:[#allocation2 + $0x648] sm:$0xf] }
 0x5fa   :  { %4075 = vmatpush.bf16.msra.mxu2 %v5441_v39 }
 0x5fb   :  { %v2951_v9 = vpop.f32.mrf.mxu3  ;;  %v3097_v14 = vpop.f32.mrf.mxu2  ;;  %4002 = vmatpush.bf16.msra.mxu1 %v5377_v8 }
 0x5fc   :  { %v7325_v63 = vadd.f32 %v2951_v9, %v2879_v43  ;;  %v7327_v37 = vadd.f32 %v3097_v14, %v3025_v32 }
 0x5ff   :  { %v7329_v28 = vpop.f32.mrf.mxu0  ;;  %v7331_v18 = vpop.f32.mrf.mxu1 }
 0x600   :  { %3380 = vmatmul.bf16.gmra.mxu3 %v6873_v29  ;;  %3526 = vmatmul.bf16.gmra.mxu2 %v6873_v29  ;;  %v3030_v29 = vadd.f32 %v7233_v51, %v7121_v56 }
 0x602   :  { %3327 = vmatmul.bf16.gmra.mxu0 %v6972_v11  ;;  %3473 = vmatmul.bf16.gmra.mxu1 %v6972_v11  ;;  %v2884_v11 = vadd.f32 %v7231_v40, %v7119_v42  ;;  %v3033_v40 = vadd.f32 %v7245_v22, %v7121_v56  ;;  %v5703_v22 = vld [vmem:[#allocation2 + $0x66c] sm:$0xf] }
 0x603   :  { %v2954_v61 = vpop.f32.mrf.mxu3  ;;  %v3100_v43 = vpop.f32.mrf.mxu2 }
 0x604   :  { %v7341_v32 = vadd.f32 %v2954_v61, %v2882_v48  ;;  %v7343_v12 = vadd.f32 %v3100_v43, %v3028_v35  ;;  %v5700_v35 = vld [vmem:[#allocation2 + $0x64c] sm:$0xf0]  ;;  %v2887_v43 = vadd.f32 %v7243_v16, %v7119_v42 }
 0x605   :  { %v5413_v62 = vor.u32 %v5700_v35, %v5412_v38  ;;  %v5684_v16 = vld [vmem:[#allocation2 + $0x5cc] sm:$0xf0] }
 0x607   :  { %v7345_v39 = vpop.f32.mrf.mxu0  ;;  %v7347_v9 = vpop.f32.mrf.mxu1  ;;  %3932 = vmatpush.bf16.msrb.mxu3 %v5413_v62 }
 0x60b   :  { %v2956_v31 = vpop.f32.mrf.mxu3  ;;  %v3102_v34 = vpop.f32.mrf.mxu2 }
 0x60c   :  { %v7353_v14 = vadd.f32 %v2956_v31, %v2884_v11  ;;  %v7355_v48 = vadd.f32 %v3102_v34, %v3030_v29  ;;  %v5348_v34 = vld [vmem:[#allocation2 + $0x5c8] sm:$0xf] }
 0x60d   :  { %v5349_v38 = vor.u32 %v5684_v16, %v5348_v34  ;;  %v5687_v34 = vld [vmem:[#allocation2 + $0x5ec] sm:$0xf]  ;;  %v5366_v16 = vld [vmem:[#allocation2 + $0x5f0] sm:$0xf0] }
 0x60e   :  { %8219 = vst [vmem:[#allocation17_spill] sm:$0xff] %v7353_v14  ;;  %v5430_v14 = vld [vmem:[#allocation2 + $0x670] sm:$0xf0] }
 0x60f   :  { %8220 = vst [vmem:[#allocation9_spill] sm:$0xff] %v7355_v48  ;;  %v7357_v61 = vpop.f32.mrf.mxu0  ;;  %v7359_v8 = vpop.f32.mrf.mxu1  ;;  %3859 = vmatpush.bf16.msrb.mxu0 %v5349_v38  ;;  %v5433_v62 = vor.u32 %v5703_v22, %v5430_v14  ;;  %v3038_v14 = vadd.f32 %v7275_v20, %v7121_v56  ;;  %v5404_v20 = vld [vmem:[#allocation2 + $0x638] sm:$0xf] }
 0x610   :  { %3385 = vmatmul.bf16.gmra.mxu3 %v6896_v27  ;;  %3531 = vmatmul.bf16.gmra.mxu2 %v6896_v27  ;;  %v3035_v27 = vadd.f32 %v7263_v33, %v7121_v56 }
 0x611   :  { %4076 = vmatpush.bf16.msra.mxu2 %v5433_v62 }
 0x612   :  { %3332 = vmatmul.bf16.gmra.mxu0 %v6996_v47  ;;  %3478 = vmatmul.bf16.gmra.mxu1 %v6996_v47  ;;  %v2889_v47 = vadd.f32 %v7261_v60, %v7119_v42 }
 0x613   :  { %v2959_v51 = vpop.f32.mrf.mxu3  ;;  %v3105_v11 = vpop.f32.mrf.mxu2 }
 0x614   :  { %v7369_v29 = vadd.f32 %v2959_v51, %v2887_v43  ;;  %v7371_v31 = vadd.f32 %v3105_v11, %v3033_v40 }
 0x616   :  { %8221 = vst [vmem:[#allocation11_spill] sm:$0xff] %v7371_v31  ;;  %v2892_v31 = vadd.f32 %v7273_v46, %v7119_v42 }
 0x617   :  { %v2908_v35 = vpop.f32.mrf.mxu0  ;;  %v3054_v48 = vpop.f32.mrf.mxu1 }
 0x618   :  { %v5369_v48 = vor.u32 %v5687_v34, %v5366_v16 }
 0x61a   :  { %4003 = vmatpush.bf16.msra.mxu1 %v5369_v48 }
 0x61b   :  { %v2961_v43 = vpop.f32.mrf.mxu3  ;;  %v3107_v40 = vpop.f32.mrf.mxu2 }
 0x61c   :  { %v7377_v51 = vadd.f32 %v2961_v43, %v2889_v47  ;;  %v7379_v11 = vadd.f32 %v3107_v40, %v3035_v27  ;;  %v3040_v40 = vadd.f32 %v7291_v54, %v7121_v56 }
 0x61f   :  { %v3298_v38 = vpop.f32.mrf.mxu0  ;;  %v3444_v35 = vpop.f32.mrf.mxu1 }
 0x620   :  { %v7384_v33 = vadd.f32 %v3298_v38, %v7137_v45  ;;  %v7387_v60 = vadd.f32 %v3444_v35, %v7139_v15  ;;  %3390 = vmatmul.bf16.gmra.mxu3 %v6920_v3  ;;  %3536 = vmatmul.bf16.gmra.mxu2 %v6920_v3  ;;  %v5698_v3 = vld [vmem:[#allocation2 + $0x63c] sm:$0xf0] }
 0x621   :  { %v5682_v35 = vld [vmem:[#allocation2 + $0x5bc] sm:$0xf0] }
 0x622   :  { %3337 = vmatmul.bf16.gmra.mxu0 %v7018_v58  ;;  %3483 = vmatmul.bf16.gmra.mxu1 %v7018_v58  ;;  %v5405_v58 = vor.u32 %v5698_v3, %v5404_v20 }
 0x623   :  { %v2964_v22 = vpop.f32.mrf.mxu3  ;;  %v3110_v45 = vpop.f32.mrf.mxu2 }
 0x624   :  { %v7395_v46 = vadd.f32 %v2964_v22, %v2892_v31  ;;  %v7397_v27 = vadd.f32 %v3110_v45, %v3038_v14  ;;  %v2894_v31 = vadd.f32 %v7289_v36, %v7119_v42  ;;  %3933 = vmatpush.bf16.msrb.mxu3 %v5405_v58  ;;  %v2897_v45 = vadd.f32 %v7301_v55, %v7119_v42  ;;  %v5422_v55 = vld [vmem:[#allocation2 + $0x660] sm:$0xf0]  ;;  %v5685_v58 = vld [vmem:[#allocation2 + $0x5dc] sm:$0xf] }
 0x627   :  { %v3300_v15 = vpop.f32.mrf.mxu0  ;;  %v3446_v62 = vpop.f32.mrf.mxu1 }
 0x628   :  { %v7400_v47 = vadd.f32 %v3300_v15, %v7149_v57  ;;  %v7403_v43 = vadd.f32 %v3446_v62, %v7151_v44  ;;  %v5340_v57 = vld [vmem:[#allocation2 + $0x5b8] sm:$0xf]  ;;  %v3043_v15 = vadd.f32 %v7303_v50, %v7121_v56  ;;  %v5701_v62 = vld [vmem:[#allocation2 + $0x65c] sm:$0xf] }
 0x629   :  { %v5341_v44 = vor.u32 %v5682_v35, %v5340_v57  ;;  %v3045_v57 = vadd.f32 %v7319_v24, %v7121_v56  ;;  %v2899_v35 = vadd.f32 %v7317_v4, %v7119_v42  ;;  %v3048_v4 = vadd.f32 %v7331_v18, %v7121_v56  ;;  %v5332_v18 = vld [vmem:[#allocation2 + $0x5a8] sm:$0xf] }
 0x62b   :  { %v2966_v34 = vpop.f32.mrf.mxu3  ;;  %v3112_v48 = vpop.f32.mrf.mxu2  ;;  %3860 = vmatpush.bf16.msrb.mxu0 %v5341_v44 }
 0x62c   :  { %v7409_v16 = vadd.f32 %v2966_v34, %v2894_v31  ;;  %v7411_v38 = vadd.f32 %v3112_v48, %v3040_v40  ;;  %v5358_v31 = vld [vmem:[#allocation2 + $0x5e0] sm:$0xf0] }
 0x62d   :  { %v5361_v34 = vor.u32 %v5685_v58, %v5358_v31  ;;  %v5342_v58 = vld [vmem:[#allocation2 + $0x5c0] sm:$0xf0] }
 0x62f   :  { %v3303_v14 = vpop.f32.mrf.mxu0  ;;  %v3449_v22 = vpop.f32.mrf.mxu1  ;;  %4004 = vmatpush.bf16.msra.mxu1 %v5361_v34 }
 0x630   :  { %v7416_v54 = vadd.f32 %v3303_v14, %v7167_v1  ;;  %v7419_v36 = vadd.f32 %v3449_v22, %v7169_v19  ;;  %3395 = vmatmul.bf16.gmra.mxu3 %v6946_v23  ;;  %3541 = vmatmul.bf16.gmra.mxu2 %v6946_v23  ;;  %v5425_v1 = vor.u32 %v5701_v62, %v5422_v55  ;;  %v5350_v62 = vld [vmem:[#allocation2 + $0x5d0] sm:$0xf0] }
 0x632   :  { %3342 = vmatmul.bf16.gmra.mxu0 %v7044_v21  ;;  %3488 = vmatmul.bf16.gmra.mxu1 %v7044_v21 }
 0x633   :  { %v2969_v20 = vpop.f32.mrf.mxu3  ;;  %v3115_v19 = vpop.f32.mrf.mxu2  ;;  %4077 = vmatpush.bf16.msra.mxu2 %v5425_v1 }
 0x634   :  { %v7427_v3 = vadd.f32 %v2969_v20, %v2897_v45  ;;  %v7429_v40 = vadd.f32 %v3115_v19, %v3043_v15  ;;  %v5683_v15 = vld [vmem:[#allocation2 + $0x5cc] sm:$0xf]  ;;  %v5681_v19 = vld [vmem:[#allocation2 + $0x5bc] sm:$0xf] }
 0x635   :  { %v5345_v31 = vor.u32 %v5681_v19, %v5342_v58  ;;  %v5677_v19 = vld [vmem:[#allocation2 + $0x59c] sm:$0xf]  ;;  %v2904_v58 = vadd.f32 %v7345_v39, %v7119_v42  ;;  %v2907_v39 = vadd.f32 %v7357_v61, %v7119_v42 }
 0x637   :  { %v3305_v50 = vpop.f32.mrf.mxu0  ;;  %v3451_v48 = vpop.f32.mrf.mxu1 }
 0x638   :  { %v7432_v23 = vadd.f32 %v3305_v50, %v7179_v49  ;;  %v7435_v21 = vadd.f32 %v3451_v48, %v7181_v52  ;;  %v5353_v49 = vor.u32 %v5683_v15, %v5350_v62  ;;  %v2902_v52 = vadd.f32 %v7329_v28, %v7119_v42  ;;  %v5396_v28 = vld [vmem:[#allocation2 + $0x628] sm:$0xf] }
 0x63a   :  { %4005 = vmatpush.bf16.msra.mxu1 %v5353_v49 }
 0x63b   :  { %v2971_v44 = vpop.f32.mrf.mxu3  ;;  %v3117_v22 = vpop.f32.mrf.mxu2 }
 0x63c   :  { %v7441_v14 = vadd.f32 %v2971_v44, %v2899_v35  ;;  %v7443_v45 = vadd.f32 %v3117_v22, %v3045_v57  ;;  %v5679_v35 = vld [vmem:[#allocation2 + $0x5ac] sm:$0xf]  ;;  %v5334_v22 = vld [vmem:[#allocation2 + $0x5b0] sm:$0xf0] }
 0x63e   :  { %4006 = vmatpush.bf16.msra.mxu1 %v5345_v31 }
 0x63f   :  { %v3308_v55 = vpop.f32.mrf.mxu0  ;;  %v3454_v20 = vpop.f32.mrf.mxu1 }
 0x640   :  { %v7448_v1 = vadd.f32 %v3308_v55, %v7197_v0  ;;  %v7451_v24 = vadd.f32 %v3454_v20, %v7199_v7  ;;  %3400 = vmatmul.bf16.gmra.mxu3 %v6974_v30  ;;  %3546 = vmatmul.bf16.gmra.mxu2 %v6974_v30  ;;  %v5696_v0 = vld [vmem:[#allocation2 + $0x62c] sm:$0xf0]  ;;  %v3050_v20 = vadd.f32 %v7347_v9, %v7121_v56 }
 0x641   :  { %v5397_v7 = vor.u32 %v5696_v0, %v5396_v28  ;;  %v5680_v30 = vld [vmem:[#allocation2 + $0x5ac] sm:$0xf0]  ;;  %v5326_v0 = vld [vmem:[#allocation2 + $0x5a0] sm:$0xf0] }
 0x642   :  { %3347 = vmatmul.bf16.gmra.mxu0 %v7070_v53  ;;  %3493 = vmatmul.bf16.gmra.mxu1 %v7070_v53  ;;  %v5333_v44 = vor.u32 %v5680_v30, %v5332_v18  ;;  %v5337_v53 = vor.u32 %v5679_v35, %v5334_v22  ;;  %v5676_v9 = vld [vmem:[#allocation2 + $0x58c] sm:$0xf0]  ;;  %v5675_v18 = vld [vmem:[#allocation2 + $0x58c] sm:$0xf]  ;;  %v5318_v35 = vld [vmem:[#allocation2 + $0x590] sm:$0xf0] }
 0x643   :  { %v2974_v34 = vpop.f32.mrf.mxu3  ;;  %v3120_v48 = vpop.f32.mrf.mxu2  ;;  %3934 = vmatpush.bf16.msrb.mxu3 %v5397_v7 }
 0x644   :  { %v7459_v50 = vadd.f32 %v2974_v34, %v2902_v52  ;;  %v7461_v57 = vadd.f32 %v3120_v48, %v3048_v4  ;;  %3861 = vmatpush.bf16.msrb.mxu0 %v5333_v44  ;;  %4007 = vmatpush.bf16.msra.mxu1 %v5337_v53  ;;  %v5324_v52 = vld [vmem:[#allocation2 + $0x598] sm:$0xf]  ;;  %v5678_v4 = vld [vmem:[#allocation2 + $0x59c] sm:$0xf0]  ;;  %v5329_v34 = vor.u32 %v5677_v19, %v5326_v0  ;;  %v5316_v48 = vld [vmem:[#allocation2 + $0x588] sm:$0xf] }
 0x645   :  { %v5325_v28 = vor.u32 %v5678_v4, %v5324_v52  ;;  %v5317_v30 = vor.u32 %v5676_v9, %v5316_v48  ;;  %v5699_v52 = vld [vmem:[#allocation2 + $0x64c] sm:$0xf]  ;;  %v5414_v4 = vld [vmem:[#allocation2 + $0x650] sm:$0xf0]  ;;  %v8222_v0 = vld [vmem:[#allocation8_spill] sm:$0xff] }
 0x646   :  { %v5417_v42 = vor.u32 %v5699_v52, %v5414_v4  ;;  %v5388_v48 = vld [vmem:[#allocation2 + $0x618] sm:$0xf]  ;;  %v5694_v9 = vld [vmem:[#allocation2 + $0x61c] sm:$0xf0] }
 0x647   :  { %v3310_v15 = vpop.f32.mrf.mxu0  ;;  %v3456_v62 = vpop.f32.mrf.mxu1 }
 0x648   :  { %v7464_v49 = vadd.f32 %v3310_v15, %v7209_v2  ;;  %v7467_v55 = vadd.f32 %v3456_v62, %v7211_v26  ;;  %3862 = vmatpush.bf16.msrb.mxu0 %v5325_v28  ;;  %4008 = vmatpush.bf16.msra.mxu1 %v5329_v34  ;;  %v5321_v15 = vor.u32 %v5675_v18, %v5318_v35 }
 0x649   :  { %4078 = vmatpush.bf16.msra.mxu2 %v5417_v42  ;;  %v5697_v42 = vld [vmem:[#allocation2 + $0x63c] sm:$0xf] }
 0x64b   :  { %v2976_v31 = vpop.f32.mrf.mxu3  ;;  %v3122_v7 = vpop.f32.mrf.mxu2 }
 0x64c   :  { %v7473_v2 = vadd.f32 %v2976_v31, %v2904_v58  ;;  %v7475_v26 = vadd.f32 %v3122_v7, %v3050_v20  ;;  %3863 = vmatpush.bf16.msrb.mxu0 %v5317_v30  ;;  %v3053_v20 = vadd.f32 %v7359_v8, %v7121_v56  ;;  %4009 = vmatpush.bf16.msra.mxu1 %v5321_v15  ;;  %v2602_v31 = vmax.f32 %v8222_v0, 0.0  ;;  %v8223_v30 = vld [vmem:[#allocation10_spill] sm:$0xff] }
 0x64d   :  { %v5389_v15 = vor.u32 %v5694_v9, %v5388_v48 }
 0x64e   :  { %v2628_v18 = vpack.c.bf16 %v2602_v31, %v2602_v31 }
 0x64f   :  { %v3313_v44 = vpop.f32.mrf.mxu0  ;;  %v3459_v22 = vpop.f32.mrf.mxu1  ;;  %3935 = vmatpush.bf16.msrb.mxu3 %v5389_v15  ;;  %v8227_v15 = vld [vmem:[#allocation22_spill] sm:$0xff] }
 0x650   :  { %v7480_v62 = vadd.f32 %v3313_v44, %v7227_v5  ;;  %v7483_v53 = vadd.f32 %v3459_v22, %v7229_v13  ;;  %3405 = vmatmul.bf16.gmra.mxu3 %v7000_v17  ;;  %3551 = vmatmul.bf16.gmra.mxu2 %v7000_v17  ;;  %v8224_v44 = vld [vmem:[#allocation21_spill] sm:$0xff] }
 0x652   :  { %3352 = vmatmul.bf16.gmra.mxu0 %v7098_v25  ;;  %3498 = vmatmul.bf16.gmra.mxu1 %v7098_v25 }
 0x653   :  { %v2979_v5 = vpop.f32.mrf.mxu3  ;;  %v3125_v13 = vpop.f32.mrf.mxu2 }
 0x654   :  { %v7491_v61 = vadd.f32 %v2979_v5, %v2907_v39  ;;  %v7493_v19 = vadd.f32 %v3125_v13, %v3053_v20  ;;  %v5406_v5 = vld [vmem:[#allocation2 + $0x640] sm:$0xf0] }
 0x657   :  { %v3315_v58 = vpop.f32.mrf.mxu0  ;;  %v3461_v28 = vpop.f32.mrf.mxu1 }
 0x658   :  { %v7496_v56 = vadd.f32 %v3315_v58, %v7239_v41  ;;  %v7499_v17 = vadd.f32 %v3461_v28, %v7241_v6  ;;  %v8225_v41 = vld [vmem:[#allocation5_spill] sm:$0xff]  ;;  %v8226_v58 = vld [vmem:[#allocation12_spill] sm:$0xff] }
 0x65b   :  { %v2981_v8 = vpop.f32.mrf.mxu3  ;;  %v3127_v25 = vpop.f32.mrf.mxu2 }
 0x65c   :  { %v5409_v8 = vor.u32 %v5697_v42, %v5406_v5  ;;  %v5380_v42 = vld [vmem:[#allocation2 + $0x608] sm:$0xf]  ;;  %v8229_v5 = vld [vmem:[#allocation14_spill] sm:$0xff] }
 0x65e   :  { %4079 = vmatpush.bf16.msra.mxu2 %v5409_v8  ;;  %v8230_v8 = vld [vmem:[#allocation23_spill] sm:$0xff] }
 0x65f   :  { %v3318_v34 = vpop.f32.mrf.mxu0  ;;  %v3464_v7 = vpop.f32.mrf.mxu1 }
 0x660   :  { %v7503_v35 = vadd.f32 %v3318_v34, %v8223_v30  ;;  %v7506_v22 = vadd.f32 %v3464_v7, %v8224_v44  ;;  %3410 = vmatmul.bf16.gmra.mxu3 %v8225_v41  ;;  %3556 = vmatmul.bf16.gmra.mxu2 %v8225_v41 }
 0x662   :  { %3357 = vmatmul.bf16.gmra.mxu0 %v2628_v18  ;;  %3503 = vmatmul.bf16.gmra.mxu1 %v2628_v18 }
 0x663   :  { %v3371_v6 = vpop.f32.mrf.mxu3  ;;  %v3517_v39 = vpop.f32.mrf.mxu2 }
 0x664   :  { %v3518_v20 = vadd.f32 %v3517_v39, %v7387_v60  ;;  %v3372_v0 = vadd.f32 %v3371_v6, %v7384_v33  ;;  %v8228_v33 = vld [vmem:[#allocation18_spill] sm:$0xff] }
 0x666   :  { %v3581_v7 = vmax.f32 %v3372_v0, 0.0  ;;  %v3582_v9 = vmax.f32 %v3518_v20, 0.0 }
 0x667   :  { %v3320_v52 = vpop.f32.mrf.mxu0  ;;  %v3466_v4 = vpop.f32.mrf.mxu1 }
 0x668   :  { %v7512_v13 = vadd.f32 %v3320_v52, %v7269_v10  ;;  %v7515_v28 = vadd.f32 %v3466_v4, %v8226_v58 }
 0x66b   :  { %v3373_v31 = vpop.f32.mrf.mxu3  ;;  %v3519_v34 = vpop.f32.mrf.mxu2 }
 0x66c   :  { %v3374_v25 = vadd.f32 %v3373_v31, %v7400_v47  ;;  %v3520_v60 = vadd.f32 %v3519_v34, %v7403_v43 }
 0x66e   :  { %v3583_v48 = vmax.f32 %v3374_v25, 0.0  ;;  %v3584_v18 = vmax.f32 %v3520_v60, 0.0 }
 0x66f   :  { %v3323_v30 = vpop.f32.mrf.mxu0  ;;  %v3469_v10 = vpop.f32.mrf.mxu1 }
 0x670   :  { %v3631_v44 = vpack.c.bf16 %v3583_v48, %v3581_v7  ;;  %v7521_v41 = vadd.f32 %v3323_v30, %v7285_v59  ;;  %v7524_v39 = vadd.f32 %v3469_v10, %v8227_v15  ;;  %3415 = vmatmul.bf16.gmra.mxu3 %v8228_v33  ;;  %v7527_v6 = vpack.c.bf16 %v3584_v18, %v3582_v9  ;;  %v5692_v59 = vld [vmem:[#allocation2 + $0x60c] sm:$0xf0]  ;;  %v8231_v15 = vld [vmem:[#allocation16_spill] sm:$0xff] }
 0x671   :  { %3561 = vmatmul.bf16.gmra.mxu2 %v8228_v33  ;;  %v5381_v31 = vor.u32 %v5692_v59, %v5380_v42 }
 0x672   :  { %3864 = vmatmul.bf16.vlgmr.msrb.gmra.mxu0 %v3631_v44  ;;  %4010 = vmatmul.bf16.vlgmr.msra.gmra.mxu1 %v3631_v44 }
 0x673   :  { %v3376_v47 = vpop.f32.mrf.mxu3  ;;  %v3522_v43 = vpop.f32.mrf.mxu2  ;;  %3936 = vmatpush.bf16.msrb.mxu3 %v5381_v31 }
 0x674   :  { %v3523_v20 = vadd.f32 %v3522_v43, %v7419_v36  ;;  %v3377_v25 = vadd.f32 %v3376_v47, %v7416_v54  ;;  %v8232_v43 = vld [vmem:[#allocation7_spill] sm:$0xff]  ;;  %v8233_v54 = vld [vmem:[#allocation6_spill] sm:$0xff] }
 0x676   :  { %v3585_v48 = vmax.f32 %v3377_v25, 0.0  ;;  %v3586_v18 = vmax.f32 %v3523_v20, 0.0  ;;  %v5693_v25 = vld [vmem:[#allocation2 + $0x61c] sm:$0xf] }
 0x677   :  { %v3325_v52 = vpop.f32.mrf.mxu0  ;;  %v3471_v4 = vpop.f32.mrf.mxu1 }
 0x678   :  { %v7532_v58 = vadd.f32 %v3325_v52, %v8229_v5  ;;  %v7535_v0 = vadd.f32 %v3471_v4, %v8230_v8  ;;  %v5398_v4 = vld [vmem:[#allocation2 + $0x630] sm:$0xf0] }
 0x67b   :  { %v3378_v34 = vpop.f32.mrf.mxu3  ;;  %v3524_v7 = vpop.f32.mrf.mxu2 }
 0x67c   :  { %v3379_v60 = vadd.f32 %v3378_v34, %v7432_v23  ;;  %v3525_v36 = vadd.f32 %v3524_v7, %v7435_v21  ;;  %v5695_v23 = vld [vmem:[#allocation2 + $0x62c] sm:$0xf]  ;;  %v5390_v34 = vld [vmem:[#allocation2 + $0x620] sm:$0xf0] }
 0x67d   :  { %v5401_v20 = vor.u32 %v5695_v23, %v5398_v4 }
 0x67e   :  { %v3587_v9 = vmax.f32 %v3379_v60, 0.0  ;;  %v3588_v30 = vmax.f32 %v3525_v36, 0.0  ;;  %v5393_v36 = vor.u32 %v5693_v25, %v5390_v34  ;;  %v5472_v34 = vld [vmem:[#allocation2 + $0x6f8] sm:$0xf] }
 0x67f   :  { %v3328_v10 = vpop.f32.mrf.mxu0  ;;  %v3474_v44 = vpop.f32.mrf.mxu1  ;;  %4080 = vmatpush.bf16.msra.mxu2 %v5401_v20  ;;  %v8234_v20 = vld [vmem:[#allocation19_spill] sm:$0xff] }
 0x680   :  { %v7541_v33 = vadd.f32 %v3328_v10, %v8231_v15  ;;  %v7544_v52 = vadd.f32 %v3474_v44, %v8232_v43  ;;  %3420 = vmatmul.bf16.gmra.mxu3 %v8233_v54  ;;  %v3633_v47 = vpack.c.bf16 %v3587_v9, %v3585_v48  ;;  %v7548_v21 = vpack.c.bf16 %v3588_v30, %v3586_v18  ;;  %v5691_v18 = vld [vmem:[#allocation2 + $0x60c] sm:$0xf]  ;;  %v5382_v30 = vld [vmem:[#allocation2 + $0x610] sm:$0xf0] }
 0x681   :  { %3566 = vmatmul.bf16.gmra.mxu2 %v8233_v54  ;;  %v5385_v44 = vor.u32 %v5691_v18, %v5382_v30  ;;  %v8236_v18 = vld [vmem:[#allocation9_spill] sm:$0xff] }
 0x682   :  { %3869 = vmatmul.bf16.gmra.mxu0 %v3633_v47  ;;  %4015 = vmatmul.bf16.gmra.mxu1 %v3633_v47 }
 0x683   :  { %v3381_v42 = vpop.f32.mrf.mxu3  ;;  %v3527_v59 = vpop.f32.mrf.mxu2  ;;  %4081 = vmatpush.bf16.msra.mxu2 %v5393_v36  ;;  %v5714_v36 = vld [vmem:[#allocation2 + $0x6fc] sm:$0xf0] }
 0x684   :  { %v3528_v5 = vadd.f32 %v3527_v59, %v7451_v24  ;;  %v3382_v48 = vadd.f32 %v3381_v42, %v7448_v1  ;;  %v5504_v42 = vld [vmem:[#allocation2 + $0x778] sm:$0xf] }
 0x686   :  { %v3589_v43 = vmax.f32 %v3382_v48, 0.0  ;;  %v8235_v48 = vld [vmem:[#allocation17_spill] sm:$0xff] }
 0x687   :  { %v3330_v8 = vpop.f32.mrf.mxu0  ;;  %v3476_v31 = vpop.f32.mrf.mxu1  ;;  %4082 = vmatpush.bf16.msra.mxu2 %v5385_v44 }
 0x688   :  { %v7552_v60 = vadd.f32 %v3330_v8, %v7325_v63  ;;  %v7555_v7 = vadd.f32 %v3476_v31, %v7327_v37  ;;  %v3590_v63 = vmax.f32 %v3528_v5, 0.0 }
 0x68b   :  { %v3383_v9 = vpop.f32.mrf.mxu3  ;;  %v3529_v24 = vpop.f32.mrf.mxu2 }
 0x68c   :  { %v3384_v10 = vadd.f32 %v3383_v9, %v7464_v49  ;;  %v3530_v15 = vadd.f32 %v3529_v24, %v7467_v55  ;;  %v5722_v55 = vld [vmem:[#allocation2 + $0x77c] sm:$0xf0] }
 0x68d   :  { %v5505_v5 = vor.u32 %v5722_v55, %v5504_v42  ;;  %v8237_v24 = vld [vmem:[#allocation20_spill] sm:$0xff] }
 0x68e   :  { %v3591_v54 = vmax.f32 %v3384_v10, 0.0  ;;  %v3592_v47 = vmax.f32 %v3530_v15, 0.0  ;;  %v5473_v10 = vor.u32 %v5714_v36, %v5472_v34  ;;  %v2603_v44 = vmax.f32 %v8237_v24, 0.0 }
 0x68f   :  { %v3333_v37 = vpop.f32.mrf.mxu0  ;;  %v3479_v23 = vpop.f32.mrf.mxu1  ;;  %4426 = vmatpush.bf16.msra.mxu3 %v5505_v5 }
 0x690   :  { %v7561_v4 = vadd.f32 %v3333_v37, %v7341_v32  ;;  %v7564_v1 = vadd.f32 %v3479_v23, %v7343_v12  ;;  %3425 = vmatmul.bf16.gmra.mxu3 %v8234_v20  ;;  %v3635_v49 = vpack.c.bf16 %v3591_v54, %v3589_v43  ;;  %v7568_v59 = vpack.c.bf16 %v3592_v47, %v3590_v63 }
 0x691   :  { %3571 = vmatmul.bf16.gmra.mxu2 %v8234_v20  ;;  %4353 = vmatpush.bf16.msra.mxu0 %v5473_v10  ;;  %v2629_v47 = vpack.c.bf16 %v2603_v44, %v2603_v44 }
 0x692   :  { %3874 = vmatmul.bf16.gmra.mxu0 %v3635_v49  ;;  %4020 = vmatmul.bf16.gmra.mxu1 %v3635_v49 }
 0x693   :  { %v3386_v8 = vpop.f32.mrf.mxu3  ;;  %v3532_v31 = vpop.f32.mrf.mxu2 }
 0x694   :  { %v3533_v32 = vadd.f32 %v3532_v31, %v7483_v53  ;;  %v3387_v15 = vadd.f32 %v3386_v8, %v7480_v62  ;;  %v8238_v31 = vld [vmem:[#allocation11_spill] sm:$0xff] }
 0x696   :  { %v3593_v37 = vmax.f32 %v3387_v15, 0.0  ;;  %v3594_v20 = vmax.f32 %v3533_v32, 0.0 }
 0x697   :  { %v3335_v25 = vpop.f32.mrf.mxu0  ;;  %v3481_v12 = vpop.f32.mrf.mxu1 }
 0x698   :  { %v7572_v9 = vadd.f32 %v3335_v25, %v8235_v48  ;;  %v7575_v30 = vadd.f32 %v3481_v12, %v8236_v18  ;;  %v5500_v48 = vld [vmem:[#allocation2 + $0x768] sm:$0xf]  ;;  %v5721_v18 = vld [vmem:[#allocation2 + $0x76c] sm:$0xf0] }
 0x699   :  { %v5501_v10 = vor.u32 %v5721_v18, %v5500_v48 }
 0x69b   :  { %v3388_v43 = vpop.f32.mrf.mxu3  ;;  %v3534_v53 = vpop.f32.mrf.mxu2  ;;  %4427 = vmatpush.bf16.msra.mxu3 %v5501_v10 }
 0x69c   :  { %v3389_v54 = vadd.f32 %v3388_v43, %v7496_v56  ;;  %v3535_v63 = vadd.f32 %v3534_v53, %v7499_v17 }
 0x69e   :  { %v3595_v23 = vmax.f32 %v3389_v54, 0.0  ;;  %v3596_v49 = vmax.f32 %v3535_v63, 0.0 }
 0x69f   :  { %v3338_v42 = vpop.f32.mrf.mxu0  ;;  %v3484_v55 = vpop.f32.mrf.mxu1 }
 0x6a0   :  { %v7582_v5 = vadd.f32 %v3338_v42, %v7369_v29  ;;  %v7585_v25 = vadd.f32 %v3484_v55, %v8238_v31  ;;  %3430 = vmatmul.bf16.gmra.mxu3 %v2629_v47  ;;  %v3637_v62 = vpack.c.bf16 %v3595_v23, %v3593_v37  ;;  %v7587_v56 = vpack.c.bf16 %v3596_v49, %v3594_v20  ;;  %v5713_v20 = vld [vmem:[#allocation2 + $0x6ec] sm:$0xf0] }
 0x6a1   :  { %3576 = vmatmul.bf16.gmra.mxu2 %v2629_v47 }
 0x6a2   :  { %3879 = vmatmul.bf16.gmra.mxu0 %v3637_v62  ;;  %4025 = vmatmul.bf16.gmra.mxu1 %v3637_v62 }
 0x6a3   :  { %v3391_v17 = vpop.f32.mrf.mxu3  ;;  %v3537_v8 = vpop.f32.mrf.mxu2 }
 0x6a4   :  { %v3538_v32 = vadd.f32 %v3537_v8, %v7506_v22  ;;  %v3392_v24 = vadd.f32 %v3391_v17, %v7503_v35 }
 0x6a6   :  { %v3597_v54 = vmax.f32 %v3392_v24, 0.0  ;;  %v3598_v63 = vmax.f32 %v3538_v32, 0.0 }
 0x6a7   :  { %v3340_v12 = vpop.f32.mrf.mxu0  ;;  %v3486_v34 = vpop.f32.mrf.mxu1 }
 0x6a8   :  { %v7591_v36 = vadd.f32 %v3340_v12, %v7377_v51  ;;  %v7594_v29 = vadd.f32 %v3486_v34, %v7379_v11 }
 0x6ab   :  { %v3393_v44 = vpop.f32.mrf.mxu3  ;;  %v3539_v43 = vpop.f32.mrf.mxu2 }
 0x6ac   :  { %v3394_v15 = vadd.f32 %v3393_v44, %v7512_v13  ;;  %v3540_v22 = vadd.f32 %v3539_v43, %v7515_v28  ;;  %v5468_v13 = vld [vmem:[#allocation2 + $0x6e8] sm:$0xf] }
 0x6ad   :  { %v5469_v49 = vor.u32 %v5713_v20, %v5468_v13 }
 0x6ae   :  { %v3599_v53 = vmax.f32 %v3394_v15, 0.0  ;;  %v3600_v51 = vmax.f32 %v3540_v22, 0.0 }
 0x6af   :  { %v3343_v47 = vpop.f32.mrf.mxu0  ;;  %v3489_v37 = vpop.f32.mrf.mxu1  ;;  %4354 = vmatpush.bf16.msra.mxu0 %v5469_v49 }
 0x6b0   :  { %v7600_v11 = vadd.f32 %v3343_v47, %v7395_v46  ;;  %v7603_v23 = vadd.f32 %v3489_v37, %v7397_v27  ;;  %3937 = vmatmul.bf16.vlgmr.msrb.gmra.mxu3 %v7527_v6  ;;  %v3639_v35 = vpack.c.bf16 %v3599_v53, %v3597_v54  ;;  %v7607_v28 = vpack.c.bf16 %v3600_v51, %v3598_v63  ;;  %v5720_v53 = vld [vmem:[#allocation2 + $0x75c] sm:$0xf0] }
 0x6b1   :  { %4083 = vmatmul.bf16.vlgmr.msra.gmra.mxu2 %v7527_v6  ;;  %v5712_v47 = vld [vmem:[#allocation2 + $0x6dc] sm:$0xf0] }
 0x6b2   :  { %3884 = vmatmul.bf16.gmra.mxu0 %v3639_v35  ;;  %4030 = vmatmul.bf16.gmra.mxu1 %v3639_v35 }
 0x6b3   :  { %v3396_v42 = vpop.f32.mrf.mxu3  ;;  %v3542_v55 = vpop.f32.mrf.mxu2 }
 0x6b4   :  { %v3543_v46 = vadd.f32 %v3542_v55, %v7524_v39  ;;  %v3397_v6 = vadd.f32 %v3396_v42, %v7521_v41 }
 0x6b6   :  { %v3601_v48 = vmax.f32 %v3397_v6, 0.0  ;;  %v3602_v10 = vmax.f32 %v3543_v46, 0.0 }
 0x6b7   :  { %v3345_v31 = vpop.f32.mrf.mxu0  ;;  %v3491_v27 = vpop.f32.mrf.mxu1 }
 0x6b8   :  { %v7611_v62 = vadd.f32 %v3345_v31, %v7409_v16  ;;  %v7614_v17 = vadd.f32 %v3491_v27, %v7411_v38 }
 0x6bb   :  { %v3398_v8 = vpop.f32.mrf.mxu3  ;;  %v3544_v12 = vpop.f32.mrf.mxu2 }
 0x6bc   :  { %v3399_v32 = vadd.f32 %v3398_v8, %v7532_v58  ;;  %v3545_v34 = vadd.f32 %v3544_v12, %v7535_v0 }
 0x6be   :  { %v3603_v18 = vmax.f32 %v3399_v32, 0.0  ;;  %v3604_v39 = vmax.f32 %v3545_v34, 0.0 }
 0x6bf   :  { %v3348_v24 = vpop.f32.mrf.mxu0  ;;  %v3494_v44 = vpop.f32.mrf.mxu1 }
 0x6c0   :  { %v7620_v16 = vadd.f32 %v3348_v24, %v7427_v3  ;;  %v7623_v38 = vadd.f32 %v3494_v44, %v7429_v40  ;;  %3942 = vmatmul.bf16.gmra.mxu3 %v7548_v21  ;;  %v3641_v41 = vpack.c.bf16 %v3603_v18, %v3601_v48  ;;  %v7627_v58 = vpack.c.bf16 %v3604_v39, %v3602_v10  ;;  %v5496_v3 = vld [vmem:[#allocation2 + $0x758] sm:$0xf] }
 0x6c1   :  { %4088 = vmatmul.bf16.gmra.mxu2 %v7548_v21  ;;  %v5497_v51 = vor.u32 %v5720_v53, %v5496_v3  ;;  %v5464_v21 = vld [vmem:[#allocation2 + $0x6d8] sm:$0xf] }
 0x6c2   :  { %3889 = vmatmul.bf16.gmra.mxu0 %v3641_v41  ;;  %4035 = vmatmul.bf16.gmra.mxu1 %v3641_v41  ;;  %v5465_v37 = vor.u32 %v5712_v47, %v5464_v21  ;;  %v5460_v21 = vld [vmem:[#allocation2 + $0x6c8] sm:$0xf] }
 0x6c3   :  { %v3401_v0 = vpop.f32.mrf.mxu3  ;;  %v3547_v15 = vpop.f32.mrf.mxu2  ;;  %4428 = vmatpush.bf16.msra.mxu3 %v5497_v51 }
 0x6c4   :  { %v3548_v43 = vadd.f32 %v3547_v15, %v7544_v52  ;;  %v3402_v35 = vadd.f32 %v3401_v0, %v7541_v33  ;;  %4355 = vmatpush.bf16.msra.mxu0 %v5465_v37 }
 0x6c6   :  { %v3605_v42 = vmax.f32 %v3402_v35, 0.0  ;;  %v3606_v55 = vmax.f32 %v3548_v43, 0.0  ;;  %v5492_v43 = vld [vmem:[#allocation2 + $0x748] sm:$0xf] }
 0x6c7   :  { %v3350_v22 = vpop.f32.mrf.mxu0  ;;  %v3496_v54 = vpop.f32.mrf.mxu1 }
 0x6c8   :  { %v7631_v40 = vadd.f32 %v3350_v22, %v7441_v14  ;;  %v7634_v63 = vadd.f32 %v3496_v54, %v7443_v45 }
 0x6cb   :  { %v3403_v13 = vpop.f32.mrf.mxu3  ;;  %v3549_v20 = vpop.f32.mrf.mxu2 }
 0x6cc   :  { %v3404_v52 = vadd.f32 %v3403_v13, %v7552_v60  ;;  %v3550_v49 = vadd.f32 %v3549_v20, %v7555_v7 }
 0x6ce   :  { %v3607_v14 = vmax.f32 %v3404_v52, 0.0  ;;  %v3608_v46 = vmax.f32 %v3550_v49, 0.0 }
 0x6cf   :  { %v3353_v45 = vpop.f32.mrf.mxu0  ;;  %v3499_v31 = vpop.f32.mrf.mxu1 }
 0x6d0   :  { %v7640_v27 = vadd.f32 %v3353_v45, %v7459_v50  ;;  %v7643_v6 = vadd.f32 %v3499_v31, %v7461_v57  ;;  %3947 = vmatmul.bf16.gmra.mxu3 %v7568_v59  ;;  %v3643_v33 = vpack.c.bf16 %v3607_v14, %v3605_v42  ;;  %v7647_v60 = vpack.c.bf16 %v3608_v46, %v3606_v55 }
 0x6d1   :  { %4093 = vmatmul.bf16.gmra.mxu2 %v7568_v59 }
 0x6d2   :  { %3894 = vmatmul.bf16.gmra.mxu0 %v3643_v33  ;;  %4040 = vmatmul.bf16.gmra.mxu1 %v3643_v33 }
 0x6d3   :  { %v3406_v7 = vpop.f32.mrf.mxu3  ;;  %v3552_v8 = vpop.f32.mrf.mxu2 }
 0x6d4   :  { %v3553_v32 = vadd.f32 %v3552_v8, %v7564_v1  ;;  %v3407_v48 = vadd.f32 %v3406_v7, %v7561_v4  ;;  %v5488_v7 = vld [vmem:[#allocation2 + $0x738] sm:$0xf]  ;;  %v5718_v8 = vld [vmem:[#allocation2 + $0x73c] sm:$0xf0] }
 0x6d6   :  { %v3609_v24 = vmax.f32 %v3407_v48, 0.0  ;;  %v3610_v41 = vmax.f32 %v3553_v32, 0.0  ;;  %v5489_v32 = vor.u32 %v5718_v8, %v5488_v7 }
 0x6d7   :  { %v3355_v12 = vpop.f32.mrf.mxu0  ;;  %v3501_v34 = vpop.f32.mrf.mxu1 }
 0x6d8   :  { %v7651_v50 = vadd.f32 %v3355_v12, %v7473_v2  ;;  %v7654_v57 = vadd.f32 %v3501_v34, %v7475_v26  ;;  %v5719_v2 = vld [vmem:[#allocation2 + $0x74c] sm:$0xf0] }
 0x6db   :  { %v3408_v18 = vpop.f32.mrf.mxu3  ;;  %v3554_v10 = vpop.f32.mrf.mxu2 }
 0x6dc   :  { %v3409_v59 = vadd.f32 %v3408_v18, %v7572_v9  ;;  %v3555_v39 = vadd.f32 %v3554_v10, %v7575_v30  ;;  %v5493_v9 = vor.u32 %v5719_v2, %v5492_v43 }
 0x6de   :  { %v3611_v44 = vmax.f32 %v3409_v59, 0.0  ;;  %v3612_v1 = vmax.f32 %v3555_v39, 0.0  ;;  %4429 = vmatpush.bf16.msra.mxu3 %v5493_v9 }
 0x6df   :  { %v3358_v0 = vpop.f32.mrf.mxu0  ;;  %v3504_v15 = vpop.f32.mrf.mxu1 }
 0x6e0   :  { %v7660_v22 = vadd.f32 %v3358_v0, %v7491_v61  ;;  %v7663_v26 = vadd.f32 %v3504_v15, %v7493_v19  ;;  %3952 = vmatmul.bf16.gmra.mxu3 %v7587_v56  ;;  %v3645_v4 = vpack.c.bf16 %v3611_v44, %v3609_v24  ;;  %v7667_v30 = vpack.c.bf16 %v3612_v1, %v3610_v41  ;;  %v5711_v19 = vld [vmem:[#allocation2 + $0x6cc] sm:$0xf0]  ;;  %v5456_v41 = vld [vmem:[#allocation2 + $0x6b8] sm:$0xf]  ;;  %v5710_v1 = vld [vmem:[#allocation2 + $0x6bc] sm:$0xf0] }
 0x6e1   :  { %4098 = vmatmul.bf16.gmra.mxu2 %v7587_v56  ;;  %v5461_v47 = vor.u32 %v5711_v19, %v5460_v21  ;;  %v5457_v0 = vor.u32 %v5710_v1, %v5456_v41 }
 0x6e2   :  { %3899 = vmatmul.bf16.gmra.mxu0 %v3645_v4  ;;  %4045 = vmatmul.bf16.gmra.mxu1 %v3645_v4 }
 0x6e3   :  { %v3411_v54 = vpop.f32.mrf.mxu3  ;;  %v3557_v3 = vpop.f32.mrf.mxu2  ;;  %4356 = vmatpush.bf16.msra.mxu0 %v5461_v47  ;;  %4430 = vmatpush.bf16.msra.mxu3 %v5489_v32 }
 0x6e4   :  { %v3558_v53 = vadd.f32 %v3557_v3, %v7585_v25  ;;  %v3412_v37 = vadd.f32 %v3411_v54, %v7582_v5 }
 0x6e6   :  { %v3613_v20 = vmax.f32 %v3412_v37, 0.0  ;;  %v3614_v42 = vmax.f32 %v3558_v53, 0.0 }
 0x6e7   :  { %v3360_v61 = vpop.f32.mrf.mxu0  ;;  %v3506_v51 = vpop.f32.mrf.mxu1  ;;  %4357 = vmatpush.bf16.msra.mxu0 %v5457_v0 }
 0x6eb   :  { %v3413_v35 = vpop.f32.mrf.mxu3  ;;  %v3559_v13 = vpop.f32.mrf.mxu2 }
 0x6ec   :  { %v3414_v56 = vadd.f32 %v3413_v35, %v7591_v36  ;;  %v3560_v52 = vadd.f32 %v3559_v13, %v7594_v29  ;;  %v5717_v35 = vld [vmem:[#allocation2 + $0x72c] sm:$0xf0] }
 0x6ee   :  { %v3615_v49 = vmax.f32 %v3414_v56, 0.0  ;;  %v3616_v14 = vmax.f32 %v3560_v52, 0.0 }
 0x6ef   :  { %v7673_v55 = vpop.f32.mrf.mxu0  ;;  %v7675_v25 = vpop.f32.mrf.mxu1 }
 0x6f0   :  { %3957 = vmatmul.bf16.gmra.mxu3 %v7607_v28  ;;  %v3647_v46 = vpack.c.bf16 %v3615_v49, %v3613_v20  ;;  %v7679_v5 = vpack.c.bf16 %v3616_v14, %v3614_v42  ;;  %v5452_v20 = vld [vmem:[#allocation2 + $0x6a8] sm:$0xf]  ;;  %v5709_v49 = vld [vmem:[#allocation2 + $0x6ac] sm:$0xf0] }
 0x6f1   :  { %4103 = vmatmul.bf16.gmra.mxu2 %v7607_v28  ;;  %v5453_v42 = vor.u32 %v5709_v49, %v5452_v20 }
 0x6f2   :  { %3904 = vmatmul.bf16.gmra.mxu0 %v3647_v46  ;;  %4050 = vmatmul.bf16.gmra.mxu1 %v3647_v46 }
 0x6f3   :  { %v3416_v36 = vpop.f32.mrf.mxu3  ;;  %4358 = vmatpush.bf16.msra.mxu0 %v5453_v42 }
 0x6f4   :  { %v3562_v45 = vpop.f32.mrf.mxu2  ;;  %v3417_v12 = vadd.f32 %v3416_v36, %v7600_v11  ;;  %v5708_v36 = vld [vmem:[#allocation2 + $0x69c] sm:$0xf0] }
 0x6f5   :  { %v3563_v29 = vadd.f32 %v3562_v45, %v7603_v23 }
 0x6f6   :  { %v3617_v59 = vmax.f32 %v3417_v12, 0.0  ;;  %v5444_v12 = vld [vmem:[#allocation2 + $0x688] sm:$0xf] }
 0x6f7   :  { %v7682_v31 = vpop.f32.mrf.mxu0  ;;  %v7684_v33 = vpop.f32.mrf.mxu1  ;;  %v3618_v39 = vmax.f32 %v3563_v29, 0.0 }
 0x6fb   :  { %v3418_v34 = vpop.f32.mrf.mxu3 }
 0x6fc   :  { %v3419_v28 = vadd.f32 %v3418_v34, %v7611_v62  ;;  %v3564_v48 = vpop.f32.mrf.mxu2  ;;  %v5707_v34 = vld [vmem:[#allocation2 + $0x68c] sm:$0xf0] }
 0x6fd   :  { %v3565_v18 = vadd.f32 %v3564_v48, %v7614_v17 }
 0x6fe   :  { %v3619_v10 = vmax.f32 %v3419_v28, 0.0 }
 0x6ff   :  { %v3620_v23 = vmax.f32 %v3565_v18, 0.0  ;;  %v7689_v24 = vpop.f32.mrf.mxu0  ;;  %v7691_v44 = vpop.f32.mrf.mxu1  ;;  %v5445_v18 = vor.u32 %v5707_v34, %v5444_v12 }
 0x700   :  { %3962 = vmatmul.bf16.gmra.mxu3 %v7627_v58  ;;  %v3649_v11 = vpack.c.bf16 %v3619_v10, %v3617_v59 }
 0x701   :  { %4108 = vmatmul.bf16.gmra.mxu2 %v7627_v58  ;;  %v7695_v62 = vpack.c.bf16 %v3620_v23, %v3618_v39 }
 0x702   :  { %3909 = vmatmul.bf16.gmra.mxu0 %v3649_v11  ;;  %4055 = vmatmul.bf16.gmra.mxu1 %v3649_v11 }
 0x703   :  { %v3421_v17 = vpop.f32.mrf.mxu3 }
 0x704   :  { %v3567_v15 = vpop.f32.mrf.mxu2  ;;  %v3422_v9 = vadd.f32 %v3421_v17, %v7620_v16 }
 0x705   :  { %v3568_v43 = vadd.f32 %v3567_v15, %v7623_v38 }
 0x706   :  { %v3621_v61 = vmax.f32 %v3422_v9, 0.0 }
 0x707   :  { %v7698_v2 = vpop.f32.mrf.mxu0  ;;  %v7700_v4 = vpop.f32.mrf.mxu1  ;;  %v3622_v21 = vmax.f32 %v3568_v43, 0.0 }
 0x70b   :  { %v3423_v54 = vpop.f32.mrf.mxu3 }
 0x70c   :  { %v3424_v3 = vadd.f32 %v3423_v54, %v7631_v40  ;;  %v3569_v53 = vpop.f32.mrf.mxu2  ;;  %v5484_v40 = vld [vmem:[#allocation2 + $0x728] sm:$0xf] }
 0x70d   :  { %v3570_v58 = vadd.f32 %v3569_v53, %v7634_v63  ;;  %v5485_v56 = vor.u32 %v5717_v35, %v5484_v40 }
 0x70e   :  { %v3623_v51 = vmax.f32 %v3424_v3, 0.0 }
 0x70f   :  { %v3624_v19 = vmax.f32 %v3570_v58, 0.0  ;;  %v7705_v47 = vpop.f32.mrf.mxu0  ;;  %v7707_v37 = vpop.f32.mrf.mxu1  ;;  %4431 = vmatpush.bf16.msra.mxu3 %v5485_v56  ;;  %v5480_v58 = vld [vmem:[#allocation2 + $0x718] sm:$0xf] }
 0x710   :  { %3967 = vmatmul.bf16.gmra.mxu3 %v7647_v60  ;;  %v3651_v38 = vpack.c.bf16 %v3623_v51, %v3621_v61 }
 0x711   :  { %4113 = vmatmul.bf16.gmra.mxu2 %v7647_v60  ;;  %v7711_v16 = vpack.c.bf16 %v3624_v19, %v3622_v21  ;;  %v5448_v60 = vld [vmem:[#allocation2 + $0x698] sm:$0xf] }
 0x712   :  { %3914 = vmatmul.bf16.gmra.mxu0 %v3651_v38  ;;  %4060 = vmatmul.bf16.gmra.mxu1 %v3651_v38  ;;  %v5449_v29 = vor.u32 %v5708_v36, %v5448_v60 }
 0x713   :  { %v3426_v63 = vpop.f32.mrf.mxu3 }
 0x714   :  { %v3572_v13 = vpop.f32.mrf.mxu2  ;;  %v3427_v45 = vadd.f32 %v3426_v63, %v7640_v27  ;;  %4359 = vmatpush.bf16.msra.mxu0 %v5449_v29 }
 0x715   :  { %v3573_v52 = vadd.f32 %v3572_v13, %v7643_v6 }
 0x716   :  { %v3625_v28 = vmax.f32 %v3427_v45, 0.0 }
 0x717   :  { %v7714_v14 = vpop.f32.mrf.mxu0  ;;  %v7716_v46 = vpop.f32.mrf.mxu1  ;;  %v3626_v59 = vmax.f32 %v3573_v52, 0.0 }
 0x718   :  { %4360 = vmatpush.bf16.msra.mxu0 %v5445_v18  ;;  %v5715_v18 = vld [vmem:[#allocation2 + $0x70c] sm:$0xf0] }
 0x71b   :  { %v3428_v7 = vpop.f32.mrf.mxu3 }
 0x71c   :  { %v3429_v8 = vadd.f32 %v3428_v7, %v7651_v50  ;;  %v3574_v32 = vpop.f32.mrf.mxu2 }
 0x71d   :  { %v3575_v6 = vadd.f32 %v3574_v32, %v7654_v57 }
 0x71e   :  { %v3627_v48 = vmax.f32 %v3429_v8, 0.0 }
 0x71f   :  { %v3628_v10 = vmax.f32 %v3575_v6, 0.0  ;;  %v7721_v39 = vpop.f32.mrf.mxu0  ;;  %v7723_v23 = vpop.f32.mrf.mxu1 }
 0x720   :  { %3972 = vmatmul.bf16.gmra.mxu3 %v7667_v30  ;;  %v3653_v27 = vpack.c.bf16 %v3627_v48, %v3625_v28  ;;  %v5476_v48 = vld [vmem:[#allocation2 + $0x708] sm:$0xf] }
 0x721   :  { %4118 = vmatmul.bf16.gmra.mxu2 %v7667_v30  ;;  %v7727_v50 = vpack.c.bf16 %v3628_v10, %v3626_v59  ;;  %v5313_v30 = vld [vmem:[%s8098_s2 + $0x10] ss:$8 sm:$0x3]  ;;  %v5477_v10 = vor.u32 %v5715_v18, %v5476_v48 }
 0x722   :  { %3919 = vmatmul.bf16.gmra.mxu0 %v3653_v27  ;;  %4065 = vmatmul.bf16.gmra.mxu1 %v3653_v27  ;;  %v7740_v54 = vperm.slane %v5313_v30, 1  ;;  %v7750_v19 = vperm.slane %v5313_v30, 0 }
 0x723   :  { %v3431_v57 = vpop.f32.mrf.mxu3 }
 0x724   :  { %v3577_v41 = vpop.f32.mrf.mxu2  ;;  %v3432_v17 = vadd.f32 %v3431_v57, %v7660_v22  ;;  %v5716_v22 = vld [vmem:[#allocation2 + $0x71c] sm:$0xf0]  ;;  %v4012_v51 = vadd.f32 %v7675_v25, %v7740_v54  ;;  %v3868_v56 = vadd.f32 %v7682_v31, %v7750_v19  ;;  %v4014_v25 = vadd.f32 %v7684_v33, %v7740_v54 }
 0x725   :  { %v7730_v1 = vadd.f32 %v3577_v41, %v7663_v26  ;;  %v5481_v61 = vor.u32 %v5716_v22, %v5480_v58  ;;  %v4017_v33 = vadd.f32 %v7691_v44, %v7740_v54  ;;  %v3871_v59 = vadd.f32 %v7689_v24, %v7750_v19 }
 0x726   :  { %v3629_v43 = vmax.f32 %v3432_v17, 0.0  ;;  %v4019_v44 = vadd.f32 %v7700_v4, %v7740_v54  ;;  %v4022_v4 = vadd.f32 %v7707_v37, %v7740_v54  ;;  %v3881_v48 = vadd.f32 %v7721_v39, %v7750_v19 }
 0x727   :  { %v7732_v11 = vpop.f32.mrf.mxu0  ;;  %v7734_v0 = vpop.f32.mrf.mxu1  ;;  %4432 = vmatpush.bf16.msra.mxu3 %v5481_v61  ;;  %v3630_v18 = vmax.f32 %v7730_v1, 0.0 }
 0x728   :  { %v3655_v26 = vpack.c.bf16 %v3629_v43, %v3629_v43 }
 0x72b   :  { %v3433_v15 = vpop.f32.mrf.mxu3  ;;  %4433 = vmatpush.bf16.msra.mxu3 %v5477_v10  ;;  %v4029_v10 = vadd.f32 %v7734_v0, %v7740_v54 }
 0x72c   :  { %v3579_v9 = vpop.f32.mrf.mxu2 }
 0x72f   :  { %v7742_v3 = vpop.f32.mrf.mxu0  ;;  %v7744_v53 = vpop.f32.mrf.mxu1 }
 0x730   :  { %3977 = vmatmul.bf16.gmra.mxu3 %v7679_v5  ;;  %v4032_v0 = vadd.f32 %v7744_v53, %v7740_v54 }
 0x731   :  { %4123 = vmatmul.bf16.gmra.mxu2 %v7679_v5  ;;  %v3866_v5 = vadd.f32 %v7673_v55, %v7750_v19 }
 0x732   :  { %3924 = vmatmul.bf16.gmra.mxu0 %v3655_v26  ;;  %4070 = vmatmul.bf16.gmra.mxu1 %v3655_v26 }
 0x733   :  { %v3938_v21 = vpop.f32.mrf.mxu3 }
 0x734   :  { %v4084_v38 = vpop.f32.mrf.mxu2  ;;  %v3939_v13 = vadd.f32 %v3938_v21, %v3866_v5  ;;  %v3876_v5 = vadd.f32 %v7705_v47, %v7750_v19 }
 0x735   :  { %v4085_v40 = vadd.f32 %v4084_v38, %v4012_v51 }
 0x736   :  { %v4148_v60 = vmax.f32 %v3939_v13, 0.0 }
 0x737   :  { %v7752_v35 = vpop.f32.mrf.mxu0  ;;  %v7754_v63 = vpop.f32.mrf.mxu1  ;;  %v4149_v45 = vmax.f32 %v4085_v40, 0.0 }
 0x73b   :  { %v3940_v52 = vpop.f32.mrf.mxu3 }
 0x73c   :  { %v3941_v20 = vadd.f32 %v3940_v52, %v3868_v56  ;;  %v4086_v49 = vpop.f32.mrf.mxu2  ;;  %v3878_v56 = vadd.f32 %v7714_v14, %v7750_v19 }
 0x73d   :  { %v4087_v42 = vadd.f32 %v4086_v49, %v4014_v25 }
 0x73e   :  { %v4150_v36 = vmax.f32 %v3941_v20, 0.0 }
 0x73f   :  { %v4151_v29 = vmax.f32 %v4087_v42, 0.0  ;;  %v7762_v7 = vpop.f32.mrf.mxu0  ;;  %v7764_v8 = vpop.f32.mrf.mxu1 }
 0x740   :  { %v4198_v55 = vpack.c.bf16 %v4150_v36, %v4148_v60  ;;  %3982 = vmatmul.bf16.gmra.mxu3 %v7695_v62 }
 0x741   :  { %v7767_v31 = vpack.c.bf16 %v4151_v29, %v4149_v45  ;;  %4128 = vmatmul.bf16.gmra.mxu2 %v7695_v62  ;;  %v3873_v62 = vadd.f32 %v7698_v2, %v7750_v19 }
 0x742   :  { %4361 = vmatmul.bf16.vlgmr.msra.gmra.mxu0 %v4198_v55 }
 0x743   :  { %v3943_v32 = vpop.f32.mrf.mxu3 }
 0x744   :  { %v4089_v6 = vpop.f32.mrf.mxu2  ;;  %v3944_v27 = vadd.f32 %v3943_v32, %v3871_v59  ;;  %v3883_v59 = vadd.f32 %v7732_v11, %v7750_v19 }
 0x745   :  { %v4090_v12 = vadd.f32 %v4089_v6, %v4017_v33 }
 0x746   :  { %v4152_v30 = vmax.f32 %v3944_v27, 0.0 }
 0x747   :  { %v7772_v34 = vpop.f32.mrf.mxu0  ;;  %v7774_v28 = vpop.f32.mrf.mxu1  ;;  %v4153_v9 = vmax.f32 %v4090_v12, 0.0 }
 0x74b   :  { %v3945_v57 = vpop.f32.mrf.mxu3 }
 0x74c   :  { %v3946_v41 = vadd.f32 %v3945_v57, %v3873_v62  ;;  %v4091_v17 = vpop.f32.mrf.mxu2  ;;  %v3656_v57 = vpack.c.bf16 %v3630_v18, %v3630_v18  ;;  %v4039_v18 = vadd.f32 %v7774_v28, %v7740_v54 }
 0x74d   :  { %v4092_v15 = vadd.f32 %v4091_v17, %v4019_v44 }
 0x74e   :  { %v4154_v43 = vmax.f32 %v3946_v41, 0.0 }
 0x74f   :  { %v4155_v26 = vmax.f32 %v4092_v15, 0.0  ;;  %v7782_v58 = vpop.f32.mrf.mxu0  ;;  %v7784_v24 = vpop.f32.mrf.mxu1 }
 0x750   :  { %3987 = vmatmul.bf16.gmra.mxu3 %v7711_v16  ;;  %v4200_v2 = vpack.c.bf16 %v4154_v43, %v4152_v30  ;;  %v4042_v28 = vadd.f32 %v7784_v24, %v7740_v54 }
 0x751   :  { %v7787_v22 = vpack.c.bf16 %v4155_v26, %v4153_v9  ;;  %4133 = vmatmul.bf16.gmra.mxu2 %v7711_v16  ;;  %v4024_v16 = vadd.f32 %v7716_v46, %v7740_v54  ;;  %v4027_v46 = vadd.f32 %v7723_v23, %v7740_v54 }
 0x752   :  { %4366 = vmatmul.bf16.gmra.mxu0 %v4200_v2 }
 0x753   :  { %v3948_v61 = vpop.f32.mrf.mxu3 }
 0x754   :  { %v4094_v51 = vpop.f32.mrf.mxu2  ;;  %v3949_v13 = vadd.f32 %v3948_v61, %v3876_v5 }
 0x755   :  { %v4095_v21 = vadd.f32 %v4094_v51, %v4022_v4  ;;  %v3886_v51 = vadd.f32 %v7742_v3, %v7750_v19 }
 0x756   :  { %v4156_v49 = vmax.f32 %v3949_v13, 0.0 }
 0x757   :  { %v7792_v38 = vpop.f32.mrf.mxu0  ;;  %v7794_v40 = vpop.f32.mrf.mxu1  ;;  %v4157_v60 = vmax.f32 %v4095_v21, 0.0  ;;  %v3888_v21 = vadd.f32 %v7752_v35, %v7750_v19 }
 0x75b   :  { %v3950_v25 = vpop.f32.mrf.mxu3 }
 0x75c   :  { %v3951_v52 = vadd.f32 %v3950_v25, %v3878_v56  ;;  %v4096_v37 = vpop.f32.mrf.mxu2  ;;  %v4034_v56 = vadd.f32 %v7754_v63, %v7740_v54  ;;  %v4037_v63 = vadd.f32 %v7764_v8, %v7740_v54 }
 0x75d   :  { %v4097_v20 = vadd.f32 %v4096_v37, %v4024_v16 }
 0x75e   :  { %v4158_v42 = vmax.f32 %v3951_v52, 0.0 }
 0x75f   :  { %v4159_v36 = vmax.f32 %v4097_v20, 0.0  ;;  %v7802_v45 = vpop.f32.mrf.mxu0  ;;  %v7804_v29 = vpop.f32.mrf.mxu1 }
 0x760   :  { %3992 = vmatmul.bf16.gmra.mxu3 %v7727_v50  ;;  %v4202_v47 = vpack.c.bf16 %v4158_v42, %v4156_v49 }
 0x761   :  { %v7807_v14 = vpack.c.bf16 %v4159_v36, %v4157_v60  ;;  %4138 = vmatmul.bf16.gmra.mxu2 %v7727_v50 }
 0x762   :  { %4371 = vmatmul.bf16.gmra.mxu0 %v4202_v47 }
 0x763   :  { %v3953_v55 = vpop.f32.mrf.mxu3 }
 0x764   :  { %v4099_v33 = vpop.f32.mrf.mxu2  ;;  %v3954_v50 = vadd.f32 %v3953_v55, %v3881_v48 }
 0x765   :  { %v4100_v32 = vadd.f32 %v4099_v33, %v4027_v46 }
 0x766   :  { %v4160_v41 = vmax.f32 %v3954_v50, 0.0 }
 0x767   :  { %v7812_v6 = vpop.f32.mrf.mxu0  ;;  %v7814_v12 = vpop.f32.mrf.mxu1  ;;  %v4161_v15 = vmax.f32 %v4100_v32, 0.0  ;;  %v3891_v32 = vadd.f32 %v7762_v7, %v7750_v19 }
 0x76b   :  { %v3955_v23 = vpop.f32.mrf.mxu3 }
 0x76c   :  { %v3956_v62 = vadd.f32 %v3955_v23, %v3883_v59  ;;  %v4101_v27 = vpop.f32.mrf.mxu2 }
 0x76d   :  { %v4102_v44 = vadd.f32 %v4101_v27, %v4029_v10 }
 0x76e   :  { %v4162_v17 = vmax.f32 %v3956_v62, 0.0 }
 0x76f   :  { %v4163_v30 = vmax.f32 %v4102_v44, 0.0  ;;  %v7823_v43 = vpop.f32.mrf.mxu0  ;;  %v7825_v39 = vpop.f32.mrf.mxu1 }
 0x770   :  { %3997 = vmatmul.bf16.gmra.mxu3 %v3656_v57  ;;  %v4204_v1 = vpack.c.bf16 %v4162_v17, %v4160_v41 }
 0x771   :  { %v7827_v11 = vpack.c.bf16 %v4163_v30, %v4161_v15  ;;  %4143 = vmatmul.bf16.gmra.mxu2 %v3656_v57 }
 0x772   :  { %4376 = vmatmul.bf16.gmra.mxu0 %v4204_v1 }
 0x773   :  { %v3958_v9 = vpop.f32.mrf.mxu3 }
 0x774   :  { %v4104_v26 = vpop.f32.mrf.mxu2  ;;  %v3959_v5 = vadd.f32 %v3958_v9, %v3886_v51  ;;  %v3896_v9 = vadd.f32 %v7782_v58, %v7750_v19 }
 0x775   :  { %v4105_v2 = vadd.f32 %v4104_v26, %v4032_v0 }
 0x776   :  { %v4164_v52 = vmax.f32 %v3959_v5, 0.0 }
 0x777   :  { %v7831_v4 = vpop.f32.mrf.mxu0  ;;  %v7833_v61 = vpop.f32.mrf.mxu1  ;;  %v4165_v20 = vmax.f32 %v4105_v2, 0.0  ;;  %v4044_v2 = vadd.f32 %v7794_v40, %v7740_v54  ;;  %v4047_v40 = vadd.f32 %v7804_v29, %v7740_v54 }
 0x77b   :  { %v3960_v13 = vpop.f32.mrf.mxu3 }
 0x77c   :  { %v3961_v16 = vadd.f32 %v3960_v13, %v3888_v21  ;;  %v4106_v53 = vpop.f32.mrf.mxu2 }
 0x77d   :  { %v4107_v25 = vadd.f32 %v4106_v53, %v4034_v56 }
 0x77e   :  { %v4166_v37 = vmax.f32 %v3961_v16, 0.0 }
 0x77f   :  { %v4167_v49 = vmax.f32 %v4107_v25, 0.0  ;;  %v7841_v42 = vpop.f32.mrf.mxu0  ;;  %v7843_v60 = vpop.f32.mrf.mxu1 }
 0x780   :  { %4434 = vmatmul.bf16.vlgmr.msra.gmra.mxu3 %v7767_v31  ;;  %v4206_v3 = vpack.c.bf16 %v4166_v37, %v4164_v52  ;;  %v3893_v31 = vadd.f32 %v7772_v34, %v7750_v19 }
 0x781   :  { %v7846_v35 = vpack.c.bf16 %v4167_v49, %v4165_v20 }
 0x782   :  { %4381 = vmatmul.bf16.gmra.mxu0 %v4206_v3 }
 0x783   :  { %v3963_v36 = vpop.f32.mrf.mxu3 }
 0x784   :  { %v4109_v47 = vpop.f32.mrf.mxu2  ;;  %v3964_v48 = vadd.f32 %v3963_v36, %v3891_v32  ;;  %v3901_v36 = vadd.f32 %v7802_v45, %v7750_v19 }
 0x785   :  { %v4110_v46 = vadd.f32 %v4109_v47, %v4037_v63 }
 0x786   :  { %v4168_v23 = vmax.f32 %v3964_v48, 0.0 }
 0x787   :  { %v7850_v55 = vpop.f32.mrf.mxu0  ;;  %v7852_v33 = vpop.f32.mrf.mxu1  ;;  %v4169_v27 = vmax.f32 %v4110_v46, 0.0  ;;  %v4049_v46 = vadd.f32 %v7814_v12, %v7740_v54  ;;  %v4052_v12 = vadd.f32 %v7825_v39, %v7740_v54 }
 0x78b   :  { %v3965_v59 = vpop.f32.mrf.mxu3 }
 0x78c   :  { %v3966_v50 = vadd.f32 %v3965_v59, %v3893_v31  ;;  %v4111_v8 = vpop.f32.mrf.mxu2 }
 0x78d   :  { %v4112_v10 = vadd.f32 %v4111_v8, %v4039_v18 }
 0x78e   :  { %v4170_v62 = vmax.f32 %v3966_v50, 0.0 }
 0x78f   :  { %v4171_v44 = vmax.f32 %v4112_v10, 0.0  ;;  %v7860_v57 = vpop.f32.mrf.mxu0  ;;  %v7862_v41 = vpop.f32.mrf.mxu1 }
 0x790   :  { %4439 = vmatmul.bf16.gmra.mxu3 %v7787_v22  ;;  %v4208_v7 = vpack.c.bf16 %v4170_v62, %v4168_v23  ;;  %v3898_v22 = vadd.f32 %v7792_v38, %v7750_v19 }
 0x791   :  { %v7865_v34 = vpack.c.bf16 %v4171_v44, %v4169_v27 }
 0x792   :  { %4386 = vmatmul.bf16.gmra.mxu0 %v4208_v7 }
 0x793   :  { %v3968_v17 = vpop.f32.mrf.mxu3 }
 0x794   :  { %v4114_v15 = vpop.f32.mrf.mxu2  ;;  %v3969_v26 = vadd.f32 %v3968_v17, %v3896_v9  ;;  %v3906_v17 = vadd.f32 %v7823_v43, %v7750_v19 }
 0x795   :  { %v4115_v30 = vadd.f32 %v4114_v15, %v4042_v28  ;;  %v3908_v15 = vadd.f32 %v7831_v4, %v7750_v19  ;;  %v4057_v4 = vadd.f32 %v7843_v60, %v7740_v54 }
 0x796   :  { %v4172_v56 = vmax.f32 %v3969_v26, 0.0 }
 0x797   :  { %v7869_v1 = vpop.f32.mrf.mxu0  ;;  %v7871_v0 = vpop.f32.mrf.mxu1  ;;  %v4173_v16 = vmax.f32 %v4115_v30, 0.0 }
 0x79b   :  { %v3970_v51 = vpop.f32.mrf.mxu3 }
 0x79c   :  { %v3971_v21 = vadd.f32 %v3970_v51, %v3898_v22  ;;  %v4116_v24 = vpop.f32.mrf.mxu2 }
 0x79d   :  { %v4117_v5 = vadd.f32 %v4116_v24, %v4044_v2 }
 0x79e   :  { %v4174_v13 = vmax.f32 %v3971_v21, 0.0 }
 0x79f   :  { %v4175_v53 = vmax.f32 %v4117_v5, 0.0  ;;  %v7879_v25 = vpop.f32.mrf.mxu0  ;;  %v7881_v52 = vpop.f32.mrf.mxu1 }
 0x7a0   :  { %4444 = vmatmul.bf16.gmra.mxu3 %v7807_v14  ;;  %v4210_v58 = vpack.c.bf16 %v4174_v13, %v4172_v56  ;;  %v3903_v14 = vadd.f32 %v7812_v6, %v7750_v19 }
 0x7a1   :  { %v7884_v38 = vpack.c.bf16 %v4175_v53, %v4173_v16 }
 0x7a2   :  { %4391 = vmatmul.bf16.gmra.mxu0 %v4210_v58  ;;  %v3911_v58 = vadd.f32 %v7841_v42, %v7750_v19 }
 0x7a3   :  { %v3973_v37 = vpop.f32.mrf.mxu3 }
 0x7a4   :  { %v4119_v20 = vpop.f32.mrf.mxu2  ;;  %v3974_v47 = vadd.f32 %v3973_v37, %v3901_v36 }
 0x7a5   :  { %v4120_v49 = vadd.f32 %v4119_v20, %v4047_v40  ;;  %v3913_v40 = vadd.f32 %v7850_v55, %v7750_v19  ;;  %v4062_v55 = vadd.f32 %v7862_v41, %v7740_v54 }
 0x7a6   :  { %v4176_v18 = vmax.f32 %v3974_v47, 0.0 }
 0x7a7   :  { %v7888_v3 = vpop.f32.mrf.mxu0  ;;  %v7890_v63 = vpop.f32.mrf.mxu1  ;;  %v4177_v50 = vmax.f32 %v4120_v49, 0.0 }
 0x7ab   :  { %v3975_v32 = vpop.f32.mrf.mxu3 }
 0x7ac   :  { %v3976_v31 = vadd.f32 %v3975_v32, %v3903_v14  ;;  %v4121_v29 = vpop.f32.mrf.mxu2 }
 0x7ad   :  { %v4122_v48 = vadd.f32 %v4121_v29, %v4049_v46 }
 0x7ae   :  { %v4178_v59 = vmax.f32 %v3976_v31, 0.0 }
 0x7af   :  { %v4179_v8 = vmax.f32 %v4122_v48, 0.0  ;;  %v7898_v10 = vpop.f32.mrf.mxu0  ;;  %v7900_v23 = vpop.f32.mrf.mxu1 }
 0x7b0   :  { %4449 = vmatmul.bf16.gmra.mxu3 %v7827_v11  ;;  %v4212_v45 = vpack.c.bf16 %v4178_v59, %v4176_v18  ;;  %v4054_v11 = vadd.f32 %v7833_v61, %v7740_v54 }
 0x7b1   :  { %v7903_v6 = vpack.c.bf16 %v4179_v8, %v4177_v50  ;;  %v3916_v50 = vadd.f32 %v7860_v57, %v7750_v19  ;;  %v3918_v8 = vadd.f32 %v7869_v1, %v7750_v19  ;;  %v4067_v1 = vadd.f32 %v7881_v52, %v7740_v54 }
 0x7b2   :  { %4396 = vmatmul.bf16.gmra.mxu0 %v4212_v45 }
 0x7b3   :  { %v3978_v62 = vpop.f32.mrf.mxu3 }
 0x7b4   :  { %v4124_v27 = vpop.f32.mrf.mxu2  ;;  %v3979_v30 = vadd.f32 %v3978_v62, %v3906_v17 }
 0x7b5   :  { %v4125_v44 = vadd.f32 %v4124_v27, %v4052_v12 }
 0x7b6   :  { %v4180_v39 = vmax.f32 %v3979_v30, 0.0 }
 0x7b7   :  { %v3927_v7 = vpop.f32.mrf.mxu0  ;;  %v4073_v28 = vpop.f32.mrf.mxu1  ;;  %v4181_v21 = vmax.f32 %v4125_v44, 0.0 }
 0x7bb   :  { %v3980_v9 = vpop.f32.mrf.mxu3 }
 0x7bc   :  { %v3981_v22 = vadd.f32 %v3980_v9, %v3908_v15  ;;  %v4126_v26 = vpop.f32.mrf.mxu2 }
 0x7bd   :  { %v4127_v2 = vadd.f32 %v4126_v26, %v4054_v11  ;;  %v3921_v26 = vadd.f32 %v7879_v25, %v7750_v19 }
 0x7be   :  { %v4182_v51 = vmax.f32 %v3981_v22, 0.0 }
 0x7bf   :  { %v4183_v24 = vmax.f32 %v4127_v2, 0.0  ;;  %v7913_v5 = vpop.f32.mrf.mxu0  ;;  %v3923_v2 = vadd.f32 %v7888_v3, %v7750_v19  ;;  %v4072_v3 = vadd.f32 %v7900_v23, %v7740_v54 }
 0x7c0   :  { %4454 = vmatmul.bf16.gmra.mxu3 %v7846_v35  ;;  %v4214_v43 = vpack.c.bf16 %v4182_v51, %v4180_v39  ;;  %v4059_v35 = vadd.f32 %v7852_v33, %v7740_v54 }
 0x7c1   :  { %v7916_v56 = vpack.c.bf16 %v4183_v24, %v4181_v21 }
 0x7c2   :  { %4401 = vmatmul.bf16.gmra.mxu0 %v4214_v43 }
 0x7c3   :  { %v3983_v61 = vpop.f32.mrf.mxu3 }
 0x7c4   :  { %v4129_v13 = vpop.f32.mrf.mxu2  ;;  %v3984_v37 = vadd.f32 %v3983_v61, %v3911_v58 }
 0x7c5   :  { %v4130_v16 = vadd.f32 %v4129_v13, %v4057_v4 }
 0x7c6   :  { %v4184_v60 = vmax.f32 %v3984_v37, 0.0 }
 0x7c7   :  { %v7920_v53 = vpop.f32.mrf.mxu0  ;;  %v4185_v46 = vmax.f32 %v4130_v16, 0.0 }
 0x7cb   :  { %v3985_v20 = vpop.f32.mrf.mxu3 }
 0x7cc   :  { %v3986_v49 = vadd.f32 %v3985_v20, %v3913_v40  ;;  %v4131_v36 = vpop.f32.mrf.mxu2 }
 0x7cd   :  { %v4132_v14 = vadd.f32 %v4131_v36, %v4059_v35  ;;  %v3926_v35 = vadd.f32 %v7898_v10, %v7750_v19 }
 0x7ce   :  { %v4186_v47 = vmax.f32 %v3986_v49, 0.0 }
 0x7cf   :  { %v4187_v32 = vmax.f32 %v4132_v14, 0.0  ;;  %v7928_v31 = vpop.f32.mrf.mxu0 }
 0x7d0   :  { %4459 = vmatmul.bf16.gmra.mxu3 %v7865_v34  ;;  %v4216_v42 = vpack.c.bf16 %v4186_v47, %v4184_v60  ;;  %v4064_v34 = vadd.f32 %v7871_v0, %v7740_v54 }
 0x7d1   :  { %v7931_v29 = vpack.c.bf16 %v4187_v32, %v4185_v46 }
 0x7d2   :  { %4406 = vmatmul.bf16.gmra.mxu0 %v4216_v42 }
 0x7d3   :  { %v3988_v33 = vpop.f32.mrf.mxu3 }
 0x7d4   :  { %v4134_v48 = vpop.f32.mrf.mxu2  ;;  %v3989_v45 = vadd.f32 %v3988_v33, %v3916_v50 }
 0x7d5   :  { %v4135_v18 = vadd.f32 %v4134_v48, %v4062_v55 }
 0x7d6   :  { %v4188_v41 = vmax.f32 %v3989_v45, 0.0 }
 0x7d7   :  { %v7935_v59 = vpop.f32.mrf.mxu0  ;;  %v4189_v28 = vmax.f32 %v4135_v18, 0.0 }
 0x7db   :  { %v3990_v12 = vpop.f32.mrf.mxu3 }
 0x7dc   :  { %v3991_v62 = vadd.f32 %v3990_v12, %v3918_v8  ;;  %v4136_v27 = vpop.f32.mrf.mxu2 }
 0x7dd   :  { %v4137_v44 = vadd.f32 %v4136_v27, %v4064_v34 }
 0x7de   :  { %v4190_v7 = vmax.f32 %v3991_v62, 0.0 }
 0x7df   :  { %v4191_v17 = vmax.f32 %v4137_v44, 0.0  ;;  %v7943_v15 = vpop.f32.mrf.mxu0 }
 0x7e0   :  { %4464 = vmatmul.bf16.gmra.mxu3 %v7884_v38  ;;  %v4218_v57 = vpack.c.bf16 %v4190_v7, %v4188_v41  ;;  %v4069_v38 = vadd.f32 %v7890_v63, %v7740_v54 }
 0x7e1   :  { %v4219_v30 = vpack.c.bf16 %v4191_v17, %v4189_v28 }
 0x7e2   :  { %4411 = vmatmul.bf16.gmra.mxu0 %v4218_v57 }
 0x7e3   :  { %v3993_v11 = vpop.f32.mrf.mxu3 }
 0x7e4   :  { %v4139_v0 = vpop.f32.mrf.mxu2  ;;  %v3994_v39 = vadd.f32 %v3993_v11, %v3921_v26 }
 0x7e5   :  { %v4140_v9 = vadd.f32 %v4139_v0, %v4067_v1 }
 0x7e6   :  { %v4192_v4 = vmax.f32 %v3994_v39, 0.0 }
 0x7e7   :  { %v4374_v22 = vpop.f32.mrf.mxu0  ;;  %v4193_v61 = vmax.f32 %v4140_v9, 0.0 }
 0x7eb   :  { %v3995_v51 = vpop.f32.mrf.mxu3 }
 0x7ec   :  { %v3996_v21 = vadd.f32 %v3995_v51, %v3923_v2  ;;  %v4141_v24 = vpop.f32.mrf.mxu2 }
 0x7ed   :  { %v4142_v43 = vadd.f32 %v4141_v24, %v4069_v38 }
 0x7ee   :  { %v4194_v52 = vmax.f32 %v3996_v21, 0.0 }
 0x7ef   :  { %v4195_v13 = vmax.f32 %v4142_v43, 0.0  ;;  %v4377_v16 = vpop.f32.mrf.mxu0 }
 0x7f0   :  { %4469 = vmatmul.bf16.gmra.mxu3 %v7903_v6  ;;  %v4220_v58 = vpack.c.bf16 %v4194_v52, %v4192_v4  ;;  %v7962_v6 = vld [vmem:[%s8098_s2 + $0x11] ss:$0 sm:$0xff] }
 0x7f1   :  { %v4221_v25 = vpack.c.bf16 %v4195_v13, %v4193_v61  ;;  %v4363_v54 = vadd.f32 %v7913_v5, %v7962_v6  ;;  %v4365_v32 = vadd.f32 %v7920_v53, %v7962_v6  ;;  %v4370_v18 = vadd.f32 %v7935_v59, %v7962_v6 }
 0x7f2   :  { %4416 = vmatmul.bf16.gmra.mxu0 %v4220_v58  ;;  %v4375_v12 = vadd.f32 %v4374_v22, %v7962_v6  ;;  %v4378_v41 = vadd.f32 %v4377_v16, %v7962_v6 }
 0x7f3   :  { %v3998_v40 = vpop.f32.mrf.mxu3 }
 0x7f4   :  { %v4144_v37 = vpop.f32.mrf.mxu2  ;;  %v3999_v49 = vadd.f32 %v3998_v40, %v3926_v35 }
 0x7f5   :  { %v4145_v63 = vadd.f32 %v4144_v37, %v4072_v3 }
 0x7f6   :  { %v4196_v14 = vmax.f32 %v3999_v49, 0.0 }
 0x7f7   :  { %v4379_v20 = vpop.f32.mrf.mxu0 }
 0x7f8   :  { %v4222_v46 = vpack.c.bf16 %v4196_v14, %v4196_v14  ;;  %v4380_v57 = vadd.f32 %v4379_v20, %v7962_v6 }
 0x7fb   :  { %v4000_v36 = vpop.f32.mrf.mxu3 }
 0x7fc   :  { %v4146_v60 = vpop.f32.mrf.mxu2 }
 0x7ff   :  { %v4382_v47 = vpop.f32.mrf.mxu0 }
 0x800   :  { %4474 = vmatmul.bf16.gmra.mxu3 %v7916_v56  ;;  %v4368_v56 = vadd.f32 %v7928_v31, %v7962_v6  ;;  %v4373_v31 = vadd.f32 %v7943_v15, %v7962_v6  ;;  %v4197_v15 = vmax.f32 %v4145_v63, 0.0  ;;  %v4383_v9 = vadd.f32 %v4382_v47, %v7962_v6 }
 0x802   :  { %4421 = vmatmul.bf16.gmra.mxu0 %v4222_v46  ;;  %v4223_v11 = vpack.c.bf16 %v4197_v15, %v4197_v15 }
 0x803   :  { %v4435_v23 = vpop.f32.mrf.mxu3 }
 0x804   :  { %v4436_v19 = vadd.f32 %v4435_v23, %v4363_v54 }
 0x806   :  { %4500 = vst.msk [vmem:[%s8099_s3] sm:$0xff] %vm4499_vm4, %v4436_v19 }
 0x807   :  { %v4384_v10 = vpop.f32.mrf.mxu0 }
 0x808   :  { %v4385_v39 = vadd.f32 %v4384_v10, %v7962_v6 }
 0x80b   :  { %v4437_v42 = vpop.f32.mrf.mxu3 }
 0x80c   :  { %v4438_v55 = vadd.f32 %v4437_v42, %v4365_v32 }
 0x80e   :  { %4501 = vst.msk [vmem:[%s8099_s3 + $0x8] sm:$0xff] %vm4499_vm4, %v4438_v55 }
 0x80f   :  { %v4387_v5 = vpop.f32.mrf.mxu0 }
 0x810   :  { %4479 = vmatmul.bf16.gmra.mxu3 %v7931_v29  ;;  %v4388_v24 = vadd.f32 %v4387_v5, %v7962_v6 }
 0x813   :  { %v4440_v33 = vpop.f32.mrf.mxu3 }
 0x814   :  { %v4441_v48 = vadd.f32 %v4440_v33, %v4368_v56 }
 0x816   :  { %4502 = vst.msk [vmem:[%s8099_s3 + $0x10] sm:$0xff] %vm4499_vm4, %v4441_v48 }
 0x817   :  { %v4389_v53 = vpop.f32.mrf.mxu0 }
 0x818   :  { %v4390_v61 = vadd.f32 %v4389_v53, %v7962_v6 }
 0x81b   :  { %v4442_v50 = vpop.f32.mrf.mxu3 }
 0x81c   :  { %v4443_v8 = vadd.f32 %v4442_v50, %v4370_v18 }
 0x81e   :  { %4503 = vst.msk [vmem:[%s8099_s3 + $0x18] sm:$0xff] %vm4499_vm4, %v4443_v8 }
 0x81f   :  { %v4392_v29 = vpop.f32.mrf.mxu0 }
 0x820   :  { %4484 = vmatmul.bf16.gmra.mxu3 %v4219_v30 }
 0x823   :  { %v4445_v45 = vpop.f32.mrf.mxu3 }
 0x824   :  { %v4446_v34 = vadd.f32 %v4445_v45, %v4373_v31 }
 0x826   :  { %4504 = vst.msk [vmem:[%s8099_s3 + $0x20] sm:$0xff] %vm4499_vm4, %v4446_v34 }
 0x827   :  { %v4394_v59 = vpop.f32.mrf.mxu0 }
 0x828   :  { %v4395_v63 = vadd.f32 %v4394_v59, %v7962_v6 }
 0x82b   :  { %v4447_v62 = vpop.f32.mrf.mxu3 }
 0x82c   :  { %v4448_v27 = vadd.f32 %v4447_v62, %v4375_v12 }
 0x82e   :  { %4505 = vst.msk [vmem:[%s8099_s3 + $0x28] sm:$0xff] %vm4499_vm4, %v4448_v27 }
 0x82f   :  { %v4397_v44 = vpop.f32.mrf.mxu0 }
 0x830   :  { %4489 = vmatmul.bf16.gmra.mxu3 %v4221_v25  ;;  %v4393_v25 = vadd.f32 %v4392_v29, %v7962_v6  ;;  %v4398_v36 = vadd.f32 %v4397_v44, %v7962_v6 }
 0x833   :  { %v4450_v7 = vpop.f32.mrf.mxu3 }
 0x834   :  { %v4451_v28 = vadd.f32 %v4450_v7, %v4378_v41 }
 0x836   :  { %4506 = vst.msk [vmem:[%s8099_s3 + $0x30] sm:$0xff] %vm4499_vm4, %v4451_v28 }
 0x837   :  { %v4399_v17 = vpop.f32.mrf.mxu0 }
 0x838   :  { %v4400_v46 = vadd.f32 %v4399_v17, %v7962_v6 }
 0x83b   :  { %v4452_v30 = vpop.f32.mrf.mxu3 }
 0x83c   :  { %v4453_v1 = vadd.f32 %v4452_v30, %v4380_v57 }
 0x83e   :  { %4507 = vst.msk [vmem:[%s8099_s3 + $0x38] sm:$0xff] %vm4499_vm4, %v4453_v1 }
 0x83f   :  { %v4402_v0 = vpop.f32.mrf.mxu0 }
 0x840   :  { %4494 = vmatmul.bf16.gmra.mxu3 %v4223_v11  ;;  %v4403_v10 = vadd.f32 %v4402_v0, %v7962_v6 }
 0x843   :  { %v4455_v22 = vpop.f32.mrf.mxu3 }
 0x844   :  { %v4456_v26 = vadd.f32 %v4455_v22, %v4383_v9 }
 0x846   :  { %4508 = vst.msk [vmem:[%s8099_s3 + $0x40] sm:$0xff] %vm4499_vm4, %v4456_v26 }
 0x847   :  { %v4404_v2 = vpop.f32.mrf.mxu0 }
 0x848   :  { %v4405_v5 = vadd.f32 %v4404_v2, %v7962_v6 }
 0x84b   :  { %v4457_v38 = vpop.f32.mrf.mxu3 }
 0x84c   :  { %v4458_v51 = vadd.f32 %v4457_v38, %v4385_v39 }
 0x84e   :  { %4509 = vst.msk [vmem:[%s8099_s3 + $0x48] sm:$0xff] %vm4499_vm4, %v4458_v51 }
 0x84f   :  { %v4407_v21 = vpop.f32.mrf.mxu0 }
 0x850   :  { %v4408_v48 = vadd.f32 %v4407_v21, %v7962_v6 }
 0x853   :  { %v4460_v43 = vpop.f32.mrf.mxu3 }
 0x854   :  { %v4461_v4 = vadd.f32 %v4460_v43, %v4388_v24 }
 0x856   :  { %4510 = vst.msk [vmem:[%s8099_s3 + $0x50] sm:$0xff] %vm4499_vm4, %v4461_v4 }
 0x857   :  { %v4409_v52 = vpop.f32.mrf.mxu0 }
 0x858   :  { %v4410_v50 = vadd.f32 %v4409_v52, %v7962_v6 }
 0x85b   :  { %v4462_v13 = vpop.f32.mrf.mxu3 }
 0x85c   :  { %v4463_v16 = vadd.f32 %v4462_v13, %v4390_v61 }
 0x85e   :  { %4511 = vst.msk [vmem:[%s8099_s3 + $0x58] sm:$0xff] %vm4499_vm4, %v4463_v16 }
 0x85f   :  { %v4412_v58 = vpop.f32.mrf.mxu0 }
 0x860   :  { %v4413_v31 = vadd.f32 %v4412_v58, %v7962_v6 }
 0x863   :  { %v4465_v3 = vpop.f32.mrf.mxu3 }
 0x864   :  { %v4466_v40 = vadd.f32 %v4465_v3, %v4393_v25 }
 0x866   :  { %4512 = vst.msk [vmem:[%s8099_s3 + $0x60] sm:$0xff] %vm4499_vm4, %v4466_v40 }
 0x867   :  { %v4414_v37 = vpop.f32.mrf.mxu0 }
 0x868   :  { %v4415_v59 = vadd.f32 %v4414_v37, %v7962_v6 }
 0x86b   :  { %v4467_v35 = vpop.f32.mrf.mxu3 }
 0x86c   :  { %v4468_v20 = vadd.f32 %v4467_v35, %v4395_v63 }
 0x86e   :  { %4513 = vst.msk [vmem:[%s8099_s3 + $0x68] sm:$0xff] %vm4499_vm4, %v4468_v20 }
 0x86f   :  { %v4417_v49 = vpop.f32.mrf.mxu0 }
 0x870   :  { %v4418_v27 = vadd.f32 %v4417_v49, %v7962_v6 }
 0x873   :  { %v4470_v14 = vpop.f32.mrf.mxu3 }
 0x874   :  { %v4471_v60 = vadd.f32 %v4470_v14, %v4398_v36 }
 0x876   :  { %4514 = vst.msk [vmem:[%s8099_s3 + $0x70] sm:$0xff] %vm4499_vm4, %v4471_v60 }
 0x877   :  { %v4419_v47 = vpop.f32.mrf.mxu0 }
 0x878   :  { %v4420_v7 = vadd.f32 %v4419_v47, %v7962_v6 }
 0x87b   :  { %v4472_v54 = vpop.f32.mrf.mxu3 }
 0x87c   :  { %v4473_v23 = vadd.f32 %v4472_v54, %v4400_v46 }
 0x87e   :  { %4515 = vst.msk [vmem:[%s8099_s3 + $0x78] sm:$0xff] %vm4499_vm4, %v4473_v23 }
 0x87f   :  { %v4422_v19 = vpop.f32.mrf.mxu0 }
 0x880   :  { %v4423_v15 = vadd.f32 %v4422_v19, %v7962_v6 }
 0x883   :  { %v4475_v32 = vpop.f32.mrf.mxu3 }
 0x884   :  { %v4476_v42 = vadd.f32 %v4475_v32, %v4403_v10 }
 0x886   :  { %4516 = vst.msk [vmem:[%s8099_s3 + $0x80] sm:$0xff] %vm4499_vm4, %v4476_v42 }
 0x887   :  { %v4424_v55 = vpop.f32.mrf.mxu0 }
 0x88b   :  { %v4477_v56 = vpop.f32.mrf.mxu3 }
 0x88c   :  { %v4478_v33 = vadd.f32 %v4477_v56, %v4405_v5 }
 0x88e   :  { %4517 = vst.msk [vmem:[%s8099_s3 + $0x88] sm:$0xff] %vm4499_vm4, %v4478_v33 }
 0x893   :  { %v4480_v53 = vpop.f32.mrf.mxu3 }
 0x894   :  { %v4481_v18 = vadd.f32 %v4480_v53, %v4408_v48 }
 0x896   :  { %4518 = vst.msk [vmem:[%s8099_s3 + $0x90] sm:$0xff] %vm4499_vm4, %v4481_v18 }
 0x89b   :  { %v4482_v8 = vpop.f32.mrf.mxu3 }
 0x89c   :  { %v4483_v29 = vadd.f32 %v4482_v8, %v4410_v50 }
 0x89e   :  { %4519 = vst.msk [vmem:[%s8099_s3 + $0x98] sm:$0xff] %vm4499_vm4, %v4483_v29 }
 0x8a3   :  { %v4485_v45 = vpop.f32.mrf.mxu3 }
 0x8a4   :  { %v4486_v34 = vadd.f32 %v4485_v45, %v4413_v31 }
 0x8a6   :  { %4520 = vst.msk [vmem:[%s8099_s3 + $0xa0] sm:$0xff] %vm4499_vm4, %v4486_v34 }
 0x8ab   :  { %v4487_v12 = vpop.f32.mrf.mxu3 }
 0x8ac   :  { %v4488_v62 = vadd.f32 %v4487_v12, %v4415_v59 }
 0x8ae   :  { %4521 = vst.msk [vmem:[%s8099_s3 + $0xa8] sm:$0xff] %vm4499_vm4, %v4488_v62 }
 0x8b3   :  { %v4490_v44 = vpop.f32.mrf.mxu3 }
 0x8b4   :  { %v4491_v41 = vadd.f32 %v4490_v44, %v4418_v27 }
 0x8b6   :  { %4522 = vst.msk [vmem:[%s8099_s3 + $0xb0] sm:$0xff] %vm4499_vm4, %v4491_v41 }
 0x8bb   :  { %v4492_v28 = vpop.f32.mrf.mxu3 }
 0x8bc   :  { %v4493_v17 = vadd.f32 %v4492_v28, %v4420_v7 }
 0x8be   :  { %4523 = vst.msk [vmem:[%s8099_s3 + $0xb8] sm:$0xff] %vm4499_vm4, %v4493_v17 }
 0x8c3   :  { %v4495_v57 = vpop.f32.mrf.mxu3 }
 0x8c4   :  { %v4496_v30 = vadd.f32 %v4495_v57, %v4423_v15 }
 0x8c6   :  { %4524 = vst.msk [vmem:[%s8099_s3 + $0xc0] sm:$0xff] %vm4499_vm4, %v4496_v30 }
 0x8cb   :  { %v4497_v1 = vpop.f32.mrf.mxu3 }
 0x8cc   :  { %4529 = vsyncpa [#allocation3], 1 }

</bundles_post_ra>
